<compile_context>
chip_gen: v7x
topology: tpu7x:2x2x1
jax: 0.10.0
libtpu: 0.0.40
codegen_flags: <defaults>
</compile_context>

<pallas_src>
import functools

import jax
import jax.numpy as jnp
from jax import lax
from jax.experimental import pallas as pl
from jax.experimental.pallas import tpu as pltpu

LRELU_SLOPE = 0.2
BN_EPS = 1e-5
KW = 4             # conv kernel size
PADW = 2           # int(ceil((4 - 1) / 2))
LANE = 128         # TPU lane width


def _round_up(x, m):
    return (x + m - 1) // m * m


# ---------------------------------------------------------------------------
# Pallas kernels (one grid step == one scale; the whole layer tile is in VMEM)
# ---------------------------------------------------------------------------
def _conv_bias_act_kernel(p_ref, w_ref, b_ref, o_ref, *, use_act):
    """Conv-as-matmul (bf16 operands, f32 accumulation) + bias (+ LeakyReLU)."""
    y = jnp.dot(p_ref[0], w_ref[0], preferred_element_type=jnp.float32)
    y = y + b_ref[0]
    if use_act:
        y = jnp.where(y > 0, y, LRELU_SLOPE * y)
    o_ref[0] = y.astype(o_ref.dtype)


def _conv_bn_act_kernel(cnt_ref, p_ref, w_ref, g_ref, beta_ref, o_ref):
    """Conv-as-matmul + training-mode BatchNorm (exact batch stats) + LeakyReLU.

    cnt_ref[s] is the TRUE number of rows (N*Ho*Wo) for this scale.  Padded
    patch rows produce exactly 0 conv output (no bias), so the plain row sum
    equals the valid-row sum; the variance uses masked centered values.
    """
    s = pl.program_id(0)
    cnt = cnt_ref[s]
    y = jnp.dot(p_ref[0], w_ref[0], preferred_element_type=jnp.float32)
    inv_n = 1.0 / cnt.astype(jnp.float32)
    mean = jnp.sum(y, axis=0, keepdims=True) * inv_n
    rows = lax.broadcasted_iota(jnp.int32, y.shape, 0)
    valid = (rows < cnt).astype(jnp.float32)
    yc = (y - mean) * valid
    var = jnp.sum(yc * yc, axis=0, keepdims=True) * inv_n
    ynorm = (y - mean) * lax.rsqrt(var + BN_EPS) * g_ref[0] + beta_ref[0]
    act = jnp.where(ynorm > 0, ynorm, LRELU_SLOPE * ynorm)
    o_ref[0] = act.astype(o_ref.dtype)


# ---------------------------------------------------------------------------
# pallas_call wrappers (batched over scales along axis 0)
# ---------------------------------------------------------------------------
def conv_bias_act(patches, w, b, *, use_act, out_dtype):
    s_dim, p_pad, k_pad = patches.shape
    c_pad = w.shape[-1]
    kern = functools.partial(_conv_bias_act_kernel, use_act=use_act)
    return pl.pallas_call(
        kern,
        out_shape=jax.ShapeDtypeStruct((s_dim, p_pad, c_pad), out_dtype),
        grid=(s_dim,),
        in_specs=[
            pl.BlockSpec((1, p_pad, k_pad), lambda s: (s, 0, 0)),
            pl.BlockSpec((1, k_pad, c_pad), lambda s: (s, 0, 0)),
            pl.BlockSpec((1, 1, c_pad), lambda s: (s, 0, 0)),
        ],
        out_specs=pl.BlockSpec((1, p_pad, c_pad), lambda s: (s, 0, 0)),
        compiler_params=pltpu.CompilerParams(dimension_semantics=("parallel",)),
    )(patches, w, b)


def conv_bn_act(patches, w, gamma, beta, counts, *, out_dtype):
    s_dim, p_pad, k_pad = patches.shape
    c_pad = w.shape[-1]
    return pl.pallas_call(
        _conv_bn_act_kernel,
        out_shape=jax.ShapeDtypeStruct((s_dim, p_pad, c_pad), out_dtype),
        grid_spec=pltpu.PrefetchScalarGridSpec(
            num_scalar_prefetch=1,              # per-scale true row counts (SMEM)
            grid=(s_dim,),
            in_specs=[
                pl.BlockSpec((1, p_pad, k_pad), lambda s, cnt: (s, 0, 0)),
                pl.BlockSpec((1, k_pad, c_pad), lambda s, cnt: (s, 0, 0)),
                pl.BlockSpec((1, 1, c_pad), lambda s, cnt: (s, 0, 0)),
                pl.BlockSpec((1, 1, c_pad), lambda s, cnt: (s, 0, 0)),
            ],
            out_specs=pl.BlockSpec((1, p_pad, c_pad), lambda s, cnt: (s, 0, 0)),
        ),
        compiler_params=pltpu.CompilerParams(dimension_semantics=("parallel",)),
    )(counts, patches, w, gamma, beta)


# ---------------------------------------------------------------------------
# XLA-side glue: downsample, im2col, parameters
# ---------------------------------------------------------------------------
def avgpool_3x3_s2(x_nhwc):
    """nn.AvgPool2d(3, stride=2, padding=1, count_include_pad=False), NHWC.

    Kept in XLA (lax.reduce_window): with C=4 a Pallas kernel would be
    lane-sparse and launch-bound (perf review recommendation).
    """
    dims, strides = (1, 3, 3, 1), (1, 2, 2, 1)
    pads = ((0, 0), (1, 1), (1, 1), (0, 0))
    sums = lax.reduce_window(x_nhwc, 0.0, lax.add, dims, strides, pads)
    cnts = lax.reduce_window(jnp.ones_like(x_nhwc), 0.0, lax.add, dims, strides, pads)
    return sums / cnts


def _im2col(x_nhwc, stride):
    """NHWC -> (N*Ho*Wo, KW*KW*C) patch matrix (PyTorch Conv2d arithmetic)."""
    n, h, w, c = x_nhwc.shape
    ho = (h + 2 * PADW - KW) // stride + 1
    wo = (w + 2 * PADW - KW) // stride + 1
    xp = jnp.pad(x_nhwc, ((0, 0), (PADW, PADW), (PADW, PADW), (0, 0)))
    cols = []
    for i in range(KW):
        for j in range(KW):
            cols.append(xp[:, i:i + stride * (ho - 1) + 1:stride,
                           j:j + stride * (wo - 1) + 1:stride, :])
    patches = jnp.concatenate(cols, axis=-1).reshape(n * ho * wo, KW * KW * c)
    return patches, ho, wo


def layer_specs(input_nc, ndf, n_layers):
    """(cin, cout, stride, use_bn, use_act) per conv layer of NLayerDiscriminator."""
    specs = [(input_nc, ndf, 2, False, True)]
    nf = ndf
    for _ in range(1, n_layers):
        nf_prev, nf = nf, min(nf * 2, 512)
        specs.append((nf_prev, nf, 2, True, True))
    nf_prev, nf = nf, min(nf * 2, 512)
    specs.append((nf_prev, nf, 1, True, True))
    specs.append((nf, 1, 1, False, False))
    return specs


def init_params(key, input_nc, ndf, n_layers, num_D):
    """Per-layer-index parameter stacks, batched over the num_D scales.

    Axis 0 follows *forward position* order: position i uses the weights of
    NLayerDiscriminator index (num_D - 1 - i), matching the PyTorch forward.

    Weight layout is (kh, kw, cin) flattened to (K, cout); real PyTorch
    Conv2d weights (cout, cin, kh, kw) would need permuting before flattening.
    """
    specs = layer_specs(input_nc, ndf, n_layers)
    per_netd = []
    for _ in range(num_D):
        net = []
        for (cin, cout, _stride, _bn, _act) in specs:
            key, wk, bk = jax.random.split(key, 3)
            k_true = KW * KW * cin
            bound = 1.0 / float(k_true) ** 0.5
            w = jax.random.uniform(wk, (k_true, cout), jnp.float32, -bound, bound)
            b = jax.random.uniform(bk, (1, cout), jnp.float32, -bound, bound)
            net.append((w, b))
        per_netd.append(net)

    layers = []
    for li, (cin, cout, stride, use_bn, use_act) in enumerate(specs):
        k_true = KW * KW * cin
        k_pad = _round_up(k_true, LANE)
        c_pad = _round_up(cout, LANE)
        w_stack, b_stack = [], []
        for pos in range(num_D):
            w, b = per_netd[num_D - 1 - pos][li]
            w_stack.append(jnp.zeros((k_pad, c_pad), jnp.float32)
                           .at[:k_true, :cout].set(w))
            b_stack.append(jnp.zeros((1, c_pad), jnp.float32)
                           .at[:, :cout].set(b))
        layers.append(dict(
            w=jnp.stack(w_stack).astype(jnp.bfloat16),       # (num_D, K_pad, C_pad)
            b=jnp.stack(b_stack),                            # (num_D, 1, C_pad) f32
            gamma=jnp.ones((num_D, 1, c_pad), jnp.float32),
            beta=jnp.zeros((num_D, 1, c_pad), jnp.float32),
            stride=stride, use_bn=use_bn, use_act=use_act,
            cout=cout, k_pad=k_pad))
    return layers, key


# ---------------------------------------------------------------------------
# Module forward
# ---------------------------------------------------------------------------
def multiscale_discriminator_forward(layers, x_nchw, num_D):
    """MultiscaleDiscriminator.forward (getIntermFeat=False, use_sigmoid=False).

    Returns: list (length num_D) of single-element lists of NCHW outputs,
    ordered like the PyTorch module (coarse-index netD on full-res input first).
    """
    x = jnp.transpose(x_nchw, (0, 2, 3, 1)).astype(jnp.float32)   # NCHW -> NHWC
    acts = [x]
    for _ in range(num_D - 1):
        acts.append(avgpool_3x3_s2(acts[-1]))                     # chained downsample

    n_layers_total = len(layers)
    for li, p in enumerate(layers):
        pat_list, metas = [], []
        for a in acts:
            pats, ho, wo = _im2col(a, p["stride"])
            pat_list.append(pats)
            metas.append((a.shape[0], ho, wo, pats.shape[0]))
        p_pad = _round_up(max(m[3] for m in metas), 16)
        k_pad = p["k_pad"]
        patches = jnp.stack([
            jnp.pad(q, ((0, p_pad - q.shape[0]), (0, k_pad - q.shape[1])))
            for q in pat_list]).astype(jnp.bfloat16)               # (num_D, P_pad, K_pad)

        out_dtype = jnp.float32 if li == n_layers_total - 1 else jnp.bfloat16
        if p["use_bn"]:
            counts = jnp.asarray([m[3] for m in metas], jnp.int32)
            out = conv_bn_act(patches, p["w"], p["gamma"], p["beta"], counts,
                              out_dtype=out_dtype)
        else:
            out = conv_bias_act(patches, p["w"], p["b"],
                                use_act=p["use_act"], out_dtype=out_dtype)

        acts = [out[i, :m[3], :p["cout"]].reshape(m[0], m[1], m[2], p["cout"])
                for i, m in enumerate(metas)]

    return [[jnp.transpose(a, (0, 3, 1, 2))] for a in acts]        # back to NCHW


# ---------------------------------------------------------------------------
if __name__ == "__main__":
    # Small synthetic configuration.
    input_nc, ndf, n_layers, num_D = 4, 8, 3, 3
    N, H, W = 2, 16, 16

    key = jax.random.PRNGKey(0)
    key, xkey = jax.random.split(key)
    x = jax.random.normal(xkey, (N, input_nc, H, W), jnp.float32)

    layers, key = init_params(key, input_nc, ndf, n_layers, num_D)

    # TODO(synk): BatchNorm running_mean/running_var buffer updates (in-place
    # module state) are not replicated; only the training-mode forward output
    # (batch statistics) is computed, matching the module before any .eval().
    forward = jax.jit(functools.partial(multiscale_discriminator_forward,
                                        layers, num_D=num_D))
    result = forward(x)

    for scale_outputs in result:
        for arr in scale_outputs:
            jax.block_until_ready(arr)

    print("KERNEL_OK")
</pallas_src>

<mosaic_0001>
module attributes {stable_mosaic.version = 11 : i64} {
  func.func @_conv_bias_act_kernel(%arg0: i32, %arg1: memref<1x176x128xbf16, #tpu.memory_space<vmem>>, %arg2: memref<1x128x128xbf16, #tpu.memory_space<vmem>>, %arg3: memref<1x1x128xf32, #tpu.memory_space<vmem>>, %arg4: memref<1x176x128xbf16, #tpu.memory_space<vmem>>) attributes {dimension_semantics = [#tpu.dimension_semantics<parallel>], iteration_bounds = array<i64: 3>, scalar_prefetch = 0 : i64, scratch_operands = 0 : i64, tpu.core_type = #tpu.core_type<tc>, window_params = [{transform_indices = @transform_0, window_bounds = array<i64: 1, 176, 128>}, {transform_indices = @transform_1, window_bounds = array<i64: 1, 128, 128>}, {transform_indices = @transform_2, window_bounds = array<i64: 1, 1, 128>}, {transform_indices = @transform_3, window_bounds = array<i64: 1, 176, 128>}]} {
    %c0 = arith.constant 0 : index
    %c0_0 = arith.constant 0 : index
    %c0_1 = arith.constant 0 : index
    %0 = vector.load %arg1[%c0, %c0_0, %c0_1] : memref<1x176x128xbf16, #tpu.memory_space<vmem>>, vector<1x176x128xbf16>
    %1 = vector.shape_cast %0 : vector<1x176x128xbf16> to vector<176x128xbf16>
    %c0_2 = arith.constant 0 : index
    %c0_3 = arith.constant 0 : index
    %c0_4 = arith.constant 0 : index
    %2 = vector.load %arg2[%c0_2, %c0_3, %c0_4] : memref<1x128x128xbf16, #tpu.memory_space<vmem>>, vector<1x128x128xbf16>
    %3 = vector.shape_cast %2 : vector<1x128x128xbf16> to vector<128x128xbf16>
    %cst = arith.constant dense<0.000000e+00> : vector<176x128xf32>
    %4 = tpu.matmul %1, %3, %cst {dimension_numbers = #tpu.dot_dimension_numbers<[1], [0], [0], [1], [0, 0, 1, 1], [], []>} : vector<176x128xbf16>, vector<128x128xbf16>, vector<176x128xf32> -> vector<176x128xf32>
    %c0_5 = arith.constant 0 : index
    %c0_6 = arith.constant 0 : index
    %c0_7 = arith.constant 0 : index
    %5 = vector.load %arg3[%c0_5, %c0_6, %c0_7] : memref<1x1x128xf32, #tpu.memory_space<vmem>>, vector<1x1x128xf32>
    %6 = vector.shape_cast %5 : vector<1x1x128xf32> to vector<1x128xf32>
    %7 = vector.broadcast %6 : vector<1x128xf32> to vector<176x128xf32>
    %8 = arith.addf %4, %7 : vector<176x128xf32>
    %cst_8 = arith.constant 0.000000e+00 : f32
    %9 = vector.broadcast %cst_8 : f32 to vector<176x128xf32>
    %10 = arith.cmpf ogt, %8, %9 : vector<176x128xf32>
    %cst_9 = arith.constant 2.000000e-01 : f32
    %11 = vector.broadcast %cst_9 : f32 to vector<176x128xf32>
    %12 = arith.mulf %11, %8 : vector<176x128xf32>
    %13 = arith.select %10, %8, %12 : vector<176x128xi1>, vector<176x128xf32>
    %14 = arith.truncf %13 : vector<176x128xf32> to vector<176x128xbf16>
    %c0_10 = arith.constant 0 : index
    %c0_11 = arith.constant 0 : index
    %c0_12 = arith.constant 0 : index
    %15 = vector.load %arg4[%c0_10, %c0_11, %c0_12] : memref<1x176x128xbf16, #tpu.memory_space<vmem>>, vector<1x176x128xbf16>
    %16 = vector.shape_cast %15 : vector<1x176x128xbf16> to vector<176x128xbf16>
    %17 = vector.shape_cast %14 : vector<176x128xbf16> to vector<1x176x128xbf16>
    tpu.vector_store %arg4[%c0_10, %c0_11, %c0_12], %17 {strides = array<i32>} : memref<1x176x128xbf16, #tpu.memory_space<vmem>>, vector<1x176x128xbf16>,
    return
  }
  func.func @transform_0(%arg0: i32) -> (i32, i32, i32) {
    %c0_i32 = arith.constant 0 : i32
    %c0_i32_0 = arith.constant 0 : i32
    %c0_i32_1 = arith.constant 0 : i32
    return %arg0, %c0_i32, %c0_i32_0 : i32, i32, i32
  }
  func.func @transform_1(%arg0: i32) -> (i32, i32, i32) {
    %c0_i32 = arith.constant 0 : i32
    %c0_i32_0 = arith.constant 0 : i32
    %c0_i32_1 = arith.constant 0 : i32
    return %arg0, %c0_i32, %c0_i32_0 : i32, i32, i32
  }
  func.func @transform_2(%arg0: i32) -> (i32, i32, i32) {
    %c0_i32 = arith.constant 0 : i32
    %c0_i32_0 = arith.constant 0 : i32
    %c0_i32_1 = arith.constant 0 : i32
    return %arg0, %c0_i32, %c0_i32_0 : i32, i32, i32
  }
  func.func @transform_3(%arg0: i32) -> (i32, i32, i32) {
    %c0_i32 = arith.constant 0 : i32
    %c0_i32_0 = arith.constant 0 : i32
    %c0_i32_1 = arith.constant 0 : i32
    return %arg0, %c0_i32, %c0_i32_0 : i32, i32, i32
  }
}

module attributes {stable_mosaic.version = 11 : i64} {
  func.func @_conv_bn_act_kernel(%arg0: i32, %arg1: memref<3xi32, #tpu.memory_space<smem>>, %arg2: memref<1x64x128xbf16, #tpu.memory_space<vmem>>, %arg3: memref<1x128x128xbf16, #tpu.memory_space<vmem>>, %arg4: memref<1x1x128xf32, #tpu.memory_space<vmem>>, %arg5: memref<1x1x128xf32, #tpu.memory_space<vmem>>, %arg6: memref<1x64x128xbf16, #tpu.memory_space<vmem>>) attributes {dimension_semantics = [#tpu.dimension_semantics<parallel>], iteration_bounds = array<i64: 3>, scalar_prefetch = 1 : i64, scratch_operands = 0 : i64, tpu.core_type = #tpu.core_type<tc>, window_params = [{transform_indices = @transform_0, window_bounds = array<i64: 1, 64, 128>}, {transform_indices = @transform_1, window_bounds = array<i64: 1, 128, 128>}, {transform_indices = @transform_2, window_bounds = array<i64: 1, 1, 128>}, {transform_indices = @transform_3, window_bounds = array<i64: 1, 1, 128>}, {transform_indices = @transform_4, window_bounds = array<i64: 1, 64, 128>}]} {
    %0 = arith.index_cast %arg0 : i32 to index
    %1 = memref.load %arg1[%0] : memref<3xi32, #tpu.memory_space<smem>>
    %c0 = arith.constant 0 : index
    %c0_0 = arith.constant 0 : index
    %c0_1 = arith.constant 0 : index
    %2 = vector.load %arg2[%c0, %c0_0, %c0_1] : memref<1x64x128xbf16, #tpu.memory_space<vmem>>, vector<1x64x128xbf16>
    %3 = vector.shape_cast %2 : vector<1x64x128xbf16> to vector<64x128xbf16>
    %c0_2 = arith.constant 0 : index
    %c0_3 = arith.constant 0 : index
    %c0_4 = arith.constant 0 : index
    %4 = vector.load %arg3[%c0_2, %c0_3, %c0_4] : memref<1x128x128xbf16, #tpu.memory_space<vmem>>, vector<1x128x128xbf16>
    %5 = vector.shape_cast %4 : vector<1x128x128xbf16> to vector<128x128xbf16>
    %cst = arith.constant dense<0.000000e+00> : vector<64x128xf32>
    %6 = tpu.matmul %3, %5, %cst {dimension_numbers = #tpu.dot_dimension_numbers<[1], [0], [0], [1], [0, 0, 1, 1], [], []>} : vector<64x128xbf16>, vector<128x128xbf16>, vector<64x128xf32> -> vector<64x128xf32>
    %7 = arith.sitofp %1 : i32 to f32
    %cst_5 = arith.constant 1.000000e+00 : f32
    %8 = arith.divf %cst_5, %7 : f32
    %cst_6 = arith.constant dense<0.000000e+00> : vector<128xf32>
    %9 = vector.multi_reduction <add>, %6, %cst_6 [0] : vector<64x128xf32> to vector<128xf32>
    %10 = vector.shape_cast %9 : vector<128xf32> to vector<1x128xf32>
    %11 = vector.broadcast %8 : f32 to vector<1x128xf32>
    %12 = arith.mulf %10, %11 : vector<1x128xf32>
    %13 = tpu.iota {dimensions = array<i32: 0>} : vector<64x128xi32>
    %14 = vector.broadcast %1 : i32 to vector<64x128xi32>
    %15 = arith.cmpi slt, %13, %14 : vector<64x128xi32>
    %16 = arith.extui %15 : vector<64x128xi1> to vector<64x128xi32>
    %17 = arith.sitofp %16 : vector<64x128xi32> to vector<64x128xf32>
    %18 = vector.broadcast %12 : vector<1x128xf32> to vector<64x128xf32>
    %19 = arith.subf %6, %18 : vector<64x128xf32>
    %20 = arith.mulf %19, %17 : vector<64x128xf32>
    %21 = arith.mulf %20, %20 : vector<64x128xf32>
    %cst_7 = arith.constant dense<0.000000e+00> : vector<128xf32>
    %22 = vector.multi_reduction <add>, %21, %cst_7 [0] : vector<64x128xf32> to vector<128xf32>
    %23 = vector.shape_cast %22 : vector<128xf32> to vector<1x128xf32>
    %24 = vector.broadcast %8 : f32 to vector<1x128xf32>
    %25 = arith.mulf %23, %24 : vector<1x128xf32>
    %26 = vector.broadcast %12 : vector<1x128xf32> to vector<64x128xf32>
    %27 = arith.subf %6, %26 : vector<64x128xf32>
    %cst_8 = arith.constant 9.99999974E-6 : f32
    %28 = vector.broadcast %cst_8 : f32 to vector<1x128xf32>
    %29 = arith.addf %25, %28 : vector<1x128xf32>
    %30 = math.rsqrt %29 : vector<1x128xf32>
    %31 = vector.broadcast %30 : vector<1x128xf32> to vector<64x128xf32>
    %32 = arith.mulf %27, %31 : vector<64x128xf32>
    %c0_9 = arith.constant 0 : index
    %c0_10 = arith.constant 0 : index
    %c0_11 = arith.constant 0 : index
    %33 = vector.load %arg4[%c0_9, %c0_10, %c0_11] : memref<1x1x128xf32, #tpu.memory_space<vmem>>, vector<1x1x128xf32>
    %34 = vector.shape_cast %33 : vector<1x1x128xf32> to vector<1x128xf32>
    %35 = vector.broadcast %34 : vector<1x128xf32> to vector<64x128xf32>
    %36 = arith.mulf %32, %35 : vector<64x128xf32>
    %c0_12 = arith.constant 0 : index
    %c0_13 = arith.constant 0 : index
    %c0_14 = arith.constant 0 : index
    %37 = vector.load %arg5[%c0_12, %c0_13, %c0_14] : memref<1x1x128xf32, #tpu.memory_space<vmem>>, vector<1x1x128xf32>
    %38 = vector.shape_cast %37 : vector<1x1x128xf32> to vector<1x128xf32>
    %39 = vector.broadcast %38 : vector<1x128xf32> to vector<64x128xf32>
    %40 = arith.addf %36, %39 : vector<64x128xf32>
    %cst_15 = arith.constant 0.000000e+00 : f32
    %41 = vector.broadcast %cst_15 : f32 to vector<64x128xf32>
    %42 = arith.cmpf ogt, %40, %41 : vector<64x128xf32>
    %cst_16 = arith.constant 2.000000e-01 : f32
    %43 = vector.broadcast %cst_16 : f32 to vector<64x128xf32>
    %44 = arith.mulf %43, %40 : vector<64x128xf32>
    %45 = arith.select %42, %40, %44 : vector<64x128xi1>, vector<64x128xf32>
    %46 = arith.truncf %45 : vector<64x128xf32> to vector<64x128xbf16>
    %c0_17 = arith.constant 0 : index
    %c0_18 = arith.constant 0 : index
    %c0_19 = arith.constant 0 : index
    %47 = vector.load %arg6[%c0_17, %c0_18, %c0_19] : memref<1x64x128xbf16, #tpu.memory_space<vmem>>, vector<1x64x128xbf16>
    %48 = vector.shape_cast %47 : vector<1x64x128xbf16> to vector<64x128xbf16>
    %49 = vector.shape_cast %46 : vector<64x128xbf16> to vector<1x64x128xbf16>
    tpu.vector_store %arg6[%c0_17, %c0_18, %c0_19], %49 {strides = array<i32>} : memref<1x64x128xbf16, #tpu.memory_space<vmem>>, vector<1x64x128xbf16>,
    return
  }
  func.func @transform_0(%arg0: i32, %arg1: memref<3xi32, #tpu.memory_space<smem>>) -> (i32, i32, i32) {
    %c0_i32 = arith.constant 0 : i32
    %c0_i32_0 = arith.constant 0 : i32
    %c0_i32_1 = arith.constant 0 : i32
    return %arg0, %c0_i32, %c0_i32_0 : i32, i32, i32
  }
  func.func @transform_1(%arg0: i32, %arg1: memref<3xi32, #tpu.memory_space<smem>>) -> (i32, i32, i32) {
    %c0_i32 = arith.constant 0 : i32
    %c0_i32_0 = arith.constant 0 : i32
    %c0_i32_1 = arith.constant 0 : i32
    return %arg0, %c0_i32, %c0_i32_0 : i32, i32, i32
  }
  func.func @transform_2(%arg0: i32, %arg1: memref<3xi32, #tpu.memory_space<smem>>) -> (i32, i32, i32) {
    %c0_i32 = arith.constant 0 : i32
    %c0_i32_0 = arith.constant 0 : i32
    %c0_i32_1 = arith.constant 0 : i32
    return %arg0, %c0_i32, %c0_i32_0 : i32, i32, i32
  }
  func.func @transform_3(%arg0: i32, %arg1: memref<3xi32, #tpu.memory_space<smem>>) -> (i32, i32, i32) {
    %c0_i32 = arith.constant 0 : i32
    %c0_i32_0 = arith.constant 0 : i32
    %c0_i32_1 = arith.constant 0 : i32
    return %arg0, %c0_i32, %c0_i32_0 : i32, i32, i32
  }
  func.func @transform_4(%arg0: i32, %arg1: memref<3xi32, #tpu.memory_space<smem>>) -> (i32, i32, i32) {
    %c0_i32 = arith.constant 0 : i32
    %c0_i32_0 = arith.constant 0 : i32
    %c0_i32_1 = arith.constant 0 : i32
    return %arg0, %c0_i32, %c0_i32_0 : i32, i32, i32
  }
}

module attributes {stable_mosaic.version = 11 : i64} {
  func.func @_conv_bn_act_kernel(%arg0: i32, %arg1: memref<3xi32, #tpu.memory_space<smem>>, %arg2: memref<1x32x256xbf16, #tpu.memory_space<vmem>>, %arg3: memref<1x256x128xbf16, #tpu.memory_space<vmem>>, %arg4: memref<1x1x128xf32, #tpu.memory_space<vmem>>, %arg5: memref<1x1x128xf32, #tpu.memory_space<vmem>>, %arg6: memref<1x32x128xbf16, #tpu.memory_space<vmem>>) attributes {dimension_semantics = [#tpu.dimension_semantics<parallel>], iteration_bounds = array<i64: 3>, scalar_prefetch = 1 : i64, scratch_operands = 0 : i64, tpu.core_type = #tpu.core_type<tc>, window_params = [{transform_indices = @transform_0, window_bounds = array<i64: 1, 32, 256>}, {transform_indices = @transform_1, window_bounds = array<i64: 1, 256, 128>}, {transform_indices = @transform_2, window_bounds = array<i64: 1, 1, 128>}, {transform_indices = @transform_3, window_bounds = array<i64: 1, 1, 128>}, {transform_indices = @transform_4, window_bounds = array<i64: 1, 32, 128>}]} {
    %0 = arith.index_cast %arg0 : i32 to index
    %1 = memref.load %arg1[%0] : memref<3xi32, #tpu.memory_space<smem>>
    %c0 = arith.constant 0 : index
    %c0_0 = arith.constant 0 : index
    %c0_1 = arith.constant 0 : index
    %2 = vector.load %arg2[%c0, %c0_0, %c0_1] : memref<1x32x256xbf16, #tpu.memory_space<vmem>>, vector<1x32x256xbf16>
    %3 = vector.shape_cast %2 : vector<1x32x256xbf16> to vector<32x256xbf16>
    %c0_2 = arith.constant 0 : index
    %c0_3 = arith.constant 0 : index
    %c0_4 = arith.constant 0 : index
    %4 = vector.load %arg3[%c0_2, %c0_3, %c0_4] : memref<1x256x128xbf16, #tpu.memory_space<vmem>>, vector<1x256x128xbf16>
    %5 = vector.shape_cast %4 : vector<1x256x128xbf16> to vector<256x128xbf16>
    %cst = arith.constant dense<0.000000e+00> : vector<32x128xf32>
    %6 = tpu.matmul %3, %5, %cst {dimension_numbers = #tpu.dot_dimension_numbers<[1], [0], [0], [1], [0, 0, 1, 1], [], []>} : vector<32x256xbf16>, vector<256x128xbf16>, vector<32x128xf32> -> vector<32x128xf32>
    %7 = arith.sitofp %1 : i32 to f32
    %cst_5 = arith.constant 1.000000e+00 : f32
    %8 = arith.divf %cst_5, %7 : f32
    %cst_6 = arith.constant dense<0.000000e+00> : vector<128xf32>
    %9 = vector.multi_reduction <add>, %6, %cst_6 [0] : vector<32x128xf32> to vector<128xf32>
    %10 = vector.shape_cast %9 : vector<128xf32> to vector<1x128xf32>
    %11 = vector.broadcast %8 : f32 to vector<1x128xf32>
    %12 = arith.mulf %10, %11 : vector<1x128xf32>
    %13 = tpu.iota {dimensions = array<i32: 0>} : vector<32x128xi32>
    %14 = vector.broadcast %1 : i32 to vector<32x128xi32>
    %15 = arith.cmpi slt, %13, %14 : vector<32x128xi32>
    %16 = arith.extui %15 : vector<32x128xi1> to vector<32x128xi32>
    %17 = arith.sitofp %16 : vector<32x128xi32> to vector<32x128xf32>
    %18 = vector.broadcast %12 : vector<1x128xf32> to vector<32x128xf32>
    %19 = arith.subf %6, %18 : vector<32x128xf32>
    %20 = arith.mulf %19, %17 : vector<32x128xf32>
    %21 = arith.mulf %20, %20 : vector<32x128xf32>
    %cst_7 = arith.constant dense<0.000000e+00> : vector<128xf32>
    %22 = vector.multi_reduction <add>, %21, %cst_7 [0] : vector<32x128xf32> to vector<128xf32>
    %23 = vector.shape_cast %22 : vector<128xf32> to vector<1x128xf32>
    %24 = vector.broadcast %8 : f32 to vector<1x128xf32>
    %25 = arith.mulf %23, %24 : vector<1x128xf32>
    %26 = vector.broadcast %12 : vector<1x128xf32> to vector<32x128xf32>
    %27 = arith.subf %6, %26 : vector<32x128xf32>
    %cst_8 = arith.constant 9.99999974E-6 : f32
    %28 = vector.broadcast %cst_8 : f32 to vector<1x128xf32>
    %29 = arith.addf %25, %28 : vector<1x128xf32>
    %30 = math.rsqrt %29 : vector<1x128xf32>
    %31 = vector.broadcast %30 : vector<1x128xf32> to vector<32x128xf32>
    %32 = arith.mulf %27, %31 : vector<32x128xf32>
    %c0_9 = arith.constant 0 : index
    %c0_10 = arith.constant 0 : index
    %c0_11 = arith.constant 0 : index
    %33 = vector.load %arg4[%c0_9, %c0_10, %c0_11] : memref<1x1x128xf32, #tpu.memory_space<vmem>>, vector<1x1x128xf32>
    %34 = vector.shape_cast %33 : vector<1x1x128xf32> to vector<1x128xf32>
    %35 = vector.broadcast %34 : vector<1x128xf32> to vector<32x128xf32>
    %36 = arith.mulf %32, %35 : vector<32x128xf32>
    %c0_12 = arith.constant 0 : index
    %c0_13 = arith.constant 0 : index
    %c0_14 = arith.constant 0 : index
    %37 = vector.load %arg5[%c0_12, %c0_13, %c0_14] : memref<1x1x128xf32, #tpu.memory_space<vmem>>, vector<1x1x128xf32>
    %38 = vector.shape_cast %37 : vector<1x1x128xf32> to vector<1x128xf32>
    %39 = vector.broadcast %38 : vector<1x128xf32> to vector<32x128xf32>
    %40 = arith.addf %36, %39 : vector<32x128xf32>
    %cst_15 = arith.constant 0.000000e+00 : f32
    %41 = vector.broadcast %cst_15 : f32 to vector<32x128xf32>
    %42 = arith.cmpf ogt, %40, %41 : vector<32x128xf32>
    %cst_16 = arith.constant 2.000000e-01 : f32
    %43 = vector.broadcast %cst_16 : f32 to vector<32x128xf32>
    %44 = arith.mulf %43, %40 : vector<32x128xf32>
    %45 = arith.select %42, %40, %44 : vector<32x128xi1>, vector<32x128xf32>
    %46 = arith.truncf %45 : vector<32x128xf32> to vector<32x128xbf16>
    %c0_17 = arith.constant 0 : index
    %c0_18 = arith.constant 0 : index
    %c0_19 = arith.constant 0 : index
    %47 = vector.load %arg6[%c0_17, %c0_18, %c0_19] : memref<1x32x128xbf16, #tpu.memory_space<vmem>>, vector<1x32x128xbf16>
    %48 = vector.shape_cast %47 : vector<1x32x128xbf16> to vector<32x128xbf16>
    %49 = vector.shape_cast %46 : vector<32x128xbf16> to vector<1x32x128xbf16>
    tpu.vector_store %arg6[%c0_17, %c0_18, %c0_19], %49 {strides = array<i32>} : memref<1x32x128xbf16, #tpu.memory_space<vmem>>, vector<1x32x128xbf16>,
    return
  }
  func.func @transform_0(%arg0: i32, %arg1: memref<3xi32, #tpu.memory_space<smem>>) -> (i32, i32, i32) {
    %c0_i32 = arith.constant 0 : i32
    %c0_i32_0 = arith.constant 0 : i32
    %c0_i32_1 = arith.constant 0 : i32
    return %arg0, %c0_i32, %c0_i32_0 : i32, i32, i32
  }
  func.func @transform_1(%arg0: i32, %arg1: memref<3xi32, #tpu.memory_space<smem>>) -> (i32, i32, i32) {
    %c0_i32 = arith.constant 0 : i32
    %c0_i32_0 = arith.constant 0 : i32
    %c0_i32_1 = arith.constant 0 : i32
    return %arg0, %c0_i32, %c0_i32_0 : i32, i32, i32
  }
  func.func @transform_2(%arg0: i32, %arg1: memref<3xi32, #tpu.memory_space<smem>>) -> (i32, i32, i32) {
    %c0_i32 = arith.constant 0 : i32
    %c0_i32_0 = arith.constant 0 : i32
    %c0_i32_1 = arith.constant 0 : i32
    return %arg0, %c0_i32, %c0_i32_0 : i32, i32, i32
  }
  func.func @transform_3(%arg0: i32, %arg1: memref<3xi32, #tpu.memory_space<smem>>) -> (i32, i32, i32) {
    %c0_i32 = arith.constant 0 : i32
    %c0_i32_0 = arith.constant 0 : i32
    %c0_i32_1 = arith.constant 0 : i32
    return %arg0, %c0_i32, %c0_i32_0 : i32, i32, i32
  }
  func.func @transform_4(%arg0: i32, %arg1: memref<3xi32, #tpu.memory_space<smem>>) -> (i32, i32, i32) {
    %c0_i32 = arith.constant 0 : i32
    %c0_i32_0 = arith.constant 0 : i32
    %c0_i32_1 = arith.constant 0 : i32
    return %arg0, %c0_i32, %c0_i32_0 : i32, i32, i32
  }
}

module attributes {stable_mosaic.version = 11 : i64} {
  func.func @_conv_bn_act_kernel(%arg0: i32, %arg1: memref<3xi32, #tpu.memory_space<smem>>, %arg2: memref<1x32x512xbf16, #tpu.memory_space<vmem>>, %arg3: memref<1x512x128xbf16, #tpu.memory_space<vmem>>, %arg4: memref<1x1x128xf32, #tpu.memory_space<vmem>>, %arg5: memref<1x1x128xf32, #tpu.memory_space<vmem>>, %arg6: memref<1x32x128xbf16, #tpu.memory_space<vmem>>) attributes {dimension_semantics = [#tpu.dimension_semantics<parallel>], iteration_bounds = array<i64: 3>, scalar_prefetch = 1 : i64, scratch_operands = 0 : i64, tpu.core_type = #tpu.core_type<tc>, window_params = [{transform_indices = @transform_0, window_bounds = array<i64: 1, 32, 512>}, {transform_indices = @transform_1, window_bounds = array<i64: 1, 512, 128>}, {transform_indices = @transform_2, window_bounds = array<i64: 1, 1, 128>}, {transform_indices = @transform_3, window_bounds = array<i64: 1, 1, 128>}, {transform_indices = @transform_4, window_bounds = array<i64: 1, 32, 128>}]} {
    %0 = arith.index_cast %arg0 : i32 to index
    %1 = memref.load %arg1[%0] : memref<3xi32, #tpu.memory_space<smem>>
    %c0 = arith.constant 0 : index
    %c0_0 = arith.constant 0 : index
    %c0_1 = arith.constant 0 : index
    %2 = vector.load %arg2[%c0, %c0_0, %c0_1] : memref<1x32x512xbf16, #tpu.memory_space<vmem>>, vector<1x32x512xbf16>
    %3 = vector.shape_cast %2 : vector<1x32x512xbf16> to vector<32x512xbf16>
    %c0_2 = arith.constant 0 : index
    %c0_3 = arith.constant 0 : index
    %c0_4 = arith.constant 0 : index
    %4 = vector.load %arg3[%c0_2, %c0_3, %c0_4] : memref<1x512x128xbf16, #tpu.memory_space<vmem>>, vector<1x512x128xbf16>
    %5 = vector.shape_cast %4 : vector<1x512x128xbf16> to vector<512x128xbf16>
    %cst = arith.constant dense<0.000000e+00> : vector<32x128xf32>
    %6 = tpu.matmul %3, %5, %cst {dimension_numbers = #tpu.dot_dimension_numbers<[1], [0], [0], [1], [0, 0, 1, 1], [], []>} : vector<32x512xbf16>, vector<512x128xbf16>, vector<32x128xf32> -> vector<32x128xf32>
    %7 = arith.sitofp %1 : i32 to f32
    %cst_5 = arith.constant 1.000000e+00 : f32
    %8 = arith.divf %cst_5, %7 : f32
    %cst_6 = arith.constant dense<0.000000e+00> : vector<128xf32>
    %9 = vector.multi_reduction <add>, %6, %cst_6 [0] : vector<32x128xf32> to vector<128xf32>
    %10 = vector.shape_cast %9 : vector<128xf32> to vector<1x128xf32>
    %11 = vector.broadcast %8 : f32 to vector<1x128xf32>
    %12 = arith.mulf %10, %11 : vector<1x128xf32>
    %13 = tpu.iota {dimensions = array<i32: 0>} : vector<32x128xi32>
    %14 = vector.broadcast %1 : i32 to vector<32x128xi32>
    %15 = arith.cmpi slt, %13, %14 : vector<32x128xi32>
    %16 = arith.extui %15 : vector<32x128xi1> to vector<32x128xi32>
    %17 = arith.sitofp %16 : vector<32x128xi32> to vector<32x128xf32>
    %18 = vector.broadcast %12 : vector<1x128xf32> to vector<32x128xf32>
    %19 = arith.subf %6, %18 : vector<32x128xf32>
    %20 = arith.mulf %19, %17 : vector<32x128xf32>
    %21 = arith.mulf %20, %20 : vector<32x128xf32>
    %cst_7 = arith.constant dense<0.000000e+00> : vector<128xf32>
    %22 = vector.multi_reduction <add>, %21, %cst_7 [0] : vector<32x128xf32> to vector<128xf32>
    %23 = vector.shape_cast %22 : vector<128xf32> to vector<1x128xf32>
    %24 = vector.broadcast %8 : f32 to vector<1x128xf32>
    %25 = arith.mulf %23, %24 : vector<1x128xf32>
    %26 = vector.broadcast %12 : vector<1x128xf32> to vector<32x128xf32>
    %27 = arith.subf %6, %26 : vector<32x128xf32>
    %cst_8 = arith.constant 9.99999974E-6 : f32
    %28 = vector.broadcast %cst_8 : f32 to vector<1x128xf32>
    %29 = arith.addf %25, %28 : vector<1x128xf32>
    %30 = math.rsqrt %29 : vector<1x128xf32>
    %31 = vector.broadcast %30 : vector<1x128xf32> to vector<32x128xf32>
    %32 = arith.mulf %27, %31 : vector<32x128xf32>
    %c0_9 = arith.constant 0 : index
    %c0_10 = arith.constant 0 : index
    %c0_11 = arith.constant 0 : index
    %33 = vector.load %arg4[%c0_9, %c0_10, %c0_11] : memref<1x1x128xf32, #tpu.memory_space<vmem>>, vector<1x1x128xf32>
    %34 = vector.shape_cast %33 : vector<1x1x128xf32> to vector<1x128xf32>
    %35 = vector.broadcast %34 : vector<1x128xf32> to vector<32x128xf32>
    %36 = arith.mulf %32, %35 : vector<32x128xf32>
    %c0_12 = arith.constant 0 : index
    %c0_13 = arith.constant 0 : index
    %c0_14 = arith.constant 0 : index
    %37 = vector.load %arg5[%c0_12, %c0_13, %c0_14] : memref<1x1x128xf32, #tpu.memory_space<vmem>>, vector<1x1x128xf32>
    %38 = vector.shape_cast %37 : vector<1x1x128xf32> to vector<1x128xf32>
    %39 = vector.broadcast %38 : vector<1x128xf32> to vector<32x128xf32>
    %40 = arith.addf %36, %39 : vector<32x128xf32>
    %cst_15 = arith.constant 0.000000e+00 : f32
    %41 = vector.broadcast %cst_15 : f32 to vector<32x128xf32>
    %42 = arith.cmpf ogt, %40, %41 : vector<32x128xf32>
    %cst_16 = arith.constant 2.000000e-01 : f32
    %43 = vector.broadcast %cst_16 : f32 to vector<32x128xf32>
    %44 = arith.mulf %43, %40 : vector<32x128xf32>
    %45 = arith.select %42, %40, %44 : vector<32x128xi1>, vector<32x128xf32>
    %46 = arith.truncf %45 : vector<32x128xf32> to vector<32x128xbf16>
    %c0_17 = arith.constant 0 : index
    %c0_18 = arith.constant 0 : index
    %c0_19 = arith.constant 0 : index
    %47 = vector.load %arg6[%c0_17, %c0_18, %c0_19] : memref<1x32x128xbf16, #tpu.memory_space<vmem>>, vector<1x32x128xbf16>
    %48 = vector.shape_cast %47 : vector<1x32x128xbf16> to vector<32x128xbf16>
    %49 = vector.shape_cast %46 : vector<32x128xbf16> to vector<1x32x128xbf16>
    tpu.vector_store %arg6[%c0_17, %c0_18, %c0_19], %49 {strides = array<i32>} : memref<1x32x128xbf16, #tpu.memory_space<vmem>>, vector<1x32x128xbf16>,
    return
  }
  func.func @transform_0(%arg0: i32, %arg1: memref<3xi32, #tpu.memory_space<smem>>) -> (i32, i32, i32) {
    %c0_i32 = arith.constant 0 : i32
    %c0_i32_0 = arith.constant 0 : i32
    %c0_i32_1 = arith.constant 0 : i32
    return %arg0, %c0_i32, %c0_i32_0 : i32, i32, i32
  }
  func.func @transform_1(%arg0: i32, %arg1: memref<3xi32, #tpu.memory_space<smem>>) -> (i32, i32, i32) {
    %c0_i32 = arith.constant 0 : i32
    %c0_i32_0 = arith.constant 0 : i32
    %c0_i32_1 = arith.constant 0 : i32
    return %arg0, %c0_i32, %c0_i32_0 : i32, i32, i32
  }
  func.func @transform_2(%arg0: i32, %arg1: memref<3xi32, #tpu.memory_space<smem>>) -> (i32, i32, i32) {
    %c0_i32 = arith.constant 0 : i32
    %c0_i32_0 = arith.constant 0 : i32
    %c0_i32_1 = arith.constant 0 : i32
    return %arg0, %c0_i32, %c0_i32_0 : i32, i32, i32
  }
  func.func @transform_3(%arg0: i32, %arg1: memref<3xi32, #tpu.memory_space<smem>>) -> (i32, i32, i32) {
    %c0_i32 = arith.constant 0 : i32
    %c0_i32_0 = arith.constant 0 : i32
    %c0_i32_1 = arith.constant 0 : i32
    return %arg0, %c0_i32, %c0_i32_0 : i32, i32, i32
  }
  func.func @transform_4(%arg0: i32, %arg1: memref<3xi32, #tpu.memory_space<smem>>) -> (i32, i32, i32) {
    %c0_i32 = arith.constant 0 : i32
    %c0_i32_0 = arith.constant 0 : i32
    %c0_i32_1 = arith.constant 0 : i32
    return %arg0, %c0_i32, %c0_i32_0 : i32, i32, i32
  }
}

module attributes {stable_mosaic.version = 11 : i64} {
  func.func @_conv_bias_act_kernel(%arg0: i32, %arg1: memref<1x64x1024xbf16, #tpu.memory_space<vmem>>, %arg2: memref<1x1024x128xbf16, #tpu.memory_space<vmem>>, %arg3: memref<1x1x128xf32, #tpu.memory_space<vmem>>, %arg4: memref<1x64x128xf32, #tpu.memory_space<vmem>>) attributes {dimension_semantics = [#tpu.dimension_semantics<parallel>], iteration_bounds = array<i64: 3>, scalar_prefetch = 0 : i64, scratch_operands = 0 : i64, tpu.core_type = #tpu.core_type<tc>, window_params = [{transform_indices = @transform_0, window_bounds = array<i64: 1, 64, 1024>}, {transform_indices = @transform_1, window_bounds = array<i64: 1, 1024, 128>}, {transform_indices = @transform_2, window_bounds = array<i64: 1, 1, 128>}, {transform_indices = @transform_3, window_bounds = array<i64: 1, 64, 128>}]} {
    %c0 = arith.constant 0 : index
    %c0_0 = arith.constant 0 : index
    %c0_1 = arith.constant 0 : index
    %0 = vector.load %arg1[%c0, %c0_0, %c0_1] : memref<1x64x1024xbf16, #tpu.memory_space<vmem>>, vector<1x64x1024xbf16>
    %1 = vector.shape_cast %0 : vector<1x64x1024xbf16> to vector<64x1024xbf16>
    %c0_2 = arith.constant 0 : index
    %c0_3 = arith.constant 0 : index
    %c0_4 = arith.constant 0 : index
    %2 = vector.load %arg2[%c0_2, %c0_3, %c0_4] : memref<1x1024x128xbf16, #tpu.memory_space<vmem>>, vector<1x1024x128xbf16>
    %3 = vector.shape_cast %2 : vector<1x1024x128xbf16> to vector<1024x128xbf16>
    %cst = arith.constant dense<0.000000e+00> : vector<64x128xf32>
    %4 = tpu.matmul %1, %3, %cst {dimension_numbers = #tpu.dot_dimension_numbers<[1], [0], [0], [1], [0, 0, 1, 1], [], []>} : vector<64x1024xbf16>, vector<1024x128xbf16>, vector<64x128xf32> -> vector<64x128xf32>
    %c0_5 = arith.constant 0 : index
    %c0_6 = arith.constant 0 : index
    %c0_7 = arith.constant 0 : index
    %5 = vector.load %arg3[%c0_5, %c0_6, %c0_7] : memref<1x1x128xf32, #tpu.memory_space<vmem>>, vector<1x1x128xf32>
    %6 = vector.shape_cast %5 : vector<1x1x128xf32> to vector<1x128xf32>
    %7 = vector.broadcast %6 : vector<1x128xf32> to vector<64x128xf32>
    %8 = arith.addf %4, %7 : vector<64x128xf32>
    %c0_8 = arith.constant 0 : index
    %c0_9 = arith.constant 0 : index
    %c0_10 = arith.constant 0 : index
    %9 = vector.load %arg4[%c0_8, %c0_9, %c0_10] : memref<1x64x128xf32, #tpu.memory_space<vmem>>, vector<1x64x128xf32>
    %10 = vector.shape_cast %9 : vector<1x64x128xf32> to vector<64x128xf32>
    %11 = vector.shape_cast %8 : vector<64x128xf32> to vector<1x64x128xf32>
    tpu.vector_store %arg4[%c0_8, %c0_9, %c0_10], %11 {strides = array<i32>} : memref<1x64x128xf32, #tpu.memory_space<vmem>>, vector<1x64x128xf32>,
    return
  }
  func.func @transform_0(%arg0: i32) -> (i32, i32, i32) {
    %c0_i32 = arith.constant 0 : i32
    %c0_i32_0 = arith.constant 0 : i32
    %c0_i32_1 = arith.constant 0 : i32
    return %arg0, %c0_i32, %c0_i32_0 : i32, i32, i32
  }
  func.func @transform_1(%arg0: i32) -> (i32, i32, i32) {
    %c0_i32 = arith.constant 0 : i32
    %c0_i32_0 = arith.constant 0 : i32
    %c0_i32_1 = arith.constant 0 : i32
    return %arg0, %c0_i32, %c0_i32_0 : i32, i32, i32
  }
  func.func @transform_2(%arg0: i32) -> (i32, i32, i32) {
    %c0_i32 = arith.constant 0 : i32
    %c0_i32_0 = arith.constant 0 : i32
    %c0_i32_1 = arith.constant 0 : i32
    return %arg0, %c0_i32, %c0_i32_0 : i32, i32, i32
  }
  func.func @transform_3(%arg0: i32) -> (i32, i32, i32) {
    %c0_i32 = arith.constant 0 : i32
    %c0_i32_0 = arith.constant 0 : i32
    %c0_i32_1 = arith.constant 0 : i32
    return %arg0, %c0_i32, %c0_i32_0 : i32, i32, i32
  }
}

</mosaic_0001>

<bundles_post_ra>
// kernel: multiscale_discriminator_forward.5
= control target key start
LH: loop header
LB: loop body
LE: loop exit
PB: predicated region body
PF: predicated region fallthrough
CT: control target
= control target key end

     0   :  { %s1034_s12 = smov 0   ;;  %s1164_s0 = inlined_call_operand.vmem [shape: bf16[3,176,128], index: 0, kind: input, shape index: {}]   ;;  %s1165_s1 = inlined_call_operand.vmem [shape: bf16[3,128,128], index: 1, kind: input, shape index: {}]   ;;  %s1166_s2 = inlined_call_operand.vmem [shape: f32[3,1,128], index: 2, kind: input, shape index: {}]   ;;  %s1167_s3 = inlined_call_operand.vmem [shape: bf16[3,176,128], index: 3, kind: output, shape index: {}]  }
   0x1 LB: > { %s738_s13 = sadd.s32 4294967295, %s1010_s12   ;;  %p742_p0 = scmp.ge.s32.totalorder %s1010_s12, 1  ;;  %s1010_s12 = sphi %s1034_s12, %s13_s12  }
   0x2   : > { %p155_p1 = scmp.lt.s32.totalorder %s1010_s12, 4 }
   0x4   : > { %p156_p2 = pnand %p742_p0, %p155_p1 }
   0x5   : > { %p187_p3 = scmp.lt.s32.totalorder (!%p156_p2), %s738_s13, 2  ;;  %v1012_v0 = vmov (!%p156_p2), 0.0   ;;  %vm1013_vm0 = vmmov (!%p156_p2), 0  }
   0x6   : > { %159 = sbr.rel (%p156_p2) target bundleno = 310 (0x136), region = 32  ;;  %898 = vmatprep.subr.bf16.mxu0 (!%p156_p2), %v1012_v0  ;;  %958 = vmatprep.subr.bf16.mxu1 (!%p156_p2), %v1012_v0 }
   0x7   : > { %914 = vmatprep.mubr.msk.bf16.mxu0 (!%p156_p2), %vm1013_vm0, %v1012_v0  ;;  %938 = vmatprep.mubr.msk.bf16.mxu1 (!%p156_p2), %vm1013_vm0, %v1012_v0 }
   0xd   : > { %s1169_s13 = smov (!%p187_p3, %s738_s13), 2 }
   0xe   : > { %s791_s14 = sshll.u32 %s1169_s13, 6  ;;  %s974_s18 = smul.u32 88, %s1169_s13 }
   0xf   : > { %s1054_s17 = scalar_lea.vmem %s1165_s1, %s791_s14  ;;  %s199_s24 = scalar_lea.vmem %s1166_s2, %s1169_s13 }
  0x10   : > { %v985_v1 = vld [vmem:[%s1054_s17] sm:$0xff]   ;;  %v986_v2 = vld [vmem:[%s1054_s17 + $0x8] sm:$0xff]   ;;  %s1066_s21 = scalar_lea.vmem %s1164_s0, %s974_s18  ;;  %v987_v3 = vld [vmem:[%s1054_s17 + $0x10] sm:$0xff]   ;;  %s1130_s27 = scalar_lea.vmem %s1167_s3, %s974_s18 }
  0x11   : > { %899 = vmatpush3.bf16.msra.mxu0 %v985_v1  ;;  %966 = vmatpush3.bf16.msra.mxu1 %v985_v1  ;;  %v988_v4 = vld [vmem:[%s1054_s17 + $0x18] sm:$0xff]   ;;  %v989_v5 = vld [vmem:[%s1054_s17 + $0x20] sm:$0xff]   ;;  %v990_v6 = vld [vmem:[%s1054_s17 + $0x28] sm:$0xff]  }
  0x12   : > { %900 = vmatprep.subr.bf16.mxu0 %v1012_v0  ;;  %959 = vmatprep.subr.bf16.mxu1 %v1012_v0  ;;  %v991_v7 = vld [vmem:[%s1054_s17 + $0x30] sm:$0xff]   ;;  %v992_v8 = vld [vmem:[%s1054_s17 + $0x38] sm:$0xff]   ;;  %v993_v9 = vld [vmem:[%s1066_s21] sm:$0xff]  }
  0x13   : > { %v994_v10 = vld [vmem:[%s1066_s21 + $0x30] sm:$0xff]   ;;  %v995_v11 = vld [vmem:[%s1066_s21 + $0x8] sm:$0xff]   ;;  %v996_v12 = vld [vmem:[%s1066_s21 + $0x38] sm:$0xff]  }
  0x14   : > { %v997_v13 = vld [vmem:[%s1066_s21 + $0x10] sm:$0xff]   ;;  %v998_v14 = vld [vmem:[%s1066_s21 + $0x40] sm:$0xff]   ;;  %v999_v15 = vld [vmem:[%s1066_s21 + $0x18] sm:$0xff]  }
  0x15   : > { %901 = vmatpush3.bf16.msra.mxu0 %v986_v2  ;;  %967 = vmatpush3.bf16.msra.mxu1 %v986_v2  ;;  %v1000_v16 = vld [vmem:[%s1066_s21 + $0x48] sm:$0xff]   ;;  %v1001_v17 = vld [vmem:[%s1066_s21 + $0x20] sm:$0xff]   ;;  %v1002_v18 = vld [vmem:[%s1066_s21 + $0x50] sm:$0xff]  }
  0x16   : > { %902 = vmatprep.subr.bf16.mxu0 %v1012_v0  ;;  %960 = vmatprep.subr.bf16.mxu1 %v1012_v0  ;;  %v1003_v19 = vld [vmem:[%s1066_s21 + $0x28] sm:$0xff]   ;;  %v1119_v20 = vld [vmem:[%s199_s24] ss:$0 sm:$0xff] }
  0x19   : > { %903 = vmatpush3.bf16.msra.mxu0 %v987_v3  ;;  %968 = vmatpush3.bf16.msra.mxu1 %v987_v3 }
  0x1a   : > { %904 = vmatprep.subr.bf16.mxu0 %v1012_v0  ;;  %961 = vmatprep.subr.bf16.mxu1 %v1012_v0 }
  0x1d   : > { %905 = vmatpush3.bf16.msra.mxu0 %v988_v4  ;;  %969 = vmatpush3.bf16.msra.mxu1 %v988_v4 }
  0x1e   : > { %906 = vmatprep.subr.bf16.mxu0 %v1012_v0  ;;  %962 = vmatprep.subr.bf16.mxu1 %v1012_v0 }
  0x21   : > { %907 = vmatpush3.bf16.msra.mxu0 %v989_v5  ;;  %970 = vmatpush3.bf16.msra.mxu1 %v989_v5 }
  0x22   : > { %908 = vmatprep.subr.bf16.mxu0 %v1012_v0  ;;  %963 = vmatprep.subr.bf16.mxu1 %v1012_v0 }
  0x25   : > { %909 = vmatpush3.bf16.msra.mxu0 %v990_v6  ;;  %971 = vmatpush3.bf16.msra.mxu1 %v990_v6 }
  0x26   : > { %910 = vmatprep.subr.bf16.mxu0 %v1012_v0  ;;  %964 = vmatprep.subr.bf16.mxu1 %v1012_v0 }
  0x29   : > { %911 = vmatpush3.bf16.msra.mxu0 %v991_v7  ;;  %972 = vmatpush3.bf16.msra.mxu1 %v991_v7 }
  0x2a   : > { %912 = vmatprep.subr.bf16.mxu0 %v1012_v0  ;;  %965 = vmatprep.subr.bf16.mxu1 %v1012_v0 }
  0x2d   : > { %913 = vmatpush3.bf16.msra.mxu0 %v992_v8  ;;  %973 = vmatpush3.bf16.msra.mxu1 %v992_v8 }
  0x30   : > { %915 = vmatmul.mubr.bf16.vlgmr.msra.gmra.mrb[0].mxu0 %v993_v9  ;;  %939 = vmatmul.mubr.bf16.vlgmr.msra.gmra.mrb[0].mxu1 %v994_v10 }
  0x31   : > { %918 = vmatprep.mubr.msk.bf16.mxu0 %vm1013_vm0, %v1012_v0  ;;  %942 = vmatprep.mubr.msk.bf16.mxu1 %vm1013_vm0, %v1012_v0 }
  0x38   : > { %919 = vmatmul.mubr.bf16.gmra.mrb[4].mxu0 %v995_v11  ;;  %943 = vmatmul.mubr.bf16.gmra.mrb[4].mxu1 %v996_v12 }
  0x39   : > { %922 = vmatprep.mubr.msk.bf16.mxu0 %vm1013_vm0, %v1012_v0  ;;  %946 = vmatprep.mubr.msk.bf16.mxu1 %vm1013_vm0, %v1012_v0 }
  0x40   : > { %923 = vmatmul.mubr.bf16.gmra.mrb[8].mxu0 %v997_v13  ;;  %947 = vmatmul.mubr.bf16.gmra.mrb[8].mxu1 %v998_v14 }
  0x41   : > { %926 = vmatprep.mubr.msk.bf16.mxu0 %vm1013_vm0, %v1012_v0  ;;  %950 = vmatprep.mubr.msk.bf16.mxu1 %vm1013_vm0, %v1012_v0 }
  0x48   : > { %927 = vmatmul.mubr.bf16.gmra.mrb[12].mxu0 %v999_v15  ;;  %951 = vmatmul.mubr.bf16.gmra.mrb[12].mxu1 %v1000_v16 }
  0x49   : > { %930 = vmatprep.mubr.msk.bf16.mxu0 %vm1013_vm0, %v1012_v0  ;;  %954 = vmatprep.mubr.msk.bf16.mxu1 %vm1013_vm0, %v1012_v0 }
  0x50   : > { %931 = vmatmul.mubr.bf16.gmra.mrb[16].mxu0 %v1001_v17  ;;  %955 = vmatmul.mubr.bf16.gmra.mrb[16].mxu1 %v1002_v18 }
  0x51   : > { %934 = vmatprep.mubr.msk.bf16.mxu0 %vm1013_vm0, %v1012_v0 }
  0x58   : > { %935 = vmatmul.mubr.bf16.gmra.mrb[20].mxu0 %v1003_v19 }
 0x103   : > { %v399_v21 = vpop.f32.mrb[0].mxu0  ;;  %v447_v22 = vpop.f32.mrb[0].mxu1 }
 0x104   : > { %v400_v23 = vadd.f32 %v1119_v20, %v399_v21  ;;  %v916_v24 = vpop.f32.mrb[1].mxu0  ;;  %v448_v25 = vadd.f32 %v1119_v20, %v447_v22  ;;  %v940_v26 = vpop.f32.mrb[1].mxu1 }
 0x105   : > { %v402_v27 = vpop.f32.mrb[2].mxu0  ;;  %v450_v28 = vpop.f32.mrb[2].mxu1 }
 0x106   : > { %v508_v29 = vmul.f32 0.2, %v400_v23  ;;  %v403_v30 = vadd.f32 %v1119_v20, %v402_v27  ;;  %v917_v31 = vpop.f32.mrb[3].mxu0  ;;  %vm498_vm1 = vcmp.gt.f32.partialorder %v448_v25, 0.0  ;;  %v941_v32 = vpop.f32.mrb[3].mxu1  ;;  %vm486_vm2 = vcmp.gt.f32.partialorder %v400_v23, 0.0 }
 0x107   : > { %v520_v33 = vmul.f32 0.2, %v448_v25  ;;  %v451_v34 = vadd.f32 %v1119_v20, %v450_v28 }
 0x108   : > { %vm487_vm3 = vcmp.gt.f32.partialorder %v403_v30, 0.0  ;;  %v509_v35 = vmul.f32 0.2, %v403_v30  ;;  %v530_v38 = vsel %vm486_vm2, %v400_v23, %v508_v29 }
 0x109   : > { %v542_v36 = vsel %vm498_vm1, %v448_v25, %v520_v33  ;;  %vm499_vm4 = vcmp.gt.f32.partialorder %v451_v34, 0.0  ;;  %v521_v37 = vmul.f32 0.2, %v451_v34 }
 0x10a   : > { %v531_v39 = vsel %vm487_vm3, %v403_v30, %v509_v35 }
 0x10b   : > { %v817_v40 = vpack.c.bf16 %v531_v39, %v530_v38  ;;  %v543_v41 = vsel %vm499_vm4, %v451_v34, %v521_v37  ;;  %v407_v42 = vpop.f32.mrb[4].mxu0  ;;  %v455_v43 = vpop.f32.mrb[4].mxu1 }
 0x10c   : > { %v847_v44 = vpack.c.bf16 %v543_v41, %v542_v36  ;;  %v408_v45 = vadd.f32 %v1119_v20, %v407_v42  ;;  %v920_v46 = vpop.f32.mrb[5].mxu0  ;;  %v456_v47 = vadd.f32 %v1119_v20, %v455_v43  ;;  %v944_v48 = vpop.f32.mrb[5].mxu1 }
 0x10d   : > { %818 = vst [vmem:[%s1130_s27] sm:$0xff] %v817_v40   ;;  %v410_v49 = vpop.f32.mrb[6].mxu0  ;;  %v458_v50 = vpop.f32.mrb[6].mxu1 }
 0x10e   : > { %874 = vst [vmem:[%s1130_s27 + $0x30] sm:$0xff] %v847_v44   ;;  %v510_v51 = vmul.f32 0.2, %v408_v45  ;;  %v411_v52 = vadd.f32 %v1119_v20, %v410_v49  ;;  %v921_v53 = vpop.f32.mrb[7].mxu0  ;;  %vm500_vm5 = vcmp.gt.f32.partialorder %v456_v47, 0.0  ;;  %v945_v54 = vpop.f32.mrb[7].mxu1  ;;  %v459_v56 = vadd.f32 %v1119_v20, %v458_v50 }
 0x10f   : > { %vm488_vm6 = vcmp.gt.f32.partialorder %v408_v45, 0.0  ;;  %v522_v55 = vmul.f32 0.2, %v456_v47 }
 0x110   : > { %vm489_vm7 = vcmp.gt.f32.partialorder %v411_v52, 0.0  ;;  %v511_v57 = vmul.f32 0.2, %v411_v52  ;;  %vm501_vm8 = vcmp.gt.f32.partialorder %v459_v56, 0.0  ;;  %v523_v59 = vmul.f32 0.2, %v459_v56 }
 0x111   : > { %v544_v58 = vsel %vm500_vm5, %v456_v47, %v522_v55  ;;  %v532_v60 = vsel %vm488_vm6, %v408_v45, %v510_v51 }
 0x112   : > { %v533_v61 = vsel %vm489_vm7, %v411_v52, %v511_v57  ;;  %v545_v63 = vsel %vm501_vm8, %v459_v56, %v523_v59 }
 0x113   : > { %v822_v62 = vpack.c.bf16 %v533_v61, %v532_v60  ;;  %v415_v0 = vpop.f32.mrb[8].mxu0  ;;  %v463_v1 = vpop.f32.mrb[8].mxu1  ;;  %v852_v2 = vpack.c.bf16 %v545_v63, %v544_v58 }
 0x114   : > { %v416_v3 = vadd.f32 %v1119_v20, %v415_v0  ;;  %v924_v4 = vpop.f32.mrb[9].mxu0  ;;  %v464_v5 = vadd.f32 %v1119_v20, %v463_v1  ;;  %v948_v6 = vpop.f32.mrb[9].mxu1 }
 0x115   : > { %869 = vst [vmem:[%s1130_s27 + $0x8] sm:$0xff] %v822_v62   ;;  %v418_v7 = vpop.f32.mrb[10].mxu0  ;;  %v466_v8 = vpop.f32.mrb[10].mxu1  ;;  %875 = vst [vmem:[%s1130_s27 + $0x38] sm:$0xff] %v852_v2  }
 0x116   : > { %v512_v9 = vmul.f32 0.2, %v416_v3  ;;  %v419_v10 = vadd.f32 %v1119_v20, %v418_v7  ;;  %v925_v11 = vpop.f32.mrb[11].mxu0  ;;  %vm502_vm9 = vcmp.gt.f32.partialorder %v464_v5, 0.0  ;;  %v949_v12 = vpop.f32.mrb[11].mxu1  ;;  %vm490_vm10 = vcmp.gt.f32.partialorder %v416_v3, 0.0 }
 0x117   : > { %v524_v13 = vmul.f32 0.2, %v464_v5  ;;  %v467_v14 = vadd.f32 %v1119_v20, %v466_v8 }
 0x118   : > { %vm491_vm11 = vcmp.gt.f32.partialorder %v419_v10, 0.0  ;;  %v513_v15 = vmul.f32 0.2, %v419_v10  ;;  %v534_v18 = vsel %vm490_vm10, %v416_v3, %v512_v9 }
 0x119   : > { %v546_v16 = vsel %vm502_vm9, %v464_v5, %v524_v13  ;;  %vm503_vm12 = vcmp.gt.f32.partialorder %v467_v14, 0.0  ;;  %v525_v17 = vmul.f32 0.2, %v467_v14 }
 0x11a   : > { %v535_v19 = vsel %vm491_vm11, %v419_v10, %v513_v15 }
 0x11b   : > { %v827_v21 = vpack.c.bf16 %v535_v19, %v534_v18  ;;  %v547_v22 = vsel %vm503_vm12, %v467_v14, %v525_v17  ;;  %v423_v23 = vpop.f32.mrb[12].mxu0  ;;  %v471_v24 = vpop.f32.mrb[12].mxu1 }
 0x11c   : > { %v857_v25 = vpack.c.bf16 %v547_v22, %v546_v16  ;;  %v424_v26 = vadd.f32 %v1119_v20, %v423_v23  ;;  %v928_v27 = vpop.f32.mrb[13].mxu0  ;;  %v472_v28 = vadd.f32 %v1119_v20, %v471_v24  ;;  %v952_v29 = vpop.f32.mrb[13].mxu1 }
 0x11d   : > { %870 = vst [vmem:[%s1130_s27 + $0x10] sm:$0xff] %v827_v21   ;;  %v426_v30 = vpop.f32.mrb[14].mxu0  ;;  %v474_v31 = vpop.f32.mrb[14].mxu1 }
 0x11e   : > { %876 = vst [vmem:[%s1130_s27 + $0x40] sm:$0xff] %v857_v25   ;;  %v514_v32 = vmul.f32 0.2, %v424_v26  ;;  %v427_v33 = vadd.f32 %v1119_v20, %v426_v30  ;;  %v929_v34 = vpop.f32.mrb[15].mxu0  ;;  %vm504_vm13 = vcmp.gt.f32.partialorder %v472_v28, 0.0  ;;  %v953_v35 = vpop.f32.mrb[15].mxu1  ;;  %v475_v37 = vadd.f32 %v1119_v20, %v474_v31 }
 0x11f   : > { %vm492_vm14 = vcmp.gt.f32.partialorder %v424_v26, 0.0  ;;  %v526_v36 = vmul.f32 0.2, %v472_v28 }
 0x120   : > { %vm493_vm15 = vcmp.gt.f32.partialorder %v427_v33, 0.0  ;;  %v515_v38 = vmul.f32 0.2, %v427_v33  ;;  %vm505_vm0 = vcmp.gt.f32.partialorder %v475_v37, 0.0  ;;  %v527_v40 = vmul.f32 0.2, %v475_v37 }
 0x121   : > { %v548_v39 = vsel %vm504_vm13, %v472_v28, %v526_v36  ;;  %v536_v41 = vsel %vm492_vm14, %v424_v26, %v514_v32 }
 0x122   : > { %v537_v42 = vsel %vm493_vm15, %v427_v33, %v515_v38  ;;  %v549_v44 = vsel %vm505_vm0, %v475_v37, %v527_v40 }
 0x123   : > { %v832_v43 = vpack.c.bf16 %v537_v42, %v536_v41  ;;  %v431_v45 = vpop.f32.mrb[16].mxu0  ;;  %v479_v46 = vpop.f32.mrb[16].mxu1  ;;  %v862_v47 = vpack.c.bf16 %v549_v44, %v548_v39 }
 0x124   : > { %v432_v48 = vadd.f32 %v1119_v20, %v431_v45  ;;  %v932_v49 = vpop.f32.mrb[17].mxu0  ;;  %v480_v50 = vadd.f32 %v1119_v20, %v479_v46  ;;  %v956_v51 = vpop.f32.mrb[17].mxu1 }
 0x125   : > { %871 = vst [vmem:[%s1130_s27 + $0x18] sm:$0xff] %v832_v43   ;;  %v434_v52 = vpop.f32.mrb[18].mxu0  ;;  %v482_v53 = vpop.f32.mrb[18].mxu1  ;;  %877 = vst [vmem:[%s1130_s27 + $0x48] sm:$0xff] %v862_v47  }
 0x126   : > { %v516_v54 = vmul.f32 0.2, %v432_v48  ;;  %v435_v55 = vadd.f32 %v1119_v20, %v434_v52  ;;  %v933_v56 = vpop.f32.mrb[19].mxu0  ;;  %vm506_vm1 = vcmp.gt.f32.partialorder %v480_v50, 0.0  ;;  %v957_v57 = vpop.f32.mrb[19].mxu1  ;;  %vm494_vm2 = vcmp.gt.f32.partialorder %v432_v48, 0.0 }
 0x127   : > { %v528_v58 = vmul.f32 0.2, %v480_v50  ;;  %v483_v59 = vadd.f32 %v1119_v20, %v482_v53 }
 0x128   : > { %vm495_vm3 = vcmp.gt.f32.partialorder %v435_v55, 0.0  ;;  %v517_v60 = vmul.f32 0.2, %v435_v55  ;;  %v538_v63 = vsel %vm494_vm2, %v432_v48, %v516_v54 }
 0x129   : > { %v550_v61 = vsel %vm506_vm1, %v480_v50, %v528_v58  ;;  %vm507_vm4 = vcmp.gt.f32.partialorder %v483_v59, 0.0  ;;  %v529_v62 = vmul.f32 0.2, %v483_v59 }
 0x12a   : > { %v539_v0 = vsel %vm495_vm3, %v435_v55, %v517_v60 }
 0x12b   : > { %v837_v1 = vpack.c.bf16 %v539_v0, %v538_v63  ;;  %v551_v2 = vsel %vm507_vm4, %v483_v59, %v529_v62  ;;  %v439_v3 = vpop.f32.mrb[20].mxu0 }
 0x12c   : > { %v867_v4 = vpack.c.bf16 %v551_v2, %v550_v61  ;;  %v440_v5 = vadd.f32 %v1119_v20, %v439_v3  ;;  %v936_v6 = vpop.f32.mrb[21].mxu0 }
 0x12d   : > { %872 = vst [vmem:[%s1130_s27 + $0x20] sm:$0xff] %v837_v1   ;;  %v442_v7 = vpop.f32.mrb[22].mxu0 }
 0x12e   : > { %878 = vst [vmem:[%s1130_s27 + $0x50] sm:$0xff] %v867_v4   ;;  %v518_v8 = vmul.f32 0.2, %v440_v5  ;;  %v443_v9 = vadd.f32 %v1119_v20, %v442_v7  ;;  %v937_v10 = vpop.f32.mrb[23].mxu0  ;;  %vm496_vm5 = vcmp.gt.f32.partialorder %v440_v5, 0.0 }
 0x130   : > { %vm497_vm6 = vcmp.gt.f32.partialorder %v443_v9, 0.0  ;;  %v519_v11 = vmul.f32 0.2, %v443_v9  ;;  %v540_v12 = vsel %vm496_vm5, %v440_v5, %v518_v8 }
 0x132   : > { %v541_v13 = vsel %vm497_vm6, %v443_v9, %v519_v11 }
 0x133   : > { %v842_v14 = vpack.c.bf16 %v541_v13, %v540_v12 }
 0x135   : > { %873 = vst [vmem:[%s1130_s27 + $0x28] sm:$0xff] %v842_v14  }
 0x136 PF: > { %s13_s12 = sadd.s32 1, %s1010_s12  }
 0x137   : > { %p10_p4 = scmp.ge.s32.totalorder %s13_s12, 5  }
 0x139   :  { %12 = sbr.rel (!%p10_p4) target bundleno = 1 (0x1), region = 68 }

// kernel: squeeze.17
= control target key start
LH: loop header
LB: loop body
LE: loop exit
PB: predicated region body
PF: predicated region fallthrough
CT: control target
= control target key end

     0   :  { %vm50_vm0 = vcmask 64512   ;;  %v131_v8 = vmov 0.0   ;;  %s166_s0 = inlined_call_operand.vmem [shape: bf16[1,18,8], index: 0, kind: input, shape index: {}]   ;;  %s167_s1 = inlined_call_operand.vmem [shape: bf16[2,3,3,8], index: 1, kind: output, shape index: {}]  }
   0x1   :  { %v119_v0 = vld [vmem:[%s166_s0 + $0x8] sm:$0xf]  ;;  %v127_v1 = vld [vmem:[%s166_s0] sm:$0xff]  }
   0x2   :  { %v17_v2 = vunpack.c.l.bf16 %v119_v0  ;;  %v128_v3 = vunpack.c.l.bf16 %v127_v1  ;;  %v129_v4 = vunpack.c.h.bf16 %v127_v1 }
   0x4   :  { %20 = vst [vmem:[#allocation1 + $0x10] sm:$0xff] %v17_v2  ;;  %51 = vst.msk [vmem:[#allocation0] sm:$0x7] %vm50_vm0, %v128_v3  }
   0x5   :  { %53 = vst.msk [vmem:[#allocation0 + $0x5] sm:$0x38] %vm50_vm0, %v128_v3   ;;  %55 = vst.msk [vmem:[#allocation0 + $0xa] sm:$0xc0] %vm50_vm0, %v128_v3  }
   0x6   :  { %60 = vst.msk [vmem:[#allocation0 + $0x12] ss:$6 sm:$0x3] %vm50_vm0, %v129_v4   ;;  %62 = vst.msk [vmem:[#allocation0 + $0x17] sm:$0xc] %vm50_vm0, %v129_v4  }
   0x7   :  { %64 = vst.msk [vmem:[#allocation0 + $0x1c] sm:$0x70] %vm50_vm0, %v129_v4   ;;  %66 = vst.msk [vmem:[#allocation0 + $0x21] sm:$0x80] %vm50_vm0, %v129_v4  }
   0xb   :  { %v68_v5 = vld [vmem:[#allocation1 + $0x10] sm:$0x3]  }
   0xc   :  { %v76_v6 = vld [vmem:[#allocation0] sm:$0xf]  ;;  %v81_v7 = vld [vmem:[#allocation0 + $0x8] sm:$0xf]  ;;  %71 = vst.msk [vmem:[#allocation0 + $0x29] sm:$0x3] %vm50_vm0, %v68_v5  }
   0xd   :  { %v77_v9 = vpack.c.bf16 %v131_v8, %v76_v6  ;;  %v82_v10 = vpack.c.bf16 %v131_v8, %v81_v7  ;;  %v87_v11 = vld [vmem:[#allocation0 + $0x10] sm:$0xf]  ;;  %v94_v12 = vld [vmem:[#allocation0 + $0x18] sm:$0xf] }
   0xe   :  { %v101_v13 = vld [vmem:[#allocation0 + $0x20] sm:$0xf]  ;;  %v88_v14 = vpack.c.bf16 %v131_v8, %v87_v11  ;;  %v95_v15 = vpack.c.bf16 %v131_v8, %v94_v12 }
   0xf   :  { %v102_v16 = vpack.c.bf16 %v131_v8, %v101_v13  ;;  %79 = vst [vmem:[%s167_s1] sm:$0x3] %v77_v9  ;;  %121 = vst [vmem:[%s167_s1 + $0x2] sm:$0x3] %v82_v10 }
  0x10   :  { %122 = vst [vmem:[%s167_s1 + $0x4] sm:$0x3] %v88_v14  ;;  %123 = vst [vmem:[%s167_s1 + $0x6] sm:$0x3] %v95_v15 }
  0x11   :  { %124 = vst [vmem:[%s167_s1 + $0x8] sm:$0x3] %v102_v16 }
  0x13   :  { %v108_v17 = vld [vmem:[#allocation0 + $0x28] sm:$0xf] }
  0x14   :  { %v109_v18 = vpack.c.bf16 %v131_v8, %v108_v17 }
  0x16   :  { %125 = vst [vmem:[%s167_s1 + $0xa] sm:$0x3] %v109_v18 }

// kernel: squeeze.16
= control target key start
LH: loop header
LB: loop body
LE: loop exit
PB: predicated region body
PF: predicated region fallthrough
CT: control target
= control target key end

     0   :  { %vm114_vm0 = vcmask 64512   ;;  %s355_s0 = inlined_call_operand.vmem [shape: bf16[1,50,8], index: 0, kind: input, shape index: {}]   ;;  %s356_s1 = inlined_call_operand.vmem [shape: bf16[2,5,5,8], index: 1, kind: output, shape index: {}]  }
   0x1   :  { %v245_v0 = vld [vmem:[%s355_s0 + $0x18] sm:$0xf]  ;;  %v297_v1 = vld [vmem:[%s355_s0 + $0x10] sm:$0xff]   ;;  %v298_v2 = vld [vmem:[%s355_s0 + $0x8] sm:$0xff]  }
   0x2   :  { %v17_v3 = vunpack.c.l.bf16 %v245_v0  ;;  %v262_v4 = vunpack.c.l.bf16 %v297_v1  ;;  %v263_v5 = vunpack.c.h.bf16 %v297_v1  ;;  %v266_v6 = vunpack.c.l.bf16 %v298_v2  ;;  %v269_v7 = vld [vmem:[%s355_s0] sm:$0xff]  }
   0x3   :  { %v267_v8 = vunpack.c.h.bf16 %v298_v2  ;;  %v270_v9 = vunpack.c.l.bf16 %v269_v7  ;;  %v271_v10 = vunpack.c.h.bf16 %v269_v7 }
   0x4   :  { %20 = vst [vmem:[#allocation1 + $0x30] sm:$0xff] %v17_v3  ;;  %131 = vst.msk [vmem:[#allocation0 + $0x19] sm:$0xf] %vm114_vm0, %v266_v6  }
   0x5   :  { %133 = vst.msk [vmem:[#allocation0 + $0x1c] sm:$0xf0] %vm114_vm0, %v266_v6   ;;  %147 = vst.msk [vmem:[#allocation0 + $0x32] sm:$0x7] %vm114_vm0, %v262_v4  }
   0x6   :  { %149 = vst.msk [vmem:[#allocation0 + $0x35] sm:$0xf8] %vm114_vm0, %v262_v4   ;;  %154 = vst.msk [vmem:[#allocation0 + $0x40] sm:$0x1f] %vm114_vm0, %v263_v5  }
   0x7   :  { %156 = vst.msk [vmem:[#allocation0 + $0x43] sm:$0xe0] %vm114_vm0, %v263_v5   ;;  %115 = vst.msk [vmem:[#allocation0] sm:$0x1f] %vm114_vm0, %v270_v9  }
   0x8   :  { %117 = vst.msk [vmem:[#allocation0 + $0x3] sm:$0xe0] %vm114_vm0, %v270_v9   ;;  %122 = vst.msk [vmem:[#allocation0 + $0xb] sm:$0x3] %vm114_vm0, %v271_v10  }
   0x9   :  { %124 = vst.msk [vmem:[#allocation0 + $0xe] sm:$0x7c] %vm114_vm0, %v271_v10   ;;  %126 = vst.msk [vmem:[#allocation0 + $0x11] sm:$0x80] %vm114_vm0, %v271_v10  }
   0xa   :  { %138 = vst.msk [vmem:[#allocation0 + $0x24] ss:$4 sm:$0x3] %vm114_vm0, %v267_v8   ;;  %140 = vst.msk [vmem:[#allocation0 + $0x27] sm:$0x3c] %vm114_vm0, %v267_v8  }
   0xb   :  { %142 = vst.msk [vmem:[#allocation0 + $0x2a] sm:$0xc0] %vm114_vm0, %v267_v8   ;;  %v158_v11 = vld [vmem:[#allocation1 + $0x30] sm:$0x3]  }
   0xc   :  { %161 = vst.msk [vmem:[#allocation0 + $0x4b] sm:$0x3] %vm114_vm0, %v158_v11  }
   0xd   :  { %v212_v12 = vld [vmem:[#allocation0 + $0x38] sm:$0xff]  ;;  %v219_v24 = vld [vmem:[#allocation0 + $0x40] sm:$0xff] }
   0xe   :  { %v166_v13 = vld [vmem:[#allocation0] sm:$0xff] }
   0xf   :  { %v171_v14 = vld [vmem:[#allocation0 + $0x8] sm:$0xff] }
  0x10   :  { %v177_v15 = vld [vmem:[#allocation0 + $0x10] sm:$0xff]  ;;  %v275_v16 = vpack.c.bf16 %v171_v14, %v166_v13  ;;  %v184_v17 = vld [vmem:[#allocation0 + $0x18] sm:$0xff] }
  0x11   :  { %v191_v18 = vld [vmem:[#allocation0 + $0x20] sm:$0xff]  ;;  %v198_v19 = vld [vmem:[#allocation0 + $0x28] sm:$0xff]  ;;  %v280_v20 = vpack.c.bf16 %v184_v17, %v177_v15 }
  0x12   :  { %v285_v21 = vpack.c.bf16 %v198_v19, %v191_v18  ;;  %v205_v22 = vld [vmem:[#allocation0 + $0x30] sm:$0xff]  ;;  %276 = vst [vmem:[%s356_s1] sm:$0xff] %v275_v16  }
  0x13   :  { %v290_v23 = vpack.c.bf16 %v212_v12, %v205_v22  ;;  %299 = vst [vmem:[%s356_s1 + $0x8] sm:$0xff] %v280_v20   ;;  %v226_v25 = vld [vmem:[#allocation0 + $0x48] sm:$0xff] }
  0x14   :  { %300 = vst [vmem:[%s356_s1 + $0x10] sm:$0xff] %v285_v21   ;;  %v295_v26 = vpack.c.bf16 %v226_v25, %v219_v24 }
  0x15   :  { %301 = vst [vmem:[%s356_s1 + $0x18] sm:$0xff] %v290_v23  }
  0x16   :  { %302 = vst [vmem:[%s356_s1 + $0x20] sm:$0xff] %v295_v26  }

// kernel: squeeze.15
= control target key start
LH: loop header
LB: loop body
LE: loop exit
PB: predicated region body
PF: predicated region fallthrough
CT: control target
= control target key end

     0   :  { %vm376_vm0 = vcmask 1031168   ;;  %vm34_vm1 = vcmask 72704   ;;  %s817_s8 = smov 119   ;;  %s818_s9 = smov 112   ;;  %vm380_vm2 = vcmask 15360   ;;  %vm397_vm3 = vcmask 72720   ;;  %s1046_s0 = inlined_call_operand.vmem [shape: bf16[1,162,8], index: 0, kind: input, shape index: {}]   ;;  %s1047_s1 = inlined_call_operand.vmem [shape: bf16[2,9,9,8], index: 1, kind: output, shape index: {}]  }
   0x1   :  { %v701_v0 = vld [vmem:[%s1046_s0] sm:$0xff]   ;;  %s816_s0 = smov 121   ;;  %s819_s10 = smov 2  }
   0x2   :  { %v703_v1 = vunpack.c.h.bf16 %v701_v0  ;;  %v702_v2 = vunpack.c.l.bf16 %v701_v0  ;;  %s820_s11 = smov 103   ;;  %s821_s12 = smov 110  }
   0x3   :  { %s822_s13 = smov 92   ;;  %s823_s14 = smov 101  }
   0x4   :  { %52 = vrot.lane.b32.xlu0 %v703_v1, %s816_s0  ;;  %72 = vrot.lane.b32.xlu1 %v702_v2, %s817_s8  ;;  %35 = vst.msk [vmem:[#allocation0] sm:$0x1] %vm34_vm1, %v702_v2   ;;  %37 = vst.msk [vmem:[#allocation0 + $0x1f] sm:$0x2] %vm34_vm1, %v702_v2   ;;  %v377_v3 = vsel %vm376_vm0, %v703_v1, %v702_v2  ;;  %s824_s15 = smov 74   ;;  %s825_s16 = smov 83  }
   0x5   :  { %39 = vst.msk [vmem:[#allocation0 + $0x3e] sm:$0x4] %vm34_vm1, %v702_v2   ;;  %41 = vst.msk [vmem:[#allocation0 + $0x5d] sm:$0x8] %vm34_vm1, %v702_v2   ;;  %s826_s17 = smov 56   ;;  %s827_s18 = smov 65  }
   0x6   :  { %43 = vst.msk [vmem:[#allocation0 + $0x7c] sm:$0x10] %vm34_vm1, %v702_v2   ;;  %45 = vst.msk [vmem:[#allocation0 + $0x9b] sm:$0x20] %vm34_vm1, %v702_v2   ;;  %s828_s19 = smov 47   ;;  %s829_s20 = smov 38  }
   0x7   :  { %47 = vst.msk [vmem:[#allocation0 + $0xba] sm:$0x40] %vm34_vm1, %v702_v2   ;;  %49 = vst.msk [vmem:[#allocation0 + $0xd9] sm:$0x80] %vm34_vm1, %v702_v2   ;;  %s830_s21 = smov 29   ;;  %s831_s22 = smov 20  }
   0x8   :  { %93 = vrot.lane.b32.xlu1 %v703_v1, %s818_s9  ;;  %378 = vrot.lane.b32.xlu0 %v377_v3, %s819_s10  ;;  %s832_s23 = smov 11  }
   0xc   :  { %134 = vrot.lane.b32.xlu1 %v703_v1, %s820_s11  ;;  %113 = vrot.lane.b32.xlu0 %v702_v2, %s821_s12 }
  0x10   :  { %174 = vrot.lane.b32.xlu1 %v702_v2, %s822_s13  ;;  %154 = vrot.lane.b32.xlu0 %v702_v2, %s823_s14 }
  0x14   :  { %214 = vrot.lane.b32.xlu1 %v702_v2, %s824_s15  ;;  %194 = vrot.lane.b32.xlu0 %v702_v2, %s825_s16 }
  0x18   :  { %254 = vrot.lane.b32.xlu1 %v702_v2, %s826_s17  ;;  %234 = vrot.lane.b32.xlu0 %v702_v2, %s827_s18 }
  0x1c   :  { %274 = vrot.lane.b32.xlu0 %v702_v2, %s828_s19  ;;  %294 = vrot.lane.b32.xlu1 %v702_v2, %s829_s20 }
  0x20   :  { %314 = vrot.lane.b32.xlu0 %v702_v2, %s830_s21  ;;  %334 = vrot.lane.b32.xlu1 %v702_v2, %s831_s22 }
  0x24   :  { %354 = vrot.lane.b32.xlu0 %v702_v2, %s832_s23 }
  0x76   :  { %v53_v4 = vpop.permute.xlu0 %52   ;;  %v73_v5 = vpop.permute.xlu1 %72  }
  0x77   :  { %56 = vst.msk [vmem:[#allocation0 + $0x16] sm:$0x1] %vm34_vm1, %v53_v4   ;;  %58 = vst.msk [vmem:[#allocation0 + $0x35] sm:$0x2] %vm34_vm1, %v53_v4  }
  0x78   :  { %60 = vst.msk [vmem:[#allocation0 + $0x54] sm:$0x4] %vm34_vm1, %v53_v4   ;;  %62 = vst.msk [vmem:[#allocation0 + $0x73] sm:$0x8] %vm34_vm1, %v53_v4  }
  0x79   :  { %64 = vst.msk [vmem:[#allocation0 + $0x92] sm:$0x10] %vm34_vm1, %v53_v4   ;;  %66 = vst.msk [vmem:[#allocation0 + $0xb1] sm:$0x20] %vm34_vm1, %v53_v4  }
  0x7a   :  { %68 = vst.msk [vmem:[#allocation0 + $0xd0] sm:$0x40] %vm34_vm1, %v53_v4   ;;  %70 = vst.msk [vmem:[#allocation0 + $0xef] sm:$0x80] %vm34_vm1, %v53_v4   ;;  %v94_v6 = vpop.permute.xlu1 %93   ;;  %v379_v7 = vpop.permute.xlu0 %378  }
  0x7b   :  { %76 = vst.msk [vmem:[#allocation0 + $0x1] sm:$0x1] %vm34_vm1, %v73_v5   ;;  %78 = vst.msk [vmem:[#allocation0 + $0x20] sm:$0x2] %vm34_vm1, %v73_v5  }
  0x7c   :  { %80 = vst.msk [vmem:[#allocation0 + $0x3f] sm:$0x4] %vm34_vm1, %v73_v5   ;;  %82 = vst.msk [vmem:[#allocation0 + $0x5e] sm:$0x8] %vm34_vm1, %v73_v5  }
  0x7d   :  { %84 = vst.msk [vmem:[#allocation0 + $0x7d] sm:$0x10] %vm34_vm1, %v73_v5   ;;  %86 = vst.msk [vmem:[#allocation0 + $0x9c] sm:$0x20] %vm34_vm1, %v73_v5  }
  0x7e   :  { %88 = vst.msk [vmem:[#allocation0 + $0xbb] sm:$0x40] %vm34_vm1, %v73_v5   ;;  %90 = vst.msk [vmem:[#allocation0 + $0xda] sm:$0x80] %vm34_vm1, %v73_v5   ;;  %v135_v8 = vpop.permute.xlu1 %134   ;;  %v114_v9 = vpop.permute.xlu0 %113  }
  0x7f   :  { %97 = vst.msk [vmem:[#allocation0 + $0x17] sm:$0x1] %vm34_vm1, %v94_v6   ;;  %99 = vst.msk [vmem:[#allocation0 + $0x36] sm:$0x2] %vm34_vm1, %v94_v6  }
  0x80   :  { %101 = vst.msk [vmem:[#allocation0 + $0x55] sm:$0x4] %vm34_vm1, %v94_v6   ;;  %103 = vst.msk [vmem:[#allocation0 + $0x74] sm:$0x8] %vm34_vm1, %v94_v6  }
  0x81   :  { %105 = vst.msk [vmem:[#allocation0 + $0x93] sm:$0x10] %vm34_vm1, %v94_v6   ;;  %107 = vst.msk [vmem:[#allocation0 + $0xb2] sm:$0x20] %vm34_vm1, %v94_v6  }
  0x82   :  { %109 = vst.msk [vmem:[#allocation0 + $0xd1] sm:$0x40] %vm34_vm1, %v94_v6   ;;  %111 = vst.msk [vmem:[#allocation0 + $0xf0] sm:$0x80] %vm34_vm1, %v94_v6   ;;  %v175_v10 = vpop.permute.xlu1 %174   ;;  %v155_v11 = vpop.permute.xlu0 %154  }
  0x83   :  { %382 = vst.msk [vmem:[#allocation0 + $0x15] sm:$0x1] %vm380_vm2, %v379_v7   ;;  %384 = vst.msk [vmem:[#allocation0 + $0x34] sm:$0x2] %vm380_vm2, %v379_v7  }
  0x84   :  { %386 = vst.msk [vmem:[#allocation0 + $0x53] sm:$0x4] %vm380_vm2, %v379_v7   ;;  %388 = vst.msk [vmem:[#allocation0 + $0x72] sm:$0x8] %vm380_vm2, %v379_v7  }
  0x85   :  { %390 = vst.msk [vmem:[#allocation0 + $0x91] sm:$0x10] %vm380_vm2, %v379_v7   ;;  %392 = vst.msk [vmem:[#allocation0 + $0xb0] sm:$0x20] %vm380_vm2, %v379_v7  }
  0x86   :  { %394 = vst.msk [vmem:[#allocation0 + $0xcf] sm:$0x40] %vm380_vm2, %v379_v7   ;;  %396 = vst.msk [vmem:[#allocation0 + $0xee] sm:$0x80] %vm380_vm2, %v379_v7   ;;  %v215_v12 = vpop.permute.xlu1 %214   ;;  %v195_v13 = vpop.permute.xlu0 %194  }
  0x87   :  { %399 = vst.msk [vmem:[#allocation0 + $0x15] sm:$0x1] %vm397_vm3, %v379_v7   ;;  %401 = vst.msk [vmem:[#allocation0 + $0x34] sm:$0x2] %vm397_vm3, %v379_v7  }
  0x88   :  { %403 = vst.msk [vmem:[#allocation0 + $0x53] sm:$0x4] %vm397_vm3, %v379_v7   ;;  %405 = vst.msk [vmem:[#allocation0 + $0x72] sm:$0x8] %vm397_vm3, %v379_v7  }
  0x89   :  { %407 = vst.msk [vmem:[#allocation0 + $0x91] sm:$0x10] %vm397_vm3, %v379_v7   ;;  %409 = vst.msk [vmem:[#allocation0 + $0xb0] sm:$0x20] %vm397_vm3, %v379_v7  }
  0x8a   :  { %411 = vst.msk [vmem:[#allocation0 + $0xcf] sm:$0x40] %vm397_vm3, %v379_v7   ;;  %413 = vst.msk [vmem:[#allocation0 + $0xee] sm:$0x80] %vm397_vm3, %v379_v7   ;;  %v255_v14 = vpop.permute.xlu1 %254   ;;  %v235_v15 = vpop.permute.xlu0 %234  }
  0x8b   :  { %138 = vst.msk [vmem:[#allocation0 + $0x18] sm:$0x1] %vm34_vm1, %v135_v8   ;;  %140 = vst.msk [vmem:[#allocation0 + $0x37] sm:$0x2] %vm34_vm1, %v135_v8  }
  0x8c   :  { %142 = vst.msk [vmem:[#allocation0 + $0x56] sm:$0x4] %vm34_vm1, %v135_v8   ;;  %144 = vst.msk [vmem:[#allocation0 + $0x75] sm:$0x8] %vm34_vm1, %v135_v8  }
  0x8d   :  { %146 = vst.msk [vmem:[#allocation0 + $0x94] sm:$0x10] %vm34_vm1, %v135_v8   ;;  %148 = vst.msk [vmem:[#allocation0 + $0xb3] sm:$0x20] %vm34_vm1, %v135_v8  }
  0x8e   :  { %150 = vst.msk [vmem:[#allocation0 + $0xd2] sm:$0x40] %vm34_vm1, %v135_v8   ;;  %152 = vst.msk [vmem:[#allocation0 + $0xf1] sm:$0x80] %vm34_vm1, %v135_v8   ;;  %v275_v16 = vpop.permute.xlu0 %274   ;;  %v295_v17 = vpop.permute.xlu1 %294  }
  0x8f   :  { %117 = vst.msk [vmem:[#allocation0 + $0x2] sm:$0x1] %vm34_vm1, %v114_v9   ;;  %119 = vst.msk [vmem:[#allocation0 + $0x21] sm:$0x2] %vm34_vm1, %v114_v9  }
  0x90   :  { %121 = vst.msk [vmem:[#allocation0 + $0x40] sm:$0x4] %vm34_vm1, %v114_v9   ;;  %123 = vst.msk [vmem:[#allocation0 + $0x5f] sm:$0x8] %vm34_vm1, %v114_v9  }
  0x91   :  { %125 = vst.msk [vmem:[#allocation0 + $0x7e] sm:$0x10] %vm34_vm1, %v114_v9   ;;  %127 = vst.msk [vmem:[#allocation0 + $0x9d] sm:$0x20] %vm34_vm1, %v114_v9  }
  0x92   :  { %129 = vst.msk [vmem:[#allocation0 + $0xbc] sm:$0x40] %vm34_vm1, %v114_v9   ;;  %131 = vst.msk [vmem:[#allocation0 + $0xdb] sm:$0x80] %vm34_vm1, %v114_v9   ;;  %v315_v21 = vpop.permute.xlu0 %314   ;;  %v335_v22 = vpop.permute.xlu1 %334   ;;  %v436_v45 = vld [vmem:[#allocation0 + $0x18] sm:$0xff] }
  0x93   :  { %178 = vst.msk [vmem:[#allocation0 + $0x4] sm:$0x1] %vm34_vm1, %v175_v10   ;;  %180 = vst.msk [vmem:[#allocation0 + $0x23] sm:$0x2] %vm34_vm1, %v175_v10   ;;  %v464_v46 = vld [vmem:[#allocation0 + $0x38] sm:$0xff] }
  0x94   :  { %182 = vst.msk [vmem:[#allocation0 + $0x42] sm:$0x4] %vm34_vm1, %v175_v10   ;;  %184 = vst.msk [vmem:[#allocation0 + $0x61] sm:$0x8] %vm34_vm1, %v175_v10   ;;  %v492_v47 = vld [vmem:[#allocation0 + $0x58] sm:$0xff] }
  0x95   :  { %186 = vst.msk [vmem:[#allocation0 + $0x80] sm:$0x10] %vm34_vm1, %v175_v10   ;;  %188 = vst.msk [vmem:[#allocation0 + $0x9f] sm:$0x20] %vm34_vm1, %v175_v10   ;;  %v520_v48 = vld [vmem:[#allocation0 + $0x78] sm:$0xff] }
  0x96   :  { %190 = vst.msk [vmem:[#allocation0 + $0xbe] sm:$0x40] %vm34_vm1, %v175_v10   ;;  %192 = vst.msk [vmem:[#allocation0 + $0xdd] sm:$0x80] %vm34_vm1, %v175_v10   ;;  %v355_v39 = vpop.permute.xlu0 %354   ;;  %v548_v49 = vld [vmem:[#allocation0 + $0x98] sm:$0xff] }
  0x97   :  { %158 = vst.msk [vmem:[#allocation0 + $0x3] sm:$0x1] %vm34_vm1, %v155_v11   ;;  %160 = vst.msk [vmem:[#allocation0 + $0x22] sm:$0x2] %vm34_vm1, %v155_v11   ;;  %v576_v50 = vld [vmem:[#allocation0 + $0xb8] sm:$0xff] }
  0x98   :  { %162 = vst.msk [vmem:[#allocation0 + $0x41] sm:$0x4] %vm34_vm1, %v155_v11   ;;  %164 = vst.msk [vmem:[#allocation0 + $0x60] sm:$0x8] %vm34_vm1, %v155_v11   ;;  %v604_v51 = vld [vmem:[#allocation0 + $0xd8] sm:$0xff] }
  0x99   :  { %166 = vst.msk [vmem:[#allocation0 + $0x7f] sm:$0x10] %vm34_vm1, %v155_v11   ;;  %168 = vst.msk [vmem:[#allocation0 + $0x9e] sm:$0x20] %vm34_vm1, %v155_v11   ;;  %v632_v61 = vld [vmem:[#allocation0 + $0xf8] sm:$0xff] }
  0x9a   :  { %170 = vst.msk [vmem:[#allocation0 + $0xbd] sm:$0x40] %vm34_vm1, %v155_v11   ;;  %172 = vst.msk [vmem:[#allocation0 + $0xdc] sm:$0x80] %vm34_vm1, %v155_v11  }
  0x9b   :  { %218 = vst.msk [vmem:[#allocation0 + $0x6] sm:$0x1] %vm34_vm1, %v215_v12   ;;  %220 = vst.msk [vmem:[#allocation0 + $0x25] sm:$0x2] %vm34_vm1, %v215_v12  }
  0x9c   :  { %222 = vst.msk [vmem:[#allocation0 + $0x44] sm:$0x4] %vm34_vm1, %v215_v12   ;;  %224 = vst.msk [vmem:[#allocation0 + $0x63] sm:$0x8] %vm34_vm1, %v215_v12  }
  0x9d   :  { %226 = vst.msk [vmem:[#allocation0 + $0x82] sm:$0x10] %vm34_vm1, %v215_v12   ;;  %228 = vst.msk [vmem:[#allocation0 + $0xa1] sm:$0x20] %vm34_vm1, %v215_v12  }
  0x9e   :  { %230 = vst.msk [vmem:[#allocation0 + $0xc0] sm:$0x40] %vm34_vm1, %v215_v12   ;;  %232 = vst.msk [vmem:[#allocation0 + $0xdf] sm:$0x80] %vm34_vm1, %v215_v12  }
  0x9f   :  { %198 = vst.msk [vmem:[#allocation0 + $0x5] sm:$0x1] %vm34_vm1, %v195_v13   ;;  %200 = vst.msk [vmem:[#allocation0 + $0x24] sm:$0x2] %vm34_vm1, %v195_v13  }
  0xa0   :  { %202 = vst.msk [vmem:[#allocation0 + $0x43] sm:$0x4] %vm34_vm1, %v195_v13   ;;  %204 = vst.msk [vmem:[#allocation0 + $0x62] sm:$0x8] %vm34_vm1, %v195_v13  }
  0xa1   :  { %206 = vst.msk [vmem:[#allocation0 + $0x81] sm:$0x10] %vm34_vm1, %v195_v13   ;;  %208 = vst.msk [vmem:[#allocation0 + $0xa0] sm:$0x20] %vm34_vm1, %v195_v13  }
  0xa2   :  { %210 = vst.msk [vmem:[#allocation0 + $0xbf] sm:$0x40] %vm34_vm1, %v195_v13   ;;  %212 = vst.msk [vmem:[#allocation0 + $0xde] sm:$0x80] %vm34_vm1, %v195_v13  }
  0xa3   :  { %258 = vst.msk [vmem:[#allocation0 + $0x8] sm:$0x1] %vm34_vm1, %v255_v14   ;;  %260 = vst.msk [vmem:[#allocation0 + $0x27] sm:$0x2] %vm34_vm1, %v255_v14  }
  0xa4   :  { %262 = vst.msk [vmem:[#allocation0 + $0x46] sm:$0x4] %vm34_vm1, %v255_v14   ;;  %264 = vst.msk [vmem:[#allocation0 + $0x65] sm:$0x8] %vm34_vm1, %v255_v14  }
  0xa5   :  { %266 = vst.msk [vmem:[#allocation0 + $0x84] sm:$0x10] %vm34_vm1, %v255_v14   ;;  %268 = vst.msk [vmem:[#allocation0 + $0xa3] sm:$0x20] %vm34_vm1, %v255_v14  }
  0xa6   :  { %270 = vst.msk [vmem:[#allocation0 + $0xc2] sm:$0x40] %vm34_vm1, %v255_v14   ;;  %272 = vst.msk [vmem:[#allocation0 + $0xe1] sm:$0x80] %vm34_vm1, %v255_v14  }
  0xa7   :  { %238 = vst.msk [vmem:[#allocation0 + $0x7] sm:$0x1] %vm34_vm1, %v235_v15   ;;  %240 = vst.msk [vmem:[#allocation0 + $0x26] sm:$0x2] %vm34_vm1, %v235_v15  }
  0xa8   :  { %242 = vst.msk [vmem:[#allocation0 + $0x45] sm:$0x4] %vm34_vm1, %v235_v15   ;;  %244 = vst.msk [vmem:[#allocation0 + $0x64] sm:$0x8] %vm34_vm1, %v235_v15  }
  0xa9   :  { %246 = vst.msk [vmem:[#allocation0 + $0x83] sm:$0x10] %vm34_vm1, %v235_v15   ;;  %248 = vst.msk [vmem:[#allocation0 + $0xa2] sm:$0x20] %vm34_vm1, %v235_v15  }
  0xaa   :  { %250 = vst.msk [vmem:[#allocation0 + $0xc1] sm:$0x40] %vm34_vm1, %v235_v15   ;;  %252 = vst.msk [vmem:[#allocation0 + $0xe0] sm:$0x80] %vm34_vm1, %v235_v15   ;;  %v423_v18 = vld [vmem:[#allocation0 + $0x8] sm:$0xff] }
  0xab   :  { %278 = vst.msk [vmem:[#allocation0 + $0x10] sm:$0x1] %vm34_vm1, %v275_v16   ;;  %280 = vst.msk [vmem:[#allocation0 + $0x2f] sm:$0x2] %vm34_vm1, %v275_v16   ;;  %v450_v19 = vld [vmem:[#allocation0 + $0x28] sm:$0xff] }
  0xac   :  { %282 = vst.msk [vmem:[#allocation0 + $0x4e] sm:$0x4] %vm34_vm1, %v275_v16   ;;  %284 = vst.msk [vmem:[#allocation0 + $0x6d] sm:$0x8] %vm34_vm1, %v275_v16   ;;  %v478_v20 = vld [vmem:[#allocation0 + $0x48] sm:$0xff] }
  0xad   :  { %286 = vst.msk [vmem:[#allocation0 + $0x8c] sm:$0x10] %vm34_vm1, %v275_v16   ;;  %288 = vst.msk [vmem:[#allocation0 + $0xab] sm:$0x20] %vm34_vm1, %v275_v16   ;;  %v506_v23 = vld [vmem:[#allocation0 + $0x68] sm:$0xff] }
  0xae   :  { %290 = vst.msk [vmem:[#allocation0 + $0xca] sm:$0x40] %vm34_vm1, %v275_v16   ;;  %292 = vst.msk [vmem:[#allocation0 + $0xe9] sm:$0x80] %vm34_vm1, %v275_v16   ;;  %v534_v24 = vld [vmem:[#allocation0 + $0x88] sm:$0xff]  ;;  %v418_v28 = vld [vmem:[#allocation0] sm:$0xff] }
  0xaf   :  { %298 = vst.msk [vmem:[#allocation0 + $0x11] sm:$0x1] %vm34_vm1, %v295_v17   ;;  %300 = vst.msk [vmem:[#allocation0 + $0x30] sm:$0x2] %vm34_vm1, %v295_v17   ;;  %v562_v25 = vld [vmem:[#allocation0 + $0xa8] sm:$0xff]  ;;  %v443_v29 = vld [vmem:[#allocation0 + $0x20] sm:$0xff]  ;;  %v707_v32 = vpack.c.bf16 %v423_v18, %v418_v28 }
  0xb0   :  { %302 = vst.msk [vmem:[#allocation0 + $0x4f] sm:$0x4] %vm34_vm1, %v295_v17   ;;  %304 = vst.msk [vmem:[#allocation0 + $0x6e] sm:$0x8] %vm34_vm1, %v295_v17   ;;  %v590_v26 = vld [vmem:[#allocation0 + $0xc8] sm:$0xff]  ;;  %v471_v30 = vld [vmem:[#allocation0 + $0x40] sm:$0xff]  ;;  %v717_v36 = vpack.c.bf16 %v450_v19, %v443_v29 }
  0xb1   :  { %306 = vst.msk [vmem:[#allocation0 + $0x8d] sm:$0x10] %vm34_vm1, %v295_v17   ;;  %308 = vst.msk [vmem:[#allocation0 + $0xac] sm:$0x20] %vm34_vm1, %v295_v17   ;;  %v618_v27 = vld [vmem:[#allocation0 + $0xe8] sm:$0xff]  ;;  %v499_v31 = vld [vmem:[#allocation0 + $0x60] sm:$0xff]  ;;  %v727_v37 = vpack.c.bf16 %v478_v20, %v471_v30 }
  0xb2   :  { %310 = vst.msk [vmem:[#allocation0 + $0xcb] sm:$0x40] %vm34_vm1, %v295_v17   ;;  %312 = vst.msk [vmem:[#allocation0 + $0xea] sm:$0x80] %vm34_vm1, %v295_v17   ;;  %v527_v33 = vld [vmem:[#allocation0 + $0x80] sm:$0xff]  ;;  %v737_v38 = vpack.c.bf16 %v506_v23, %v499_v31 }
  0xb3   :  { %318 = vst.msk [vmem:[#allocation0 + $0x12] sm:$0x1] %vm34_vm1, %v315_v21   ;;  %320 = vst.msk [vmem:[#allocation0 + $0x31] sm:$0x2] %vm34_vm1, %v315_v21   ;;  %v555_v34 = vld [vmem:[#allocation0 + $0xa0] sm:$0xff]  ;;  %v747_v41 = vpack.c.bf16 %v534_v24, %v527_v33 }
  0xb4   :  { %322 = vst.msk [vmem:[#allocation0 + $0x50] sm:$0x4] %vm34_vm1, %v315_v21   ;;  %324 = vst.msk [vmem:[#allocation0 + $0x6f] sm:$0x8] %vm34_vm1, %v315_v21   ;;  %v583_v35 = vld [vmem:[#allocation0 + $0xc0] sm:$0xff]  ;;  %v757_v42 = vpack.c.bf16 %v562_v25, %v555_v34 }
  0xb5   :  { %326 = vst.msk [vmem:[#allocation0 + $0x8e] sm:$0x10] %vm34_vm1, %v315_v21   ;;  %328 = vst.msk [vmem:[#allocation0 + $0xad] sm:$0x20] %vm34_vm1, %v315_v21   ;;  %v611_v40 = vld [vmem:[#allocation0 + $0xe0] sm:$0xff]  ;;  %v767_v43 = vpack.c.bf16 %v590_v26, %v583_v35 }
  0xb6   :  { %330 = vst.msk [vmem:[#allocation0 + $0xcc] sm:$0x40] %vm34_vm1, %v315_v21   ;;  %332 = vst.msk [vmem:[#allocation0 + $0xeb] sm:$0x80] %vm34_vm1, %v315_v21   ;;  %v777_v44 = vpack.c.bf16 %v618_v27, %v611_v40 }
  0xb7   :  { %338 = vst.msk [vmem:[#allocation0 + $0x13] sm:$0x1] %vm34_vm1, %v335_v22   ;;  %340 = vst.msk [vmem:[#allocation0 + $0x32] sm:$0x2] %vm34_vm1, %v335_v22  }
  0xb8   :  { %342 = vst.msk [vmem:[#allocation0 + $0x51] sm:$0x4] %vm34_vm1, %v335_v22   ;;  %344 = vst.msk [vmem:[#allocation0 + $0x70] sm:$0x8] %vm34_vm1, %v335_v22  }
  0xb9   :  { %346 = vst.msk [vmem:[#allocation0 + $0x8f] sm:$0x10] %vm34_vm1, %v335_v22   ;;  %348 = vst.msk [vmem:[#allocation0 + $0xae] sm:$0x20] %vm34_vm1, %v335_v22  }
  0xba   :  { %350 = vst.msk [vmem:[#allocation0 + $0xcd] sm:$0x40] %vm34_vm1, %v335_v22   ;;  %352 = vst.msk [vmem:[#allocation0 + $0xec] sm:$0x80] %vm34_vm1, %v335_v22  }
  0xbb   :  { %708 = vst [vmem:[%s1047_s1] sm:$0xff] %v707_v32   ;;  %358 = vst.msk [vmem:[#allocation0 + $0x14] sm:$0x1] %vm34_vm1, %v355_v39  }
  0xbc   :  { %360 = vst.msk [vmem:[#allocation0 + $0x33] sm:$0x2] %vm34_vm1, %v355_v39   ;;  %362 = vst.msk [vmem:[#allocation0 + $0x52] sm:$0x4] %vm34_vm1, %v355_v39  }
  0xbd   :  { %364 = vst.msk [vmem:[#allocation0 + $0x71] sm:$0x8] %vm34_vm1, %v355_v39   ;;  %366 = vst.msk [vmem:[#allocation0 + $0x90] sm:$0x10] %vm34_vm1, %v355_v39  }
  0xbe   :  { %368 = vst.msk [vmem:[#allocation0 + $0xaf] sm:$0x20] %vm34_vm1, %v355_v39   ;;  %370 = vst.msk [vmem:[#allocation0 + $0xce] sm:$0x40] %vm34_vm1, %v355_v39  }
  0xbf   :  { %372 = vst.msk [vmem:[#allocation0 + $0xed] sm:$0x80] %vm34_vm1, %v355_v39   ;;  %785 = vst [vmem:[%s1047_s1 + $0x10] sm:$0xff] %v717_v36  }
  0xc0   :  { %787 = vst [vmem:[%s1047_s1 + $0x20] sm:$0xff] %v727_v37   ;;  %789 = vst [vmem:[%s1047_s1 + $0x30] sm:$0xff] %v737_v38  }
  0xc1   :  { %791 = vst [vmem:[%s1047_s1 + $0x40] sm:$0xff] %v747_v41   ;;  %793 = vst [vmem:[%s1047_s1 + $0x50] sm:$0xff] %v757_v42  }
  0xc2   :  { %795 = vst [vmem:[%s1047_s1 + $0x60] sm:$0xff] %v767_v43   ;;  %797 = vst [vmem:[%s1047_s1 + $0x70] sm:$0xff] %v777_v44   ;;  %v429_v52 = vld [vmem:[#allocation0 + $0x10] sm:$0xff] }
  0xc3   :  { %v457_v53 = vld [vmem:[#allocation0 + $0x30] sm:$0xff]  ;;  %v712_v55 = vpack.c.bf16 %v436_v45, %v429_v52 }
  0xc4   :  { %v485_v54 = vld [vmem:[#allocation0 + $0x50] sm:$0xff]  ;;  %v722_v56 = vpack.c.bf16 %v464_v46, %v457_v53 }
  0xc5   :  { %v732_v57 = vpack.c.bf16 %v492_v47, %v485_v54  ;;  %v513_v58 = vld [vmem:[#allocation0 + $0x70] sm:$0xff]  ;;  %784 = vst [vmem:[%s1047_s1 + $0x8] sm:$0xff] %v712_v55  }
  0xc6   :  { %v541_v59 = vld [vmem:[#allocation0 + $0x90] sm:$0xff]  ;;  %v742_v62 = vpack.c.bf16 %v520_v48, %v513_v58  ;;  %786 = vst [vmem:[%s1047_s1 + $0x18] sm:$0xff] %v722_v56  }
  0xc7   :  { %v569_v60 = vld [vmem:[#allocation0 + $0xb0] sm:$0xff]  ;;  %v752_v63 = vpack.c.bf16 %v548_v49, %v541_v59  ;;  %788 = vst [vmem:[%s1047_s1 + $0x28] sm:$0xff] %v732_v57  }
  0xc8   :  { %v762_v0 = vpack.c.bf16 %v576_v50, %v569_v60  ;;  %v597_v1 = vld [vmem:[#allocation0 + $0xd0] sm:$0xff]  ;;  %790 = vst [vmem:[%s1047_s1 + $0x38] sm:$0xff] %v742_v62  }
  0xc9   :  { %v625_v2 = vld [vmem:[#allocation0 + $0xf0] sm:$0xff]  ;;  %v772_v3 = vpack.c.bf16 %v604_v51, %v597_v1  ;;  %792 = vst [vmem:[%s1047_s1 + $0x48] sm:$0xff] %v752_v63  }
  0xca   :  { %v782_v4 = vpack.c.bf16 %v632_v61, %v625_v2  ;;  %794 = vst [vmem:[%s1047_s1 + $0x58] sm:$0xff] %v762_v0  }
  0xcb   :  { %796 = vst [vmem:[%s1047_s1 + $0x68] sm:$0xff] %v772_v3  }
  0xcc   :  { %798 = vst [vmem:[%s1047_s1 + $0x78] sm:$0xff] %v782_v4  }

// kernel: multiscale_discriminator_forward.6
= control target key start
LH: loop header
LB: loop body
LE: loop exit
PB: predicated region body
PF: predicated region fallthrough
CT: control target
= control target key end

     0   :  { %s977_s0 = inlined_call_operand.vmem [shape: s32[3], index: 0, kind: input, shape index: {}]   ;;  %s978_s1 = inlined_call_operand.vmem [shape: bf16[3,64,128], index: 1, kind: input, shape index: {}]   ;;  %s979_s2 = inlined_call_operand.vmem [shape: bf16[3,128,128], index: 2, kind: input, shape index: {}]   ;;  %s980_s3 = inlined_call_operand.vmem [shape: f32[3,1,128], index: 3, kind: input, shape index: {}]   ;;  %s981_s4 = inlined_call_operand.vmem [shape: f32[3,1,128], index: 4, kind: input, shape index: {}]   ;;  %s982_s5 = inlined_call_operand.vmem [shape: bf16[3,64,128], index: 5, kind: output, shape index: {}]  }
   0x1   :  { %s10_s20 = sshll.u32 %s977_s0, 4  ;;  %s11_s20 = int_to_ptr.vmem [resolvable:$true] %s10_s20 }
   0x2   :  { %s853_s21 = scalar_lea.vmem %s11_s20, 16  ;;  %p858_p1 = scmp.lt.s32.totalorder %s11_s20, %s11_s20 }
   0x3   :  { %p854_p0 = scmp.ne.s32.totalorder %s11_s20, %s853_s21  ;;  %p859_p2 = scmp.lt.s32.totalorder %s853_s21, %s853_s21 }
   0x5   :  { %p860_p3 = por %p859_p2, %p858_p1 }
   0x7   :  { %p861_p4 = pnand %p860_p3, %p854_p0 }
   0x9   :  { %864 = shalt.err (!%p861_p4)  }
   0xa   :  { %s875_s22 = smov [#allocation3]  }
   0xb   :  { %13 = dma.vmem_to_smem %s11_s20, 16, %s875_s22, [#allocation2] }
   0xc   :  { %869 = dma.done.wait [#allocation2], 16 }
   0xd   :  { %870 = vsyncadd [#allocation2], 4294967280 }
   0xe   :  { %15 = sfence }
   0xf   :  { %s910_s23 = smov 0  }
  0x10 LB: > { %s696_s0 = sadd.s32 4294967295, %s873_s23   ;;  %p700_p5 = scmp.ge.s32.totalorder %s873_s23, 1  ;;  %s873_s23 = sphi %s910_s23, %s21_s23  }
  0x11   : > { %p195_p6 = scmp.lt.s32.totalorder %s873_s23, 4 }
  0x13   : > { %p196_p7 = pnand %p700_p5, %p195_p6 }
  0x14   : > { %p232_p8 = scmp.lt.s32.totalorder (!%p196_p7), %s696_s0, 2  ;;  %s918_s24 = sld [smem:[#allocation3 + %s696_s0]] (!%p196_p7)  ;;  %v435_v28 = vlaneseq (!%p196_p7)  ;;  %v876_v46 = vmov (!%p196_p7), 0.0  }
  0x15   : > { %199 = sbr.rel (%p196_p7) target bundleno = 370 (0x172), region = 36 }
  0x16   : > { %v436_v31 = vshrl.u32 (!%p196_p7), %v435_v28, 7 }
  0x18   : > { %v437_v35 = vadd.s32 (!%p196_p7), 8, %v436_v31  ;;  %v438_v36 = vadd.s32 (!%p196_p7), 16, %v436_v31  ;;  %v439_v37 = vadd.s32 (!%p196_p7), 24, %v436_v31  ;;  %v440_v38 = vadd.s32 (!%p196_p7), 32, %v436_v31 }
  0x19   : > { %v441_v40 = vadd.s32 (!%p196_p7), 40, %v436_v31  ;;  %v442_v41 = vadd.s32 (!%p196_p7), 48, %v436_v31  ;;  %v443_v42 = vadd.s32 (!%p196_p7), 56, %v436_v31 }
  0x1a   : > { %s416_s29 = scvt.s32.f32 (!%p196_p7), %s918_s24  ;;  %v444_v33 = vstv (!%p196_p7), %s918_s24 }
  0x1b   : > { %vm445_vm0 = vcmp.lt.s32.totalorder (!%p196_p7), %v436_v31, %v444_v33  ;;  %vm446_vm1 = vcmp.lt.s32.totalorder (!%p196_p7), %v437_v35, %v444_v33  ;;  %vm447_vm2 = vcmp.lt.s32.totalorder (!%p196_p7), %v438_v36, %v444_v33  ;;  %vm448_vm3 = vcmp.lt.s32.totalorder (!%p196_p7), %v439_v37, %v444_v33 }
  0x1c   : > { %s984_s0 = smov (!%p232_p8, %s696_s0), 2  ;;  %v417_v2 = vstv %s416_s29  ;;  %vm449_vm4 = vcmp.lt.s32.totalorder %v440_v38, %v444_v33  ;;  %vm450_vm5 = vcmp.lt.s32.totalorder %v441_v40, %v444_v33  ;;  %vm451_vm6 = vcmp.lt.s32.totalorder %v442_v41, %v444_v33 }
  0x1d   : > { %s740_s25 = sshll.u32 %s984_s0, 6  ;;  %s739_s30 = sshll.u32 %s984_s0, 5  ;;  %849 = vrcp.f32 %v417_v2  ;;  %vm452_vm7 = vcmp.lt.s32.totalorder %v443_v42, %v444_v33  ;;  %v719_v47 = vsel %vm445_vm0, 1.0, %v876_v46  ;;  %v720_v49 = vsel %vm446_vm1, 1.0, %v876_v46 }
  0x1e   : > { %s926_s28 = scalar_lea.vmem %s979_s2, %s740_s25  ;;  %s938_s8 = scalar_lea.vmem %s978_s1, %s739_s30  ;;  %v721_v50 = vsel %vm447_vm2, 1.0, %v876_v46  ;;  %v722_v51 = vsel %vm448_vm3, 1.0, %v876_v46  ;;  %v723_v52 = vsel %vm449_vm4, 1.0, %v876_v46  ;;  %v724_v53 = vsel %vm450_vm5, 1.0, %v876_v46 }
  0x1f   : > { %v837_v0 = vld [vmem:[%s926_s28] sm:$0xff]   ;;  %v838_v1 = vld [vmem:[%s926_s28 + $0x8] sm:$0xff]   ;;  %v839_v3 = vld [vmem:[%s926_s28 + $0x10] sm:$0xff]   ;;  %v725_v54 = vsel %vm451_vm6, 1.0, %v876_v46  ;;  %v726_v55 = vsel %vm452_vm7, 1.0, %v876_v46  ;;  %s244_s12 = scalar_lea.vmem %s980_s3, %s984_s0  ;;  %s247_s15 = scalar_lea.vmem %s981_s4, %s984_s0 }
  0x20   : > { %785 = vmatprep.subr.bf16.mxu0 %v837_v0  ;;  %809 = vmatprep.subr.bf16.mxu1 %v837_v0  ;;  %v840_v4 = vld [vmem:[%s926_s28 + $0x18] sm:$0xff]   ;;  %v845_v5 = vld [vmem:[%s938_s8] sm:$0xff]   ;;  %v847_v6 = vld [vmem:[%s938_s8 + $0x10] sm:$0xff]   ;;  %s252_s18 = scalar_lea.vmem %s982_s5, %s739_s30 }
  0x21   : > { %786 = vmatpush3.bf16.msra.mxu0 %v837_v0  ;;  %817 = vmatpush3.bf16.msra.mxu1 %v837_v0  ;;  %v841_v7 = vld [vmem:[%s926_s28 + $0x20] sm:$0xff]   ;;  %v842_v9 = vld [vmem:[%s926_s28 + $0x28] sm:$0xff]   ;;  %v843_v10 = vld [vmem:[%s926_s28 + $0x30] sm:$0xff]  }
  0x22   : > { %787 = vmatprep.subr.bf16.mxu0 %v838_v1  ;;  %810 = vmatprep.subr.bf16.mxu1 %v838_v1  ;;  %v844_v11 = vld [vmem:[%s926_s28 + $0x38] sm:$0xff]   ;;  %v846_v12 = vld [vmem:[%s938_s8 + $0x8] sm:$0xff]   ;;  %v728_v41 = vld [vmem:[%s247_s15] ss:$0 sm:$0xff] }
  0x23   : > { %801 = vmatprep.mubr.bf16.mxu0 %v845_v5  ;;  %805 = vmatprep.mubr.bf16.mxu1 %v847_v6  ;;  %v848_v13 = vld [vmem:[%s938_s8 + $0x18] sm:$0xff]  }
  0x25   : > { %788 = vmatpush3.bf16.msra.mxu0 %v838_v1  ;;  %818 = vmatpush3.bf16.msra.mxu1 %v838_v1 }
  0x26   : > { %789 = vmatprep.subr.bf16.mxu0 %v839_v3  ;;  %811 = vmatprep.subr.bf16.mxu1 %v839_v3 }
  0x27   : > { %v850_v8 = vpop.eup %849 }
  0x28   : > { %825 = vpush %v850_v8 }
  0x29   : > { %790 = vmatpush3.bf16.msra.mxu0 %v839_v3  ;;  %819 = vmatpush3.bf16.msra.mxu1 %v839_v3 }
  0x2a   : > { %791 = vmatprep.subr.bf16.mxu0 %v840_v4  ;;  %812 = vmatprep.subr.bf16.mxu1 %v840_v4 }
  0x2d   : > { %792 = vmatpush3.bf16.msra.mxu0 %v840_v4  ;;  %820 = vmatpush3.bf16.msra.mxu1 %v840_v4 }
  0x2e   : > { %793 = vmatprep.subr.bf16.mxu0 %v841_v7  ;;  %813 = vmatprep.subr.bf16.mxu1 %v841_v7 }
  0x31   : > { %794 = vmatpush3.bf16.msra.mxu0 %v841_v7  ;;  %821 = vmatpush3.bf16.msra.mxu1 %v841_v7 }
  0x32   : > { %795 = vmatprep.subr.bf16.mxu0 %v842_v9  ;;  %814 = vmatprep.subr.bf16.mxu1 %v842_v9 }
  0x35   : > { %796 = vmatpush3.bf16.msra.mxu0 %v842_v9  ;;  %822 = vmatpush3.bf16.msra.mxu1 %v842_v9 }
  0x36   : > { %797 = vmatprep.subr.bf16.mxu0 %v843_v10  ;;  %815 = vmatprep.subr.bf16.mxu1 %v843_v10 }
  0x39   : > { %798 = vmatpush3.bf16.msra.mxu0 %v843_v10  ;;  %823 = vmatpush3.bf16.msra.mxu1 %v843_v10 }
  0x3a   : > { %799 = vmatprep.subr.bf16.mxu0 %v844_v11  ;;  %816 = vmatprep.subr.bf16.mxu1 %v844_v11 }
  0x3d   : > { %800 = vmatpush3.bf16.msra.mxu0 %v844_v11  ;;  %824 = vmatpush3.bf16.msra.mxu1 %v844_v11 }
  0x40   : > { %802 = vmatmul.mubr.bf16.vlgmr.msra.gmra.mrb[0].mxu0 %v846_v12  ;;  %806 = vmatmul.mubr.bf16.vlgmr.msra.gmra.mrb[0].mxu1 %v848_v13 }
  0x59   : > { %s950_s9 = spop %825 }
  0x5a   : > { %v433_v44 = vstv %s950_s9 }
 0x113   : > { %v803_v14 = vpop.f32.mrb[0].mxu0  ;;  %v807_v15 = vpop.f32.mrb[0].mxu1 }
 0x114   : > { %v385_v16 = vpop.f32.mrb[1].mxu0  ;;  %v401_v17 = vpop.f32.mrb[1].mxu1 }
 0x115   : > { %v804_v18 = vpop.f32.mrb[2].mxu0  ;;  %v808_v19 = vpop.f32.mrb[2].mxu1 }
 0x116   : > { %v388_v20 = vpop.f32.mrb[3].mxu0  ;;  %v404_v21 = vpop.f32.mrb[3].mxu1 }
 0x117   : > { %v420_v22 = vadd.f32 %v388_v20, %v385_v16 }
 0x119   : > { %v421_v23 = vadd.f32 %v803_v14, %v420_v22 }
 0x11b   : > { %v422_v24 = vadd.f32 %v804_v18, %v421_v23 }
 0x11d   : > { %v423_v25 = vadd.f32 %v422_v24, %v401_v17 }
 0x11f   : > { %v424_v26 = vadd.f32 %v423_v25, %v404_v21 }
 0x121   : > { %v425_v27 = vadd.f32 %v807_v15, %v424_v26 }
 0x123   : > { %v426_v29 = vadd.f32 %v808_v19, %v425_v27 }
 0x125   : > { %v427_v30 = vrot.slane %v426_v29, 4 }
 0x127   : > { %v428_v32 = vadd.f32 %v427_v30, %v426_v29 }
 0x129   : > { %v429_v34 = vrot.slane %v428_v32, 2 }
 0x12b   : > { %v430_v39 = vadd.f32 %v429_v34, %v428_v32  ;;  %v727_v32 = vld [vmem:[%s244_s12] ss:$0 sm:$0xff] }
 0x12d   : > { %v431_v43 = vrot.slane %v430_v39, 1 }
 0x12f   : > { %v432_v45 = vadd.f32 %v431_v43, %v430_v39 }
 0x131   : > { %v434_v48 = vmul.f32 %v433_v44, %v432_v45 }
 0x133   : > { %v469_v56 = vsub.f32 %v385_v16, %v434_v48  ;;  %v470_v57 = vsub.f32 %v388_v20, %v434_v48  ;;  %v471_v58 = vsub.f32 %v803_v14, %v434_v48  ;;  %v472_v59 = vsub.f32 %v804_v18, %v434_v48 }
 0x134   : > { %v473_v60 = vsub.f32 %v401_v17, %v434_v48  ;;  %v474_v61 = vsub.f32 %v404_v21, %v434_v48  ;;  %v475_v62 = vsub.f32 %v807_v15, %v434_v48  ;;  %v476_v63 = vsub.f32 %v808_v19, %v434_v48 }
 0x135   : > { %v477_v0 = vmul.f32 %v719_v47, %v469_v56  ;;  %v478_v1 = vmul.f32 %v720_v49, %v470_v57  ;;  %v479_v2 = vmul.f32 %v721_v50, %v471_v58  ;;  %v480_v3 = vmul.f32 %v722_v51, %v472_v59 }
 0x136   : > { %v481_v4 = vmul.f32 %v723_v52, %v473_v60  ;;  %v482_v5 = vmul.f32 %v724_v53, %v474_v61  ;;  %v483_v6 = vmul.f32 %v725_v54, %v475_v62  ;;  %v484_v7 = vmul.f32 %v726_v55, %v476_v63 }
 0x137   : > { %v485_v8 = vmul.f32 %v477_v0, %v477_v0  ;;  %v486_v9 = vmul.f32 %v478_v1, %v478_v1  ;;  %v487_v10 = vmul.f32 %v479_v2, %v479_v2  ;;  %v488_v12 = vmul.f32 %v480_v3, %v480_v3 }
 0x138   : > { %v489_v14 = vmul.f32 %v481_v4, %v481_v4  ;;  %v490_v17 = vmul.f32 %v482_v5, %v482_v5  ;;  %v491_v18 = vmul.f32 %v483_v6, %v483_v6  ;;  %v492_v20 = vmul.f32 %v484_v7, %v484_v7 }
 0x139   : > { %v493_v11 = vadd.f32 %v486_v9, %v485_v8 }
 0x13b   : > { %v494_v13 = vadd.f32 %v493_v11, %v487_v10 }
 0x13d   : > { %v495_v16 = vadd.f32 %v494_v13, %v488_v12 }
 0x13f   : > { %v496_v15 = vadd.f32 %v495_v16, %v489_v14 }
 0x141   : > { %v497_v19 = vadd.f32 %v496_v15, %v490_v17 }
 0x143   : > { %v498_v21 = vadd.f32 %v497_v19, %v491_v18 }
 0x145   : > { %v499_v22 = vadd.f32 %v498_v21, %v492_v20 }
 0x147   : > { %v500_v23 = vrot.slane %v499_v22, 4 }
 0x149   : > { %v501_v24 = vadd.f32 %v500_v23, %v499_v22 }
 0x14b   : > { %v502_v25 = vrot.slane %v501_v24, 2 }
 0x14d   : > { %v503_v26 = vadd.f32 %v502_v25, %v501_v24 }
 0x14f   : > { %v504_v27 = vrot.slane %v503_v26, 1 }
 0x151   : > { %v505_v28 = vadd.f32 %v504_v27, %v503_v26 }
 0x153   : > { %v506_v29 = vmul.f32 %v505_v28, %v433_v44 }
 0x155   : > { %v507_v30 = vadd.f32 1e-05, %v506_v29 }
 0x157   : > { %851 = vrsqrt.f32 %v507_v30 }
 0x161   : > { %v852_v31 = vpop.eup %851 }
 0x162   : > { %v509_v33 = vmul.f32 %v852_v31, %v469_v56  ;;  %v510_v34 = vmul.f32 %v852_v31, %v470_v57  ;;  %v511_v35 = vmul.f32 %v852_v31, %v471_v58  ;;  %v512_v36 = vmul.f32 %v852_v31, %v472_v59 }
 0x163   : > { %v513_v37 = vmul.f32 %v852_v31, %v473_v60  ;;  %v514_v38 = vmul.f32 %v852_v31, %v474_v61  ;;  %v515_v39 = vmul.f32 %v852_v31, %v475_v62  ;;  %v516_v40 = vmul.f32 %v852_v31, %v476_v63 }
 0x164   : > { %v524_v42 = vmul.f32 %v727_v32, %v509_v33  ;;  %v525_v43 = vmul.f32 %v727_v32, %v510_v34  ;;  %v526_v44 = vmul.f32 %v727_v32, %v511_v35  ;;  %v527_v45 = vmul.f32 %v727_v32, %v512_v36 }
 0x165   : > { %v528_v46 = vmul.f32 %v727_v32, %v513_v37  ;;  %v529_v47 = vmul.f32 %v727_v32, %v514_v38  ;;  %v530_v48 = vmul.f32 %v727_v32, %v515_v39  ;;  %v531_v49 = vmul.f32 %v727_v32, %v516_v40 }
 0x166   : > { %v539_v50 = vadd.f32 %v728_v41, %v524_v42  ;;  %v540_v51 = vadd.f32 %v728_v41, %v525_v43  ;;  %v541_v52 = vadd.f32 %v728_v41, %v526_v44  ;;  %v542_v53 = vadd.f32 %v728_v41, %v527_v45 }
 0x167   : > { %v543_v54 = vadd.f32 %v728_v41, %v528_v46  ;;  %v544_v55 = vadd.f32 %v728_v41, %v529_v47  ;;  %v545_v56 = vadd.f32 %v728_v41, %v530_v48  ;;  %v546_v57 = vadd.f32 %v728_v41, %v531_v49 }
 0x168   : > { %vm547_vm8 = vcmp.gt.f32.partialorder %v539_v50, 0.0  ;;  %vm548_vm9 = vcmp.gt.f32.partialorder %v540_v51, 0.0  ;;  %vm549_vm10 = vcmp.gt.f32.partialorder %v541_v52, 0.0  ;;  %vm550_vm11 = vcmp.gt.f32.partialorder %v542_v53, 0.0 }
 0x169   : > { %vm551_vm12 = vcmp.gt.f32.partialorder %v543_v54, 0.0  ;;  %vm552_vm13 = vcmp.gt.f32.partialorder %v544_v55, 0.0  ;;  %vm553_vm14 = vcmp.gt.f32.partialorder %v545_v56, 0.0  ;;  %vm554_vm15 = vcmp.gt.f32.partialorder %v546_v57, 0.0 }
 0x16a   : > { %v555_v58 = vmul.f32 0.2, %v539_v50  ;;  %v556_v59 = vmul.f32 0.2, %v540_v51  ;;  %v557_v60 = vmul.f32 0.2, %v541_v52 }
 0x16b   : > { %v558_v61 = vmul.f32 0.2, %v542_v53  ;;  %v559_v62 = vmul.f32 0.2, %v543_v54  ;;  %v560_v63 = vmul.f32 0.2, %v544_v55 }
 0x16c   : > { %v561_v0 = vmul.f32 0.2, %v545_v56  ;;  %v562_v1 = vmul.f32 0.2, %v546_v57  ;;  %v563_v2 = vsel %vm547_vm8, %v539_v50, %v555_v58  ;;  %v564_v3 = vsel %vm548_vm9, %v540_v51, %v556_v59 }
 0x16d   : > { %v565_v4 = vsel %vm549_vm10, %v541_v52, %v557_v60  ;;  %v566_v5 = vsel %vm550_vm11, %v542_v53, %v558_v61  ;;  %v567_v6 = vsel %vm551_vm12, %v543_v54, %v559_v62  ;;  %v568_v7 = vsel %vm552_vm13, %v544_v55, %v560_v63 }
 0x16e   : > { %v569_v8 = vsel %vm553_vm14, %v545_v56, %v561_v0  ;;  %v570_v9 = vsel %vm554_vm15, %v546_v57, %v562_v1  ;;  %v753_v10 = vpack.c.bf16 %v564_v3, %v563_v2  ;;  %v758_v11 = vpack.c.bf16 %v566_v5, %v565_v4 }
 0x16f   : > { %v763_v12 = vpack.c.bf16 %v568_v7, %v567_v6  ;;  %v768_v13 = vpack.c.bf16 %v570_v9, %v569_v8 }
 0x170   : > { %754 = vst [vmem:[%s252_s18] sm:$0xff] %v753_v10   ;;  %770 = vst [vmem:[%s252_s18 + $0x8] sm:$0xff] %v758_v11  }
 0x171   : > { %771 = vst [vmem:[%s252_s18 + $0x10] sm:$0xff] %v763_v12   ;;  %772 = vst [vmem:[%s252_s18 + $0x18] sm:$0xff] %v768_v13  }
 0x172 PF: > { %s21_s23 = sadd.s32 1, %s873_s23  }
 0x173   : > { %p18_p9 = scmp.ge.s32.totalorder %s21_s23, 5  }
 0x175   :  { %20 = sbr.rel (!%p18_p9) target bundleno = 16 (0x10), region = 75 }

// kernel: squeeze.19
= control target key start
LH: loop header
LB: loop body
LE: loop exit
PB: predicated region body
PF: predicated region fallthrough
CT: control target
= control target key end

     0   :  { %vm50_vm0 = vcmask 130048   ;;  %v131_v8 = vmov 0.0   ;;  %s166_s0 = inlined_call_operand.vmem [shape: bf16[1,18,16], index: 0, kind: input, shape index: {}]   ;;  %s167_s1 = inlined_call_operand.vmem [shape: bf16[2,3,3,16], index: 1, kind: output, shape index: {}]  }
   0x1   :  { %v119_v0 = vld [vmem:[%s166_s0 + $0x8] sm:$0xf]  ;;  %v127_v1 = vld [vmem:[%s166_s0] sm:$0xff]  }
   0x2   :  { %v17_v2 = vunpack.c.l.bf16 %v119_v0  ;;  %v128_v3 = vunpack.c.l.bf16 %v127_v1  ;;  %v129_v4 = vunpack.c.h.bf16 %v127_v1 }
   0x4   :  { %20 = vst [vmem:[#allocation1 + $0x10] sm:$0xff] %v17_v2  ;;  %51 = vst.msk [vmem:[#allocation0] sm:$0x7] %vm50_vm0, %v128_v3  }
   0x5   :  { %53 = vst.msk [vmem:[#allocation0 + $0x5] sm:$0x38] %vm50_vm0, %v128_v3   ;;  %55 = vst.msk [vmem:[#allocation0 + $0xa] sm:$0xc0] %vm50_vm0, %v128_v3  }
   0x6   :  { %60 = vst.msk [vmem:[#allocation0 + $0x12] ss:$6 sm:$0x3] %vm50_vm0, %v129_v4   ;;  %62 = vst.msk [vmem:[#allocation0 + $0x17] sm:$0xc] %vm50_vm0, %v129_v4  }
   0x7   :  { %64 = vst.msk [vmem:[#allocation0 + $0x1c] sm:$0x70] %vm50_vm0, %v129_v4   ;;  %66 = vst.msk [vmem:[#allocation0 + $0x21] sm:$0x80] %vm50_vm0, %v129_v4  }
   0xb   :  { %v68_v5 = vld [vmem:[#allocation1 + $0x10] sm:$0x3]  }
   0xc   :  { %v76_v6 = vld [vmem:[#allocation0] sm:$0xf]  ;;  %v81_v7 = vld [vmem:[#allocation0 + $0x8] sm:$0xf]  ;;  %71 = vst.msk [vmem:[#allocation0 + $0x29] sm:$0x3] %vm50_vm0, %v68_v5  }
   0xd   :  { %v77_v9 = vpack.c.bf16 %v131_v8, %v76_v6  ;;  %v82_v10 = vpack.c.bf16 %v131_v8, %v81_v7  ;;  %v87_v11 = vld [vmem:[#allocation0 + $0x10] sm:$0xf]  ;;  %v94_v12 = vld [vmem:[#allocation0 + $0x18] sm:$0xf] }
   0xe   :  { %v101_v13 = vld [vmem:[#allocation0 + $0x20] sm:$0xf]  ;;  %v88_v14 = vpack.c.bf16 %v131_v8, %v87_v11  ;;  %v95_v15 = vpack.c.bf16 %v131_v8, %v94_v12 }
   0xf   :  { %v102_v16 = vpack.c.bf16 %v131_v8, %v101_v13  ;;  %79 = vst [vmem:[%s167_s1] sm:$0x3] %v77_v9  ;;  %121 = vst [vmem:[%s167_s1 + $0x2] sm:$0x3] %v82_v10 }
  0x10   :  { %122 = vst [vmem:[%s167_s1 + $0x4] sm:$0x3] %v88_v14  ;;  %123 = vst [vmem:[%s167_s1 + $0x6] sm:$0x3] %v95_v15 }
  0x11   :  { %124 = vst [vmem:[%s167_s1 + $0x8] sm:$0x3] %v102_v16 }
  0x13   :  { %v108_v17 = vld [vmem:[#allocation0 + $0x28] sm:$0xf] }
  0x14   :  { %v109_v18 = vpack.c.bf16 %v131_v8, %v108_v17 }
  0x16   :  { %125 = vst [vmem:[%s167_s1 + $0xa] sm:$0x3] %v109_v18 }

// kernel: squeeze.18
= control target key start
LH: loop header
LB: loop body
LE: loop exit
PB: predicated region body
PF: predicated region fallthrough
CT: control target
= control target key end

     0   :  { %vm114_vm0 = vcmask 130048   ;;  %s355_s0 = inlined_call_operand.vmem [shape: bf16[1,50,16], index: 0, kind: input, shape index: {}]   ;;  %s356_s1 = inlined_call_operand.vmem [shape: bf16[2,5,5,16], index: 1, kind: output, shape index: {}]  }
   0x1   :  { %v245_v0 = vld [vmem:[%s355_s0 + $0x18] sm:$0xf]  ;;  %v297_v1 = vld [vmem:[%s355_s0 + $0x10] sm:$0xff]   ;;  %v298_v2 = vld [vmem:[%s355_s0 + $0x8] sm:$0xff]  }
   0x2   :  { %v17_v3 = vunpack.c.l.bf16 %v245_v0  ;;  %v262_v4 = vunpack.c.l.bf16 %v297_v1  ;;  %v263_v5 = vunpack.c.h.bf16 %v297_v1  ;;  %v266_v6 = vunpack.c.l.bf16 %v298_v2  ;;  %v269_v7 = vld [vmem:[%s355_s0] sm:$0xff]  }
   0x3   :  { %v267_v8 = vunpack.c.h.bf16 %v298_v2  ;;  %v270_v9 = vunpack.c.l.bf16 %v269_v7  ;;  %v271_v10 = vunpack.c.h.bf16 %v269_v7 }
   0x4   :  { %20 = vst [vmem:[#allocation1 + $0x30] sm:$0xff] %v17_v3  ;;  %131 = vst.msk [vmem:[#allocation0 + $0x19] sm:$0xf] %vm114_vm0, %v266_v6  }
   0x5   :  { %133 = vst.msk [vmem:[#allocation0 + $0x1c] sm:$0xf0] %vm114_vm0, %v266_v6   ;;  %147 = vst.msk [vmem:[#allocation0 + $0x32] sm:$0x7] %vm114_vm0, %v262_v4  }
   0x6   :  { %149 = vst.msk [vmem:[#allocation0 + $0x35] sm:$0xf8] %vm114_vm0, %v262_v4   ;;  %154 = vst.msk [vmem:[#allocation0 + $0x40] sm:$0x1f] %vm114_vm0, %v263_v5  }
   0x7   :  { %156 = vst.msk [vmem:[#allocation0 + $0x43] sm:$0xe0] %vm114_vm0, %v263_v5   ;;  %115 = vst.msk [vmem:[#allocation0] sm:$0x1f] %vm114_vm0, %v270_v9  }
   0x8   :  { %117 = vst.msk [vmem:[#allocation0 + $0x3] sm:$0xe0] %vm114_vm0, %v270_v9   ;;  %122 = vst.msk [vmem:[#allocation0 + $0xb] sm:$0x3] %vm114_vm0, %v271_v10  }
   0x9   :  { %124 = vst.msk [vmem:[#allocation0 + $0xe] sm:$0x7c] %vm114_vm0, %v271_v10   ;;  %126 = vst.msk [vmem:[#allocation0 + $0x11] sm:$0x80] %vm114_vm0, %v271_v10  }
   0xa   :  { %138 = vst.msk [vmem:[#allocation0 + $0x24] ss:$4 sm:$0x3] %vm114_vm0, %v267_v8   ;;  %140 = vst.msk [vmem:[#allocation0 + $0x27] sm:$0x3c] %vm114_vm0, %v267_v8  }
   0xb   :  { %142 = vst.msk [vmem:[#allocation0 + $0x2a] sm:$0xc0] %vm114_vm0, %v267_v8   ;;  %v158_v11 = vld [vmem:[#allocation1 + $0x30] sm:$0x3]  }
   0xc   :  { %161 = vst.msk [vmem:[#allocation0 + $0x4b] sm:$0x3] %vm114_vm0, %v158_v11  }
   0xd   :  { %v212_v12 = vld [vmem:[#allocation0 + $0x38] sm:$0xff]  ;;  %v219_v24 = vld [vmem:[#allocation0 + $0x40] sm:$0xff] }
   0xe   :  { %v166_v13 = vld [vmem:[#allocation0] sm:$0xff] }
   0xf   :  { %v171_v14 = vld [vmem:[#allocation0 + $0x8] sm:$0xff] }
  0x10   :  { %v177_v15 = vld [vmem:[#allocation0 + $0x10] sm:$0xff]  ;;  %v275_v16 = vpack.c.bf16 %v171_v14, %v166_v13  ;;  %v184_v17 = vld [vmem:[#allocation0 + $0x18] sm:$0xff] }
  0x11   :  { %v191_v18 = vld [vmem:[#allocation0 + $0x20] sm:$0xff]  ;;  %v198_v19 = vld [vmem:[#allocation0 + $0x28] sm:$0xff]  ;;  %v280_v20 = vpack.c.bf16 %v184_v17, %v177_v15 }
  0x12   :  { %v285_v21 = vpack.c.bf16 %v198_v19, %v191_v18  ;;  %v205_v22 = vld [vmem:[#allocation0 + $0x30] sm:$0xff]  ;;  %276 = vst [vmem:[%s356_s1] sm:$0xff] %v275_v16  }
  0x13   :  { %v290_v23 = vpack.c.bf16 %v212_v12, %v205_v22  ;;  %299 = vst [vmem:[%s356_s1 + $0x8] sm:$0xff] %v280_v20   ;;  %v226_v25 = vld [vmem:[#allocation0 + $0x48] sm:$0xff] }
  0x14   :  { %300 = vst [vmem:[%s356_s1 + $0x10] sm:$0xff] %v285_v21   ;;  %v295_v26 = vpack.c.bf16 %v226_v25, %v219_v24 }
  0x15   :  { %301 = vst [vmem:[%s356_s1 + $0x18] sm:$0xff] %v290_v23  }
  0x16   :  { %302 = vst [vmem:[%s356_s1 + $0x20] sm:$0xff] %v295_v26  }

// kernel: squeeze.21
= control target key start
LH: loop header
LB: loop body
LE: loop exit
PB: predicated region body
PF: predicated region fallthrough
CT: control target
= control target key end

     0   :  { %vm50_vm0 = vcmask 261120   ;;  %v131_v8 = vmov 0.0   ;;  %s166_s0 = inlined_call_operand.vmem [shape: bf16[1,18,32], index: 0, kind: input, shape index: {}]   ;;  %s167_s1 = inlined_call_operand.vmem [shape: bf16[2,3,3,32], index: 1, kind: output, shape index: {}]  }
   0x1   :  { %v119_v0 = vld [vmem:[%s166_s0 + $0x8] sm:$0xf]  ;;  %v127_v1 = vld [vmem:[%s166_s0] sm:$0xff]  }
   0x2   :  { %v17_v2 = vunpack.c.l.bf16 %v119_v0  ;;  %v128_v3 = vunpack.c.l.bf16 %v127_v1  ;;  %v129_v4 = vunpack.c.h.bf16 %v127_v1 }
   0x4   :  { %20 = vst [vmem:[#allocation1 + $0x10] sm:$0xff] %v17_v2  ;;  %51 = vst.msk [vmem:[#allocation0] sm:$0x7] %vm50_vm0, %v128_v3  }
   0x5   :  { %53 = vst.msk [vmem:[#allocation0 + $0x5] sm:$0x38] %vm50_vm0, %v128_v3   ;;  %55 = vst.msk [vmem:[#allocation0 + $0xa] sm:$0xc0] %vm50_vm0, %v128_v3  }
   0x6   :  { %60 = vst.msk [vmem:[#allocation0 + $0x12] ss:$6 sm:$0x3] %vm50_vm0, %v129_v4   ;;  %62 = vst.msk [vmem:[#allocation0 + $0x17] sm:$0xc] %vm50_vm0, %v129_v4  }
   0x7   :  { %64 = vst.msk [vmem:[#allocation0 + $0x1c] sm:$0x70] %vm50_vm0, %v129_v4   ;;  %66 = vst.msk [vmem:[#allocation0 + $0x21] sm:$0x80] %vm50_vm0, %v129_v4  }
   0xb   :  { %v68_v5 = vld [vmem:[#allocation1 + $0x10] sm:$0x3]  }
   0xc   :  { %v76_v6 = vld [vmem:[#allocation0] sm:$0xf]  ;;  %v81_v7 = vld [vmem:[#allocation0 + $0x8] sm:$0xf]  ;;  %71 = vst.msk [vmem:[#allocation0 + $0x29] sm:$0x3] %vm50_vm0, %v68_v5  }
   0xd   :  { %v77_v9 = vpack.c.bf16 %v131_v8, %v76_v6  ;;  %v82_v10 = vpack.c.bf16 %v131_v8, %v81_v7  ;;  %v87_v11 = vld [vmem:[#allocation0 + $0x10] sm:$0xf]  ;;  %v94_v12 = vld [vmem:[#allocation0 + $0x18] sm:$0xf] }
   0xe   :  { %v101_v13 = vld [vmem:[#allocation0 + $0x20] sm:$0xf]  ;;  %v88_v14 = vpack.c.bf16 %v131_v8, %v87_v11  ;;  %v95_v15 = vpack.c.bf16 %v131_v8, %v94_v12 }
   0xf   :  { %v102_v16 = vpack.c.bf16 %v131_v8, %v101_v13  ;;  %79 = vst [vmem:[%s167_s1] sm:$0x3] %v77_v9  ;;  %121 = vst [vmem:[%s167_s1 + $0x2] sm:$0x3] %v82_v10 }
  0x10   :  { %122 = vst [vmem:[%s167_s1 + $0x4] sm:$0x3] %v88_v14  ;;  %123 = vst [vmem:[%s167_s1 + $0x6] sm:$0x3] %v95_v15 }
  0x11   :  { %124 = vst [vmem:[%s167_s1 + $0x8] sm:$0x3] %v102_v16 }
  0x13   :  { %v108_v17 = vld [vmem:[#allocation0 + $0x28] sm:$0xf] }
  0x14   :  { %v109_v18 = vpack.c.bf16 %v131_v8, %v108_v17 }
  0x16   :  { %125 = vst [vmem:[%s167_s1 + $0xa] sm:$0x3] %v109_v18 }

// kernel: multiscale_discriminator_forward.7
= control target key start
LH: loop header
LB: loop body
LE: loop exit
PB: predicated region body
PF: predicated region fallthrough
CT: control target
= control target key end

     0   :  { %s914_s0 = inlined_call_operand.vmem [shape: s32[3], index: 0, kind: input, shape index: {}]   ;;  %s915_s1 = inlined_call_operand.vmem [shape: bf16[3,32,256], index: 1, kind: input, shape index: {}]   ;;  %s916_s2 = inlined_call_operand.vmem [shape: bf16[3,256,128], index: 2, kind: input, shape index: {}]   ;;  %s917_s3 = inlined_call_operand.vmem [shape: f32[3,1,128], index: 3, kind: input, shape index: {}]   ;;  %s918_s4 = inlined_call_operand.vmem [shape: f32[3,1,128], index: 4, kind: input, shape index: {}]   ;;  %s919_s5 = inlined_call_operand.vmem [shape: bf16[3,32,128], index: 5, kind: output, shape index: {}]  }
   0x1   :  { %s10_s20 = sshll.u32 %s914_s0, 4  ;;  %s11_s20 = int_to_ptr.vmem [resolvable:$true] %s10_s20 }
   0x2   :  { %s799_s21 = scalar_lea.vmem %s11_s20, 16  ;;  %p804_p1 = scmp.lt.s32.totalorder %s11_s20, %s11_s20 }
   0x3   :  { %p800_p0 = scmp.ne.s32.totalorder %s11_s20, %s799_s21  ;;  %p805_p2 = scmp.lt.s32.totalorder %s799_s21, %s799_s21 }
   0x5   :  { %p806_p3 = por %p805_p2, %p804_p1 }
   0x7   :  { %p807_p4 = pnand %p806_p3, %p800_p0 }
   0x9   :  { %810 = shalt.err (!%p807_p4)  }
   0xa   :  { %s821_s22 = smov [#allocation3]  }
   0xb   :  { %13 = dma.vmem_to_smem %s11_s20, 16, %s821_s22, [#allocation2] }
   0xc   :  { %815 = dma.done.wait [#allocation2], 16 }
   0xd   :  { %816 = vsyncadd [#allocation2], 4294967280 }
   0xe   :  { %15 = sfence }
   0xf   :  { %s856_s23 = smov 0  }
  0x10 LB: > { %s656_s0 = sadd.s32 4294967295, %s819_s23   ;;  %p660_p5 = scmp.ge.s32.totalorder %s819_s23, 1  ;;  %s819_s23 = sphi %s856_s23, %s21_s23  }
  0x11   : > { %p195_p6 = scmp.lt.s32.totalorder %s819_s23, 4 }
  0x13   : > { %p196_p7 = pnand %p660_p5, %p195_p6 }
  0x14   : > { %p232_p8 = scmp.lt.s32.totalorder (!%p196_p7), %s656_s0, 2  ;;  %s864_s24 = sld [smem:[#allocation3 + %s656_s0]] (!%p196_p7)  ;;  %v471_v37 = vlaneseq (!%p196_p7)  ;;  %v822_v51 = vmov (!%p196_p7), 0.0  }
  0x15   : > { %199 = sbr.rel (%p196_p7) target bundleno = 354 (0x162), region = 36 }
  0x16   : > { %v472_v40 = vshrl.u32 (!%p196_p7), %v471_v37, 7 }
  0x18   : > { %v473_v44 = vadd.s32 (!%p196_p7), 8, %v472_v40  ;;  %v474_v45 = vadd.s32 (!%p196_p7), 16, %v472_v40  ;;  %v475_v46 = vadd.s32 (!%p196_p7), 24, %v472_v40 }
  0x1a   : > { %s456_s29 = scvt.s32.f32 (!%p196_p7), %s864_s24  ;;  %v476_v42 = vstv (!%p196_p7), %s864_s24 }
  0x1b   : > { %vm477_vm0 = vcmp.lt.s32.totalorder (!%p196_p7), %v472_v40, %v476_v42  ;;  %vm478_vm1 = vcmp.lt.s32.totalorder (!%p196_p7), %v473_v44, %v476_v42  ;;  %vm479_vm2 = vcmp.lt.s32.totalorder (!%p196_p7), %v474_v45, %v476_v42  ;;  %vm480_vm3 = vcmp.lt.s32.totalorder (!%p196_p7), %v475_v46, %v476_v42 }
  0x1c   : > { %s921_s0 = smov (!%p232_p8, %s656_s0), 2  ;;  %v457_v3 = vstv %s456_s29  ;;  %v687_v52 = vsel %vm477_vm0, 1.0, %v822_v51  ;;  %v688_v53 = vsel %vm478_vm1, 1.0, %v822_v51  ;;  %v689_v54 = vsel %vm479_vm2, 1.0, %v822_v51 }
  0x1d   : > { %s700_s25 = sshll.u32 %s921_s0, 7  ;;  %795 = vrcp.f32 %v457_v3  ;;  %s699_s30 = sshll.u32 %s921_s0, 5  ;;  %v690_v55 = vsel %vm480_vm3, 1.0, %v822_v51 }
  0x1e   : > { %s872_s28 = scalar_lea.vmem %s916_s2, %s700_s25  ;;  %s236_s8 = scalar_lea.vmem %s915_s1, %s699_s30 }
  0x1f   : > { %v773_v0 = vld [vmem:[%s872_s28 + $0x40] sm:$0xff]   ;;  %v775_v2 = vld [vmem:[%s872_s28 + $0x48] sm:$0xff]   ;;  %v777_v5 = vld [vmem:[%s872_s28 + $0x50] sm:$0xff]   ;;  %s244_s12 = scalar_lea.vmem %s917_s3, %s921_s0  ;;  %s247_s15 = scalar_lea.vmem %s918_s4, %s921_s0 }
  0x20   : > { %v774_v1 = vld [vmem:[%s872_s28] sm:$0xff]   ;;  %717 = vmatprep.subr.bf16.mxu0 %v773_v0  ;;  %745 = vmatprep.subr.bf16.mxu1 %v773_v0  ;;  %v776_v4 = vld [vmem:[%s872_s28 + $0x8] sm:$0xff]   ;;  %v778_v6 = vld [vmem:[%s872_s28 + $0x10] sm:$0xff]   ;;  %s701_s16 = sshll.u32 %s921_s0, 4 }
  0x21   : > { %718 = vmatpush3.bf16.msra.mxu0 %v774_v1  ;;  %753 = vmatpush3.bf16.msra.mxu1 %v774_v1  ;;  %v779_v7 = vld [vmem:[%s872_s28 + $0x58] sm:$0xff]   ;;  %v781_v9 = vld [vmem:[%s872_s28 + $0x60] sm:$0xff]   ;;  %v783_v12 = vld [vmem:[%s872_s28 + $0x68] sm:$0xff]   ;;  %s252_s19 = scalar_lea.vmem %s919_s5, %s701_s16 }
  0x22   : > { %719 = vmatprep.subr.bf16.mxu0 %v775_v2  ;;  %746 = vmatprep.subr.bf16.mxu1 %v775_v2  ;;  %v780_v8 = vld [vmem:[%s872_s28 + $0x18] sm:$0xff]   ;;  %v782_v11 = vld [vmem:[%s872_s28 + $0x20] sm:$0xff]   ;;  %v784_v15 = vld [vmem:[%s872_s28 + $0x28] sm:$0xff]  }
  0x23   : > { %v791_v13 = vld [vmem:[%s236_s8 + $0x4] ss:$8 sps:$4 sm:$0xff]   ;;  %v794_v14 = vld [vmem:[%s236_s8 + $0x14] ss:$8 sps:$4 sm:$0xff]   ;;  %v789_v20 = vld [vmem:[%s236_s8] ss:$8 sps:$4 sm:$0xff]  }
  0x24   : > { %v785_v16 = vld [vmem:[%s872_s28 + $0x70] sm:$0xff]   ;;  %439 = vmatprep.mubr.bf16.mxu0 %v791_v13  ;;  %447 = vmatprep.mubr.bf16.mxu1 %v794_v14  ;;  %v787_v18 = vld [vmem:[%s872_s28 + $0x78] sm:$0xff]  }
  0x25   : > { %720 = vmatpush3.bf16.msra.mxu0 %v776_v4  ;;  %754 = vmatpush3.bf16.msra.mxu1 %v776_v4  ;;  %v786_v17 = vld [vmem:[%s872_s28 + $0x30] sm:$0xff]   ;;  %v788_v19 = vld [vmem:[%s872_s28 + $0x38] sm:$0xff]  }
  0x26   : > { %721 = vmatprep.subr.bf16.mxu0 %v777_v5  ;;  %747 = vmatprep.subr.bf16.mxu1 %v777_v5  ;;  %v792_v21 = vld [vmem:[%s236_s8 + $0x10] ss:$8 sps:$4 sm:$0xff]  }
  0x27   : > { %v796_v10 = vpop.eup %795 }
  0x28   : > { %761 = vpush %v796_v10 }
  0x29   : > { %722 = vmatpush3.bf16.msra.mxu0 %v778_v6  ;;  %755 = vmatpush3.bf16.msra.mxu1 %v778_v6 }
  0x2a   : > { %723 = vmatprep.subr.bf16.mxu0 %v779_v7  ;;  %748 = vmatprep.subr.bf16.mxu1 %v779_v7 }
  0x2d   : > { %724 = vmatpush3.bf16.msra.mxu0 %v780_v8  ;;  %756 = vmatpush3.bf16.msra.mxu1 %v780_v8 }
  0x2e   : > { %725 = vmatprep.subr.bf16.mxu0 %v781_v9  ;;  %749 = vmatprep.subr.bf16.mxu1 %v781_v9 }
  0x31   : > { %726 = vmatpush3.bf16.msra.mxu0 %v782_v11  ;;  %757 = vmatpush3.bf16.msra.mxu1 %v782_v11 }
  0x32   : > { %727 = vmatprep.subr.bf16.mxu0 %v783_v12  ;;  %750 = vmatprep.subr.bf16.mxu1 %v783_v12 }
  0x35   : > { %728 = vmatpush3.bf16.msra.mxu0 %v784_v15  ;;  %758 = vmatpush3.bf16.msra.mxu1 %v784_v15 }
  0x36   : > { %729 = vmatprep.subr.bf16.mxu0 %v785_v16  ;;  %751 = vmatprep.subr.bf16.mxu1 %v785_v16  ;;  %v691_v16 = vld [vmem:[%s244_s12] ss:$0 sm:$0xff] }
  0x39   : > { %730 = vmatpush3.bf16.msra.mxu0 %v786_v17  ;;  %759 = vmatpush3.bf16.msra.mxu1 %v786_v17 }
  0x3a   : > { %731 = vmatprep.subr.bf16.mxu0 %v787_v18  ;;  %752 = vmatprep.subr.bf16.mxu1 %v787_v18 }
  0x3d   : > { %732 = vmatpush3.bf16.msra.mxu0 %v788_v19  ;;  %760 = vmatpush3.bf16.msra.mxu1 %v788_v19 }
  0x40   : > { %440 = vmatmul.mubr.bf16.vlgmr.msra.gmra.mrb[0].mxu0 %v789_v20  ;;  %448 = vmatmul.mubr.bf16.vlgmr.msra.gmra.mrb[0].mxu1 %v792_v21  ;;  %v692_v21 = vld [vmem:[%s247_s15] ss:$0 sm:$0xff] }
  0x59   : > { %s896_s9 = spop %761 }
  0x5a   : > { %v469_v48 = vstv %s896_s9 }
 0x113   : > { %v733_v22 = vpop.f32.mrb[0].mxu0  ;;  %v739_v23 = vpop.f32.mrb[0].mxu1 }
 0x114   : > { %v734_v24 = vpop.f32.mrb[1].mxu0  ;;  %v740_v25 = vpop.f32.mrb[1].mxu1 }
 0x115   : > { %v735_v26 = vadd.f32 %v734_v24, %v733_v22  ;;  %v736_v27 = vpop.f32.mrb[2].mxu0  ;;  %v741_v28 = vadd.f32 %v740_v25, %v739_v23  ;;  %v742_v29 = vpop.f32.mrb[2].mxu1 }
 0x116   : > { %v737_v30 = vpop.f32.mrb[3].mxu0  ;;  %v743_v31 = vpop.f32.mrb[3].mxu1 }
 0x117   : > { %v738_v32 = vadd.f32 %v737_v30, %v736_v27  ;;  %v744_v33 = vadd.f32 %v743_v31, %v742_v29 }
 0x119   : > { %v460_v34 = vadd.f32 %v738_v32, %v735_v26 }
 0x11b   : > { %v461_v35 = vadd.f32 %v741_v28, %v460_v34 }
 0x11d   : > { %v462_v36 = vadd.f32 %v744_v33, %v461_v35 }
 0x11f   : > { %v463_v38 = vrot.slane %v462_v36, 4 }
 0x121   : > { %v464_v39 = vadd.f32 %v463_v38, %v462_v36 }
 0x123   : > { %v465_v41 = vrot.slane %v464_v39, 2 }
 0x125   : > { %v466_v43 = vadd.f32 %v465_v41, %v464_v39 }
 0x127   : > { %v467_v47 = vrot.slane %v466_v43, 1 }
 0x129   : > { %v468_v49 = vadd.f32 %v467_v47, %v466_v43 }
 0x12b   : > { %v470_v50 = vmul.f32 %v469_v48, %v468_v49 }
 0x12d   : > { %v489_v56 = vsub.f32 %v735_v26, %v470_v50  ;;  %v490_v57 = vsub.f32 %v738_v32, %v470_v50  ;;  %v491_v58 = vsub.f32 %v741_v28, %v470_v50  ;;  %v492_v59 = vsub.f32 %v744_v33, %v470_v50 }
 0x12f   : > { %v493_v60 = vmul.f32 %v687_v52, %v489_v56  ;;  %v494_v61 = vmul.f32 %v688_v53, %v490_v57  ;;  %v495_v62 = vmul.f32 %v689_v54, %v491_v58  ;;  %v496_v63 = vmul.f32 %v690_v55, %v492_v59 }
 0x131   : > { %v497_v0 = vmul.f32 %v493_v60, %v493_v60  ;;  %v498_v1 = vmul.f32 %v494_v61, %v494_v61  ;;  %v499_v2 = vmul.f32 %v495_v62, %v495_v62  ;;  %v500_v4 = vmul.f32 %v496_v63, %v496_v63 }
 0x133   : > { %v501_v3 = vadd.f32 %v498_v1, %v497_v0 }
 0x135   : > { %v502_v5 = vadd.f32 %v501_v3, %v499_v2 }
 0x137   : > { %v503_v6 = vadd.f32 %v502_v5, %v500_v4 }
 0x139   : > { %v504_v7 = vrot.slane %v503_v6, 4 }
 0x13b   : > { %v505_v8 = vadd.f32 %v504_v7, %v503_v6 }
 0x13d   : > { %v506_v9 = vrot.slane %v505_v8, 2 }
 0x13f   : > { %v507_v10 = vadd.f32 %v506_v9, %v505_v8 }
 0x141   : > { %v508_v11 = vrot.slane %v507_v10, 1 }
 0x143   : > { %v509_v12 = vadd.f32 %v508_v11, %v507_v10 }
 0x145   : > { %v510_v13 = vmul.f32 %v509_v12, %v469_v48 }
 0x147   : > { %v511_v14 = vadd.f32 1e-05, %v510_v13 }
 0x149   : > { %797 = vrsqrt.f32 %v511_v14 }
 0x153   : > { %v798_v15 = vpop.eup %797 }
 0x154   : > { %v513_v17 = vmul.f32 %v798_v15, %v489_v56  ;;  %v514_v18 = vmul.f32 %v798_v15, %v490_v57  ;;  %v515_v19 = vmul.f32 %v798_v15, %v491_v58  ;;  %v516_v20 = vmul.f32 %v798_v15, %v492_v59 }
 0x156   : > { %v524_v22 = vmul.f32 %v691_v16, %v513_v17  ;;  %v525_v23 = vmul.f32 %v691_v16, %v514_v18  ;;  %v526_v24 = vmul.f32 %v691_v16, %v515_v19  ;;  %v527_v25 = vmul.f32 %v691_v16, %v516_v20 }
 0x158   : > { %v535_v26 = vadd.f32 %v692_v21, %v524_v22  ;;  %v536_v27 = vadd.f32 %v692_v21, %v525_v23  ;;  %v537_v28 = vadd.f32 %v692_v21, %v526_v24  ;;  %v538_v29 = vadd.f32 %v692_v21, %v527_v25 }
 0x15a   : > { %vm539_vm4 = vcmp.gt.f32.partialorder %v535_v26, 0.0  ;;  %vm540_vm5 = vcmp.gt.f32.partialorder %v536_v27, 0.0  ;;  %vm541_vm6 = vcmp.gt.f32.partialorder %v537_v28, 0.0  ;;  %vm542_vm7 = vcmp.gt.f32.partialorder %v538_v29, 0.0 }
 0x15b   : > { %v543_v30 = vmul.f32 0.2, %v535_v26  ;;  %v544_v31 = vmul.f32 0.2, %v536_v27  ;;  %v545_v32 = vmul.f32 0.2, %v537_v28 }
 0x15c   : > { %v546_v33 = vmul.f32 0.2, %v538_v29 }
 0x15d   : > { %v547_v34 = vsel %vm539_vm4, %v535_v26, %v543_v30  ;;  %v548_v35 = vsel %vm540_vm5, %v536_v27, %v544_v31  ;;  %v549_v36 = vsel %vm541_vm6, %v537_v28, %v545_v32 }
 0x15e   : > { %v550_v37 = vsel %vm542_vm7, %v538_v29, %v546_v33  ;;  %v709_v38 = vpack.c.bf16 %v548_v35, %v547_v34 }
 0x15f   : > { %v714_v39 = vpack.c.bf16 %v550_v37, %v549_v36 }
 0x160   : > { %710 = vst [vmem:[%s252_s19] sm:$0xff] %v709_v38  }
 0x161   : > { %716 = vst [vmem:[%s252_s19 + $0x8] sm:$0xff] %v714_v39  }
 0x162 PF: > { %s21_s23 = sadd.s32 1, %s819_s23  }
 0x163   : > { %p18_p9 = scmp.ge.s32.totalorder %s21_s23, 5  }
 0x165   :  { %20 = sbr.rel (!%p18_p9) target bundleno = 16 (0x10), region = 75 }

// kernel: squeeze.26
= control target key start
LH: loop header
LB: loop body
LE: loop exit
PB: predicated region body
PF: predicated region fallthrough
CT: control target
= control target key end

     0   :  { %vm50_vm0 = vcmask 523264   ;;  %v131_v8 = vmov 0.0   ;;  %s166_s0 = inlined_call_operand.vmem [shape: bf16[1,18,64], index: 0, kind: input, shape index: {}]   ;;  %s167_s1 = inlined_call_operand.vmem [shape: bf16[2,3,3,64], index: 1, kind: output, shape index: {}]  }
   0x1   :  { %v119_v0 = vld [vmem:[%s166_s0 + $0x8] sm:$0xf]  ;;  %v127_v1 = vld [vmem:[%s166_s0] sm:$0xff]  }
   0x2   :  { %v17_v2 = vunpack.c.l.bf16 %v119_v0  ;;  %v128_v3 = vunpack.c.l.bf16 %v127_v1  ;;  %v129_v4 = vunpack.c.h.bf16 %v127_v1 }
   0x4   :  { %20 = vst [vmem:[#allocation1 + $0x10] sm:$0xff] %v17_v2  ;;  %51 = vst.msk [vmem:[#allocation0] sm:$0x7] %vm50_vm0, %v128_v3  }
   0x5   :  { %53 = vst.msk [vmem:[#allocation0 + $0x5] sm:$0x38] %vm50_vm0, %v128_v3   ;;  %55 = vst.msk [vmem:[#allocation0 + $0xa] sm:$0xc0] %vm50_vm0, %v128_v3  }
   0x6   :  { %60 = vst.msk [vmem:[#allocation0 + $0x12] ss:$6 sm:$0x3] %vm50_vm0, %v129_v4   ;;  %62 = vst.msk [vmem:[#allocation0 + $0x17] sm:$0xc] %vm50_vm0, %v129_v4  }
   0x7   :  { %64 = vst.msk [vmem:[#allocation0 + $0x1c] sm:$0x70] %vm50_vm0, %v129_v4   ;;  %66 = vst.msk [vmem:[#allocation0 + $0x21] sm:$0x80] %vm50_vm0, %v129_v4  }
   0xb   :  { %v68_v5 = vld [vmem:[#allocation1 + $0x10] sm:$0x3]  }
   0xc   :  { %v76_v6 = vld [vmem:[#allocation0] sm:$0xf]  ;;  %v81_v7 = vld [vmem:[#allocation0 + $0x8] sm:$0xf]  ;;  %71 = vst.msk [vmem:[#allocation0 + $0x29] sm:$0x3] %vm50_vm0, %v68_v5  }
   0xd   :  { %v77_v9 = vpack.c.bf16 %v131_v8, %v76_v6  ;;  %v82_v10 = vpack.c.bf16 %v131_v8, %v81_v7  ;;  %v87_v11 = vld [vmem:[#allocation0 + $0x10] sm:$0xf]  ;;  %v94_v12 = vld [vmem:[#allocation0 + $0x18] sm:$0xf] }
   0xe   :  { %v101_v13 = vld [vmem:[#allocation0 + $0x20] sm:$0xf]  ;;  %v88_v14 = vpack.c.bf16 %v131_v8, %v87_v11  ;;  %v95_v15 = vpack.c.bf16 %v131_v8, %v94_v12 }
   0xf   :  { %v102_v16 = vpack.c.bf16 %v131_v8, %v101_v13  ;;  %79 = vst [vmem:[%s167_s1] sm:$0x3] %v77_v9  ;;  %121 = vst [vmem:[%s167_s1 + $0x2] sm:$0x3] %v82_v10 }
  0x10   :  { %122 = vst [vmem:[%s167_s1 + $0x4] sm:$0x3] %v88_v14  ;;  %123 = vst [vmem:[%s167_s1 + $0x6] sm:$0x3] %v95_v15 }
  0x11   :  { %124 = vst [vmem:[%s167_s1 + $0x8] sm:$0x3] %v102_v16 }
  0x13   :  { %v108_v17 = vld [vmem:[#allocation0 + $0x28] sm:$0xf] }
  0x14   :  { %v109_v18 = vpack.c.bf16 %v131_v8, %v108_v17 }
  0x16   :  { %125 = vst [vmem:[%s167_s1 + $0xa] sm:$0x3] %v109_v18 }

// kernel: multiscale_discriminator_forward.8
= control target key start
LH: loop header
LB: loop body
LE: loop exit
PB: predicated region body
PF: predicated region fallthrough
CT: control target
= control target key end

     0   :  { %s1185_s0 = inlined_call_operand.vmem [shape: s32[3], index: 0, kind: input, shape index: {}]   ;;  %s1186_s1 = inlined_call_operand.vmem [shape: bf16[3,32,512], index: 1, kind: input, shape index: {}]   ;;  %s1187_s2 = inlined_call_operand.vmem [shape: bf16[3,512,128], index: 2, kind: input, shape index: {}]   ;;  %s1188_s3 = inlined_call_operand.vmem [shape: f32[3,1,128], index: 3, kind: input, shape index: {}]   ;;  %s1189_s4 = inlined_call_operand.vmem [shape: f32[3,1,128], index: 4, kind: input, shape index: {}]   ;;  %s1190_s5 = inlined_call_operand.vmem [shape: bf16[3,32,128], index: 5, kind: output, shape index: {}]  }
   0x1   :  { %s10_s20 = sshll.u32 %s1185_s0, 4  ;;  %s11_s20 = int_to_ptr.vmem [resolvable:$true] %s10_s20 }
   0x2   :  { %s1054_s21 = scalar_lea.vmem %s11_s20, 16  ;;  %p1059_p1 = scmp.lt.s32.totalorder %s11_s20, %s11_s20 }
   0x3   :  { %p1055_p0 = scmp.ne.s32.totalorder %s11_s20, %s1054_s21  ;;  %p1060_p2 = scmp.lt.s32.totalorder %s1054_s21, %s1054_s21 }
   0x5   :  { %p1061_p3 = por %p1060_p2, %p1059_p1 }
   0x7   :  { %p1062_p4 = pnand %p1061_p3, %p1055_p0 }
   0x9   :  { %1065 = shalt.err (!%p1062_p4)  }
   0xa   :  { %s1076_s22 = smov [#allocation3]  }
   0xb   :  { %13 = dma.vmem_to_smem %s11_s20, 16, %s1076_s22, [#allocation2] }
   0xc   :  { %1070 = dma.done.wait [#allocation2], 16 }
   0xd   :  { %1071 = vsyncadd [#allocation2], 4294967280 }
   0xe   :  { %15 = sfence }
   0xf   :  { %s1111_s23 = smov 0  }
  0x10 LB: > { %s857_s0 = sadd.s32 4294967295, %s1074_s23   ;;  %p861_p5 = scmp.ge.s32.totalorder %s1074_s23, 1  ;;  %s1074_s23 = sphi %s1111_s23, %s21_s23  }
  0x11   : > { %p195_p6 = scmp.lt.s32.totalorder %s1074_s23, 4 }
  0x13   : > { %p196_p7 = pnand %p861_p5, %p195_p6 }
  0x14   : > { %p232_p8 = scmp.lt.s32.totalorder (!%p196_p7), %s857_s0, 2  ;;  %s1119_s24 = sld [smem:[#allocation3 + %s857_s0]] (!%p196_p7) }
  0x15   : > { %199 = sbr.rel (%p196_p7) target bundleno = 362 (0x16a), region = 36 }
  0x1a   : > { %s657_s29 = scvt.s32.f32 (!%p196_p7), %s1119_s24 }
  0x1c   : > { %s1192_s0 = smov (!%p232_p8, %s857_s0), 2  ;;  %v658_v3 = vstv %s657_s29 }
  0x1d   : > { %s921_s25 = sshll.u32 %s1192_s0, 8  ;;  %1050 = vrcp.f32 %v658_v3  ;;  %s920_s30 = sshll.u32 %s1192_s0, 6 }
  0x1e   : > { %s1127_s28 = scalar_lea.vmem %s1187_s2, %s921_s25  ;;  %s236_s8 = scalar_lea.vmem %s1186_s1, %s920_s30 }
  0x1f   : > { %v1006_v0 = vld [vmem:[%s1127_s28 + $0x40] sm:$0xff]   ;;  %v1010_v5 = vld [vmem:[%s1127_s28 + $0x48] sm:$0xff]   ;;  %v1014_v9 = vld [vmem:[%s1127_s28 + $0x50] sm:$0xff]   ;;  %s244_s12 = scalar_lea.vmem %s1188_s3, %s1192_s0  ;;  %s247_s15 = scalar_lea.vmem %s1189_s4, %s1192_s0 }
  0x20   : > { %v1007_v1 = vld [vmem:[%s1127_s28 + $0xc0] sm:$0xff]   ;;  %938 = vmatprep.subr.bf16.mxu0 %v1006_v0  ;;  %v1011_v6 = vld [vmem:[%s1127_s28 + $0xc8] sm:$0xff]   ;;  %v1015_v10 = vld [vmem:[%s1127_s28 + $0xd0] sm:$0xff]   ;;  %s922_s16 = sshll.u32 %s1192_s0, 4 }
  0x21   : > { %v1008_v2 = vld [vmem:[%s1127_s28] sm:$0xff]   ;;  %966 = vmatprep.subr.bf16.mxu1 %v1007_v1  ;;  %v1012_v7 = vld [vmem:[%s1127_s28 + $0x8] sm:$0xff]   ;;  %v1016_v11 = vld [vmem:[%s1127_s28 + $0x10] sm:$0xff]   ;;  %s252_s19 = scalar_lea.vmem %s1190_s5, %s922_s16 }
  0x22   : > { %v1009_v4 = vld [vmem:[%s1127_s28 + $0x80] sm:$0xff]   ;;  %939 = vmatpush3.bf16.msra.mxu0 %v1008_v2  ;;  %v1013_v8 = vld [vmem:[%s1127_s28 + $0x88] sm:$0xff]   ;;  %v1017_v12 = vld [vmem:[%s1127_s28 + $0x90] sm:$0xff]  }
  0x23   : > { %967 = vmatpush3.bf16.msra.mxu1 %v1009_v4  ;;  %940 = vmatprep.subr.bf16.mxu0 %v1010_v5  ;;  %v1018_v13 = vld [vmem:[%s1127_s28 + $0x58] sm:$0xff]   ;;  %v1022_v18 = vld [vmem:[%s1127_s28 + $0x60] sm:$0xff]   ;;  %v1026_v22 = vld [vmem:[%s1127_s28 + $0x68] sm:$0xff]  }
  0x24   : > { %968 = vmatprep.subr.bf16.mxu1 %v1011_v6  ;;  %v1019_v15 = vld [vmem:[%s1127_s28 + $0xd8] sm:$0xff]   ;;  %v1023_v19 = vld [vmem:[%s1127_s28 + $0xe0] sm:$0xff]   ;;  %v1027_v23 = vld [vmem:[%s1127_s28 + $0xe8] sm:$0xff]  }
  0x25   : > { %v1020_v16 = vld [vmem:[%s1127_s28 + $0x18] sm:$0xff]   ;;  %v1024_v20 = vld [vmem:[%s1127_s28 + $0x20] sm:$0xff]   ;;  %v1028_v24 = vld [vmem:[%s1127_s28 + $0x28] sm:$0xff]  }
  0x26   : > { %941 = vmatpush3.bf16.msra.mxu0 %v1012_v7  ;;  %v1021_v17 = vld [vmem:[%s1127_s28 + $0x98] sm:$0xff]   ;;  %v1025_v21 = vld [vmem:[%s1127_s28 + $0xa0] sm:$0xff]   ;;  %v1029_v25 = vld [vmem:[%s1127_s28 + $0xa8] sm:$0xff]  }
  0x27   : > { %969 = vmatpush3.bf16.msra.mxu1 %v1013_v8  ;;  %942 = vmatprep.subr.bf16.mxu0 %v1014_v9  ;;  %v1051_v14 = vpop.eup %1050  ;;  %v1030_v26 = vld [vmem:[%s1127_s28 + $0x70] sm:$0xff]   ;;  %v1034_v30 = vld [vmem:[%s1127_s28 + $0x78] sm:$0xff]   ;;  %v672_v9 = vlaneseq }
  0x28   : > { %970 = vmatprep.subr.bf16.mxu1 %v1015_v10  ;;  %994 = vpush %v1051_v14  ;;  %v1031_v27 = vld [vmem:[%s1127_s28 + $0xf0] sm:$0xff]   ;;  %v1035_v31 = vld [vmem:[%s1127_s28 + $0xf8] sm:$0xff]   ;;  %v677_v14 = vstv %s1119_s24 }
  0x29   : > { %v1032_v28 = vld [vmem:[%s1127_s28 + $0x30] sm:$0xff]   ;;  %v1036_v32 = vld [vmem:[%s1127_s28 + $0x38] sm:$0xff]  }
  0x2a   : > { %943 = vmatpush3.bf16.msra.mxu0 %v1016_v11  ;;  %v1033_v29 = vld [vmem:[%s1127_s28 + $0xb0] sm:$0xff]   ;;  %v1037_v33 = vld [vmem:[%s1127_s28 + $0xb8] sm:$0xff]  }
  0x2b   : > { %971 = vmatpush3.bf16.msra.mxu1 %v1017_v12  ;;  %944 = vmatprep.subr.bf16.mxu0 %v1018_v13  ;;  %v1038_v34 = vld [vmem:[%s236_s8] ss:$16 sps:$4 sm:$0xff]   ;;  %v1040_v35 = vld [vmem:[%s236_s8 + $0x4] ss:$16 sps:$4 sm:$0xff]   ;;  %v1041_v36 = vld [vmem:[%s236_s8 + $0x8] ss:$16 sps:$4 sm:$0xff]  }
  0x2c   : > { %972 = vmatprep.subr.bf16.mxu1 %v1019_v15  ;;  %v1043_v37 = vld [vmem:[%s236_s8 + $0xc] ss:$16 sps:$4 sm:$0xff]   ;;  %591 = vmatprep.mubr.bf16.mxu0 %v1040_v35  ;;  %v1044_v38 = vld [vmem:[%s236_s8 + $0x24] ss:$16 sps:$4 sm:$0xff]   ;;  %v1048_v40 = vld [vmem:[%s236_s8 + $0x20] ss:$16 sps:$4 sm:$0xff]  }
  0x2d   : > { %640 = vmatprep.mubr.bf16.mxu1 %v1043_v37  ;;  %v1046_v39 = vld [vmem:[%s236_s8 + $0x2c] ss:$16 sps:$4 sm:$0xff]   ;;  %v1049_v41 = vld [vmem:[%s236_s8 + $0x28] ss:$16 sps:$4 sm:$0xff]   ;;  %v673_v12 = vshrl.u32 %v672_v9, 7 }
  0x2e   : > { %945 = vmatpush3.bf16.msra.mxu0 %v1020_v16 }
  0x2f   : > { %973 = vmatpush3.bf16.msra.mxu1 %v1021_v17  ;;  %946 = vmatprep.subr.bf16.mxu0 %v1022_v18  ;;  %v674_v16 = vadd.s32 8, %v673_v12  ;;  %v675_v17 = vadd.s32 16, %v673_v12  ;;  %v676_v18 = vadd.s32 24, %v673_v12  ;;  %vm678_vm0 = vcmp.lt.s32.totalorder %v673_v12, %v677_v14 }
  0x30   : > { %974 = vmatprep.subr.bf16.mxu1 %v1023_v19 }
  0x31   : > { %vm679_vm1 = vcmp.lt.s32.totalorder %v674_v16, %v677_v14  ;;  %vm680_vm2 = vcmp.lt.s32.totalorder %v675_v17, %v677_v14  ;;  %vm681_vm3 = vcmp.lt.s32.totalorder %v676_v18, %v677_v14 }
  0x32   : > { %947 = vmatpush3.bf16.msra.mxu0 %v1024_v20 }
  0x33   : > { %975 = vmatpush3.bf16.msra.mxu1 %v1025_v21  ;;  %948 = vmatprep.subr.bf16.mxu0 %v1026_v22 }
  0x34   : > { %976 = vmatprep.subr.bf16.mxu1 %v1027_v23  ;;  %v1077_v23 = vmov 0.0  }
  0x36   : > { %949 = vmatpush3.bf16.msra.mxu0 %v1028_v24  ;;  %v908_v24 = vsel %vm678_vm0, 1.0, %v1077_v23 }
  0x37   : > { %977 = vmatpush3.bf16.msra.mxu1 %v1029_v25  ;;  %950 = vmatprep.subr.bf16.mxu0 %v1030_v26  ;;  %v909_v25 = vsel %vm679_vm1, 1.0, %v1077_v23  ;;  %v910_v26 = vsel %vm680_vm2, 1.0, %v1077_v23 }
  0x38   : > { %978 = vmatprep.subr.bf16.mxu1 %v1031_v27  ;;  %v911_v27 = vsel %vm681_vm3, 1.0, %v1077_v23 }
  0x3a   : > { %951 = vmatpush3.bf16.msra.mxu0 %v1032_v28 }
  0x3b   : > { %979 = vmatpush3.bf16.msra.mxu1 %v1033_v29  ;;  %952 = vmatprep.subr.bf16.mxu0 %v1034_v30 }
  0x3c   : > { %980 = vmatprep.subr.bf16.mxu1 %v1035_v31 }
  0x3e   : > { %953 = vmatpush3.bf16.msra.mxu0 %v1036_v32 }
  0x3f   : > { %981 = vmatpush3.bf16.msra.mxu1 %v1037_v33 }
  0x41   : > { %592 = vmatmul.mubr.bf16.vlgmr.msra.gmra.mrb[0].mxu0 %v1038_v34 }
  0x42   : > { %641 = vmatmul.mubr.bf16.vlgmr.msra.gmra.mrb[0].mxu1 %v1041_v36  ;;  %599 = vmatprep.mubr.bf16.mxu0 %v1044_v38 }
  0x43   : > { %648 = vmatprep.mubr.bf16.mxu1 %v1046_v39 }
  0x49   : > { %600 = vmatmul.mubr.bf16.gmra.mrb[4].mxu0 %v1048_v40 }
  0x4a   : > { %649 = vmatmul.mubr.bf16.gmra.mrb[4].mxu1 %v1049_v41 }
  0x59   : > { %s1167_s9 = spop %994 }
  0x5a   : > { %v670_v20 = vstv %s1167_s9 }
 0x114   : > { %v954_v42 = vpop.f32.mrb[0].mxu0 }
 0x115   : > { %v982_v43 = vpop.f32.mrb[0].mxu1  ;;  %v955_v44 = vpop.f32.mrb[1].mxu0 }
 0x116   : > { %v956_v45 = vadd.f32 %v955_v44, %v954_v42  ;;  %v983_v46 = vpop.f32.mrb[1].mxu1  ;;  %v957_v47 = vpop.f32.mrb[2].mxu0 }
 0x117   : > { %v984_v48 = vadd.f32 %v983_v46, %v982_v43  ;;  %v985_v49 = vpop.f32.mrb[2].mxu1  ;;  %v958_v50 = vpop.f32.mrb[3].mxu0 }
 0x118   : > { %v959_v51 = vadd.f32 %v958_v50, %v957_v47  ;;  %v986_v52 = vpop.f32.mrb[3].mxu1 }
 0x119   : > { %v643_v53 = vadd.f32 %v984_v48, %v956_v45  ;;  %v987_v54 = vadd.f32 %v986_v52, %v985_v49  ;;  %v912_v52 = vld [vmem:[%s244_s12] ss:$0 sm:$0xff] }
 0x11b   : > { %v646_v55 = vadd.f32 %v987_v54, %v959_v51 }
 0x11c   : > { %v960_v56 = vpop.f32.mrb[4].mxu0 }
 0x11d   : > { %v661_v57 = vadd.f32 %v646_v55, %v643_v53  ;;  %v988_v58 = vpop.f32.mrb[4].mxu1  ;;  %v961_v59 = vpop.f32.mrb[5].mxu0 }
 0x11e   : > { %v962_v60 = vadd.f32 %v961_v59, %v960_v56  ;;  %v989_v61 = vpop.f32.mrb[5].mxu1  ;;  %v963_v62 = vpop.f32.mrb[6].mxu0 }
 0x11f   : > { %v990_v63 = vadd.f32 %v989_v61, %v988_v58  ;;  %v991_v0 = vpop.f32.mrb[6].mxu1  ;;  %v964_v1 = vpop.f32.mrb[7].mxu0 }
 0x120   : > { %v965_v2 = vadd.f32 %v964_v1, %v963_v62  ;;  %v992_v3 = vpop.f32.mrb[7].mxu1 }
 0x121   : > { %v651_v4 = vadd.f32 %v990_v63, %v962_v60  ;;  %v993_v5 = vadd.f32 %v992_v3, %v991_v0 }
 0x123   : > { %v662_v6 = vadd.f32 %v661_v57, %v651_v4  ;;  %v654_v7 = vadd.f32 %v993_v5, %v965_v2  ;;  %v913_v57 = vld [vmem:[%s247_s15] ss:$0 sm:$0xff] }
 0x125   : > { %v663_v8 = vadd.f32 %v662_v6, %v654_v7 }
 0x127   : > { %v664_v10 = vrot.slane %v663_v8, 4 }
 0x129   : > { %v665_v11 = vadd.f32 %v664_v10, %v663_v8 }
 0x12b   : > { %v666_v13 = vrot.slane %v665_v11, 2 }
 0x12d   : > { %v667_v15 = vadd.f32 %v666_v13, %v665_v11 }
 0x12f   : > { %v668_v19 = vrot.slane %v667_v15, 1 }
 0x131   : > { %v669_v21 = vadd.f32 %v668_v19, %v667_v15 }
 0x133   : > { %v671_v22 = vmul.f32 %v670_v20, %v669_v21 }
 0x135   : > { %v690_v28 = vsub.f32 %v643_v53, %v671_v22  ;;  %v691_v29 = vsub.f32 %v646_v55, %v671_v22  ;;  %v692_v30 = vsub.f32 %v651_v4, %v671_v22  ;;  %v693_v31 = vsub.f32 %v654_v7, %v671_v22 }
 0x137   : > { %v694_v32 = vmul.f32 %v908_v24, %v690_v28  ;;  %v695_v33 = vmul.f32 %v909_v25, %v691_v29  ;;  %v696_v34 = vmul.f32 %v910_v26, %v692_v30  ;;  %v697_v35 = vmul.f32 %v911_v27, %v693_v31 }
 0x139   : > { %v698_v36 = vmul.f32 %v694_v32, %v694_v32  ;;  %v699_v37 = vmul.f32 %v695_v33, %v695_v33  ;;  %v700_v38 = vmul.f32 %v696_v34, %v696_v34  ;;  %v701_v40 = vmul.f32 %v697_v35, %v697_v35 }
 0x13b   : > { %v702_v39 = vadd.f32 %v699_v37, %v698_v36 }
 0x13d   : > { %v703_v41 = vadd.f32 %v702_v39, %v700_v38 }
 0x13f   : > { %v704_v42 = vadd.f32 %v703_v41, %v701_v40 }
 0x141   : > { %v705_v43 = vrot.slane %v704_v42, 4 }
 0x143   : > { %v706_v44 = vadd.f32 %v705_v43, %v704_v42 }
 0x145   : > { %v707_v45 = vrot.slane %v706_v44, 2 }
 0x147   : > { %v708_v46 = vadd.f32 %v707_v45, %v706_v44 }
 0x149   : > { %v709_v47 = vrot.slane %v708_v46, 1 }
 0x14b   : > { %v710_v48 = vadd.f32 %v709_v47, %v708_v46 }
 0x14d   : > { %v711_v49 = vmul.f32 %v710_v48, %v670_v20 }
 0x14f   : > { %v712_v50 = vadd.f32 1e-05, %v711_v49 }
 0x151   : > { %1052 = vrsqrt.f32 %v712_v50 }
 0x15b   : > { %v1053_v51 = vpop.eup %1052 }
 0x15c   : > { %v714_v53 = vmul.f32 %v1053_v51, %v690_v28  ;;  %v715_v54 = vmul.f32 %v1053_v51, %v691_v29  ;;  %v716_v55 = vmul.f32 %v1053_v51, %v692_v30  ;;  %v717_v56 = vmul.f32 %v1053_v51, %v693_v31 }
 0x15e   : > { %v725_v58 = vmul.f32 %v912_v52, %v714_v53  ;;  %v726_v59 = vmul.f32 %v912_v52, %v715_v54  ;;  %v727_v60 = vmul.f32 %v912_v52, %v716_v55  ;;  %v728_v61 = vmul.f32 %v912_v52, %v717_v56 }
 0x160   : > { %v736_v62 = vadd.f32 %v913_v57, %v725_v58  ;;  %v737_v63 = vadd.f32 %v913_v57, %v726_v59  ;;  %v738_v0 = vadd.f32 %v913_v57, %v727_v60  ;;  %v739_v1 = vadd.f32 %v913_v57, %v728_v61 }
 0x162   : > { %vm740_vm4 = vcmp.gt.f32.partialorder %v736_v62, 0.0  ;;  %vm741_vm5 = vcmp.gt.f32.partialorder %v737_v63, 0.0  ;;  %vm742_vm6 = vcmp.gt.f32.partialorder %v738_v0, 0.0  ;;  %vm743_vm7 = vcmp.gt.f32.partialorder %v739_v1, 0.0 }
 0x163   : > { %v744_v2 = vmul.f32 0.2, %v736_v62  ;;  %v745_v3 = vmul.f32 0.2, %v737_v63  ;;  %v746_v4 = vmul.f32 0.2, %v738_v0 }
 0x164   : > { %v747_v5 = vmul.f32 0.2, %v739_v1 }
 0x165   : > { %v748_v6 = vsel %vm740_vm4, %v736_v62, %v744_v2  ;;  %v749_v7 = vsel %vm741_vm5, %v737_v63, %v745_v3  ;;  %v750_v8 = vsel %vm742_vm6, %v738_v0, %v746_v4 }
 0x166   : > { %v751_v9 = vsel %vm743_vm7, %v739_v1, %v747_v5  ;;  %v930_v10 = vpack.c.bf16 %v749_v7, %v748_v6 }
 0x167   : > { %v935_v11 = vpack.c.bf16 %v751_v9, %v750_v8 }
 0x168   : > { %931 = vst [vmem:[%s252_s19] sm:$0xff] %v930_v10  }
 0x169   : > { %937 = vst [vmem:[%s252_s19 + $0x8] sm:$0xff] %v935_v11  }
 0x16a PF: > { %s21_s23 = sadd.s32 1, %s1074_s23  }
 0x16b   : > { %p18_p9 = scmp.ge.s32.totalorder %s21_s23, 5  }
 0x16d   :  { %20 = sbr.rel (!%p18_p9) target bundleno = 16 (0x10), region = 75 }

// kernel: squeeze.0
= control target key start
LH: loop header
LB: loop body
LE: loop exit
PB: predicated region body
PF: predicated region fallthrough
CT: control target
= control target key end

     0   :  { %s220_s0 = inlined_call_operand.vmem [shape: f32[50], index: 0, kind: input, shape index: {}]   ;;  %s221_s1 = inlined_call_operand.hbm [shape: f32[2,1,5,5], index: 1, kind: output, shape index: {}]  }
   0x1   :  { %v5_v0 = vld [vmem:[%s220_s0] sm:$0x1] }
   0x2   :  { %6 = vst [vmem:[#allocation3] sm:$0x1] %v5_v0 }
   0x3   :  { %2 = vsyncpa [#allocation1], 0  ;;  %s175_s0 = smov 123   ;;  %s176_s8 = smov 113   ;;  %vm8_vm0 = vcmask 39936  }
   0x4   :  { %s177_s9 = smov 118   ;;  %s178_s10 = smov 108  }
   0x5   :  { %s179_s11 = smov 103   ;;  %s180_s12 = smov 98  }
   0x6   :  { %s181_s13 = smov 93   ;;  %s182_s14 = smov 88  }
   0x7   :  { %s183_s15 = smov 83   ;;  %s184_s16 = smov [#allocation0]  }
   0x8   :  { %s127_s17 = sshll.u32 %s184_s16, 4  ;;  %s128_s17 = int_to_ptr.vmem [resolvable:$true] %s127_s17 }
   0x9   :  { %v10_v1 = vld [vmem:[#allocation3] sm:$0x1]   ;;  %s151_s18 = scalar_lea.vmem %s128_s17, 160  ;;  %p156_p1 = scmp.lt.s32.totalorder %s128_s17, %s128_s17 }
   0xa   :  { %v22_v2 = vld [vmem:[#allocation3] sm:$0x1]   ;;  %11 = vrot.lane.b32.xlu0 %v10_v1, %s175_s0  ;;  %p152_p0 = scmp.ne.s32.totalorder %s128_s17, %s151_s18  ;;  %p157_p2 = scmp.lt.s32.totalorder %s151_s18, %s151_s18 }
   0xb   :  { %23 = vrot.lane.b32.xlu1 %v22_v2, %s176_s8  ;;  %v16_v3 = vld [vmem:[#allocation3] sm:$0x1]  }
   0xc   :  { %v28_v4 = vld [vmem:[#allocation3] sm:$0x1]   ;;  %p158_p3 = por %p157_p2, %p156_p1 }
   0xd   :  { %v7_v5 = vld [vmem:[#allocation3] sm:$0x1]  }
   0xe   :  { %9 = vst.msk [vmem:[#allocation2] sm:$0x1] %vm8_vm0, %v7_v5   ;;  %17 = vrot.lane.b32.xlu0 %v16_v3, %s177_s9  ;;  %v34_v6 = vld [vmem:[#allocation3] sm:$0x1]   ;;  %p159_p4 = pnand %p158_p3, %p152_p0 }
   0xf   :  { %29 = vrot.lane.b32.xlu1 %v28_v4, %s178_s10  ;;  %v40_v7 = vld [vmem:[#allocation3] sm:$0x1]  }
  0x10   :  { %v46_v8 = vld [vmem:[#allocation3] sm:$0x1]  }
  0x11   :  { %v52_v9 = vld [vmem:[#allocation3] sm:$0x1]  }
  0x12   :  { %35 = vrot.lane.b32.xlu0 %v34_v6, %s179_s11  ;;  %v58_v11 = vld [vmem:[#allocation3] sm:$0x1]  }
  0x13   :  { %41 = vrot.lane.b32.xlu1 %v40_v7, %s180_s12 }
  0x15   :  { %v67_v10 = vld [vmem:[#allocation2] sm:$0x1] }
  0x16   :  { %69 = vst [vmem:[#allocation0] sm:$0x1] %v67_v10  ;;  %47 = vrot.lane.b32.xlu0 %v46_v8, %s181_s13 }
  0x17   :  { %53 = vrot.lane.b32.xlu1 %v52_v9, %s182_s14 }
  0x1a   :  { %59 = vrot.lane.b32.xlu0 %v58_v11, %s183_s15 }
  0x7c   :  { %v12_v12 = vpop.permute.xlu0 %11  }
  0x7d   :  { %v24_v13 = vpop.permute.xlu1 %23   ;;  %15 = vst.msk [vmem:[#allocation2 + $0x8] sm:$0x1] %vm8_vm0, %v12_v12  }
  0x7e   :  { %27 = vst.msk [vmem:[#allocation2 + $0x18] sm:$0x1] %vm8_vm0, %v24_v13  }
  0x80   :  { %v18_v14 = vpop.permute.xlu0 %17  }
  0x81   :  { %v30_v15 = vpop.permute.xlu1 %29   ;;  %21 = vst.msk [vmem:[#allocation2 + $0x10] sm:$0x1] %vm8_vm0, %v18_v14  }
  0x82   :  { %33 = vst.msk [vmem:[#allocation2 + $0x20] sm:$0x1] %vm8_vm0, %v30_v15  }
  0x84   :  { %v71_v16 = vld [vmem:[#allocation2 + $0x8] sm:$0x1]  ;;  %v36_v18 = vpop.permute.xlu0 %35  }
  0x85   :  { %v82_v17 = vld [vmem:[#allocation2 + $0x18] sm:$0x1]  ;;  %v42_v19 = vpop.permute.xlu1 %41   ;;  %74 = vst [vmem:[#allocation0 + $0x1] sm:$0x1] %v71_v16  ;;  %39 = vst.msk [vmem:[#allocation2 + $0x28] sm:$0x1] %vm8_vm0, %v36_v18  }
  0x86   :  { %86 = vst [vmem:[#allocation0 + $0x3] sm:$0x1] %v82_v17  ;;  %45 = vst.msk [vmem:[#allocation2 + $0x30] sm:$0x1] %vm8_vm0, %v42_v19  }
  0x88   :  { %v76_v20 = vld [vmem:[#allocation2 + $0x10] sm:$0x1]  ;;  %v48_v22 = vpop.permute.xlu0 %47  }
  0x89   :  { %v88_v21 = vld [vmem:[#allocation2 + $0x20] sm:$0x1]  ;;  %v54_v23 = vpop.permute.xlu1 %53   ;;  %80 = vst [vmem:[#allocation0 + $0x2] sm:$0x1] %v76_v20  ;;  %51 = vst.msk [vmem:[#allocation2 + $0x38] sm:$0x1] %vm8_vm0, %v48_v22  }
  0x8a   :  { %92 = vst [vmem:[#allocation0 + $0x4] sm:$0x1] %v88_v21  ;;  %57 = vst.msk [vmem:[#allocation2 + $0x40] sm:$0x1] %vm8_vm0, %v54_v23  }
  0x8c   :  { %v94_v24 = vld [vmem:[#allocation2 + $0x28] sm:$0x1]  ;;  %v60_v26 = vpop.permute.xlu0 %59  }
  0x8d   :  { %v100_v25 = vld [vmem:[#allocation2 + $0x30] sm:$0x1]  ;;  %98 = vst [vmem:[#allocation0 + $0x5] sm:$0x1] %v94_v24  ;;  %63 = vst.msk [vmem:[#allocation2 + $0x48] sm:$0x1] %vm8_vm0, %v60_v26  }
  0x8e   :  { %104 = vst [vmem:[#allocation0 + $0x6] sm:$0x1] %v100_v25 }
  0x90   :  { %v106_v27 = vld [vmem:[#allocation2 + $0x38] sm:$0x1] }
  0x91   :  { %v112_v28 = vld [vmem:[#allocation2 + $0x40] sm:$0x1]  ;;  %110 = vst [vmem:[#allocation0 + $0x7] sm:$0x1] %v106_v27 }
  0x92   :  { %116 = vst [vmem:[#allocation0 + $0x8] sm:$0x1] %v112_v28 }
  0x94   :  { %v118_v29 = vld [vmem:[#allocation2 + $0x48] sm:$0x1] }
  0x95   :  { %122 = vst [vmem:[#allocation0 + $0x9] sm:$0x1] %v118_v29 }
  0x96   :  { %162 = shalt.err (!%p159_p4)
}
  0x97   :  { %s163_s21 = scalar_lea.hbm %s221_s1, 160 }
  0x98   :  { %p164_p5 = scmp.ne.s32.totalorder %s221_s1, %s163_s21  ;;  %p167_p6 = scmp.lt.u32.totalorder %s163_s21, %s221_s1 }
  0x9a   :  { %p169_p7 = pnand %p167_p6, %p164_p5 }
  0x9c   :  { %172 = shalt.err (!%p169_p7)
}
  0x9d   :  { %130 = dma.vmem_to_hbm [thread:$0]  %s128_s17, 160, %s221_s1, [#allocation1]  }
  0x9e   :  { %173 = dma.done.wait [#allocation1], 160  }
  0x9f   :  { %174 = vsyncadd [#allocation1], 4294967136 }
  0xa0   :  { %132 = vsyncpa [#allocation1], 1 }

// kernel: squeeze.28
= control target key start
LH: loop header
LB: loop body
LE: loop exit
PB: predicated region body
PF: predicated region fallthrough
CT: control target
= control target key end

     0   :  { %s146_s0 = inlined_call_operand.vmem [shape: f32[32], index: 0, kind: input, shape index: {}]   ;;  %s147_s1 = inlined_call_operand.hbm [shape: f32[2,1,4,4], index: 1, kind: output, shape index: {}]  }
   0x1   :  { %v5_v0 = vld [vmem:[%s146_s0] sm:$0x1] }
   0x2   :  { %6 = vst [vmem:[#allocation3] sm:$0x1] %v5_v0 }
   0x3   :  { %2 = vsyncpa [#allocation1], 0  ;;  %s105_s0 = smov 124   ;;  %s106_s8 = smov 116   ;;  %vm8_vm0 = vcmask 31744  }
   0x4   :  { %s107_s9 = smov 120   ;;  %s108_s10 = smov 112  }
   0x5   :  { %s109_s11 = smov 108   ;;  %s110_s12 = smov 104  }
   0x6   :  { %s111_s13 = smov 100   ;;  %s112_s14 = smov [#allocation0]  }
   0x7   :  { %s67_s15 = sshll.u32 %s112_s14, 4  ;;  %s68_s15 = int_to_ptr.vmem [resolvable:$true] %s67_s15 }
   0x8   :  { %s81_s16 = scalar_lea.vmem %s68_s15, 128  ;;  %p86_p1 = scmp.lt.s32.totalorder %s68_s15, %s68_s15 }
   0x9   :  { %v10_v1 = vld [vmem:[#allocation3] sm:$0x1]   ;;  %p82_p0 = scmp.ne.s32.totalorder %s68_s15, %s81_s16  ;;  %p87_p2 = scmp.lt.s32.totalorder %s81_s16, %s81_s16 }
   0xa   :  { %v22_v2 = vld [vmem:[#allocation3] sm:$0x1]   ;;  %11 = vrot.lane.b32.xlu0 %v10_v1, %s105_s0 }
   0xb   :  { %23 = vrot.lane.b32.xlu1 %v22_v2, %s106_s8  ;;  %v16_v3 = vld [vmem:[#allocation3] sm:$0x1]   ;;  %p88_p3 = por %p87_p2, %p86_p1 }
   0xc   :  { %v28_v4 = vld [vmem:[#allocation3] sm:$0x1]  }
   0xd   :  { %v7_v5 = vld [vmem:[#allocation3] sm:$0x1]   ;;  %p89_p4 = pnand %p88_p3, %p82_p0 }
   0xe   :  { %9 = vst.msk [vmem:[#allocation2] sm:$0x1] %vm8_vm0, %v7_v5   ;;  %17 = vrot.lane.b32.xlu0 %v16_v3, %s107_s9  ;;  %v34_v6 = vld [vmem:[#allocation3] sm:$0x1]  }
   0xf   :  { %29 = vrot.lane.b32.xlu1 %v28_v4, %s108_s10  ;;  %v40_v7 = vld [vmem:[#allocation3] sm:$0x1]  }
  0x10   :  { %v46_v8 = vld [vmem:[#allocation3] sm:$0x1]  }
  0x12   :  { %35 = vrot.lane.b32.xlu0 %v34_v6, %s109_s11 }
  0x13   :  { %41 = vrot.lane.b32.xlu1 %v40_v7, %s110_s12 }
  0x16   :  { %47 = vrot.lane.b32.xlu0 %v46_v8, %s111_s13 }
  0x7c   :  { %v12_v9 = vpop.permute.xlu0 %11  }
  0x7d   :  { %v24_v10 = vpop.permute.xlu1 %23   ;;  %15 = vst.msk [vmem:[#allocation2 + $0x1] sm:$0x1] %vm8_vm0, %v12_v9  }
  0x7e   :  { %27 = vst.msk [vmem:[#allocation2 + $0x3] sm:$0x1] %vm8_vm0, %v24_v10  }
  0x80   :  { %v18_v11 = vpop.permute.xlu0 %17  }
  0x81   :  { %v30_v12 = vpop.permute.xlu1 %29   ;;  %21 = vst.msk [vmem:[#allocation2 + $0x2] sm:$0x1] %vm8_vm0, %v18_v11  }
  0x82   :  { %33 = vst.msk [vmem:[#allocation2 + $0x8] sm:$0x1] %vm8_vm0, %v30_v12  }
  0x84   :  { %v36_v13 = vpop.permute.xlu0 %35  }
  0x85   :  { %v42_v14 = vpop.permute.xlu1 %41   ;;  %39 = vst.msk [vmem:[#allocation2 + $0x9] sm:$0x1] %vm8_vm0, %v36_v13  }
  0x86   :  { %45 = vst.msk [vmem:[#allocation2 + $0xa] sm:$0x1] %vm8_vm0, %v42_v14  }
  0x88   :  { %v48_v15 = vpop.permute.xlu0 %47   ;;  %v55_v16 = vld [vmem:[#allocation2] sm:$0xf] }
  0x89   :  { %51 = vst.msk [vmem:[#allocation2 + $0xb] sm:$0x1] %vm8_vm0, %v48_v15   ;;  %57 = vst [vmem:[#allocation0] sm:$0xf] %v55_v16 }
  0x90   :  { %v59_v17 = vld [vmem:[#allocation2 + $0x8] sm:$0xf] }
  0x91   :  { %62 = vst [vmem:[#allocation0 + $0x4] sm:$0xf] %v59_v17 }
  0x92   :  { %92 = shalt.err (!%p89_p4)
}
  0x93   :  { %s93_s19 = scalar_lea.hbm %s147_s1, 128 }
  0x94   :  { %p94_p5 = scmp.ne.s32.totalorder %s147_s1, %s93_s19  ;;  %p97_p6 = scmp.lt.u32.totalorder %s93_s19, %s147_s1 }
  0x96   :  { %p99_p7 = pnand %p97_p6, %p94_p5 }
  0x98   :  { %102 = shalt.err (!%p99_p7)
}
  0x99   :  { %70 = dma.vmem_to_hbm [thread:$0]  %s68_s15, 128, %s147_s1, [#allocation1]  }
  0x9a   :  { %103 = dma.done.wait [#allocation1], 128  }
  0x9b   :  { %104 = vsyncadd [#allocation1], 4294967168 }
  0x9c   :  { %72 = vsyncpa [#allocation1], 1 }

// kernel: multiscale_discriminator_forward.9
= control target key start
LH: loop header
LB: loop body
LE: loop exit
PB: predicated region body
PF: predicated region fallthrough
CT: control target
= control target key end

     0   :  { %s1634_s12 = smov 0   ;;  %s1794_s0 = inlined_call_operand.vmem [shape: bf16[3,64,1024], index: 0, kind: input, shape index: {}]   ;;  %s1795_s1 = inlined_call_operand.vmem [shape: bf16[3,1024,128], index: 1, kind: input, shape index: {}]   ;;  %s1796_s2 = inlined_call_operand.vmem [shape: f32[3,1,128], index: 2, kind: input, shape index: {}]   ;;  %s1797_s3 = inlined_call_operand.vmem [shape: f32[3,64,128], index: 3, kind: output, shape index: {}]  }
   0x1 LB: > { %s1261_s13 = sadd.s32 4294967295, %s1612_s12   ;;  %p1265_p0 = scmp.ge.s32.totalorder %s1612_s12, 1  ;;  %s1612_s12 = sphi %s1634_s12, %s13_s12  }
   0x2   : > { %p155_p1 = scmp.lt.s32.totalorder %s1612_s12, 4 }
   0x4   : > { %p156_p2 = pnand %p1265_p0, %p155_p1 }
   0x5   : > { %p187_p3 = scmp.lt.s32.totalorder (!%p156_p2), %s1261_s13, 2 }
   0x6   : > { %159 = sbr.rel (%p156_p2) target bundleno = 328 (0x148), region = 32 }
   0xd   : > { %s1799_s13 = smov (!%p187_p3, %s1261_s13), 2 }
   0xe   : > { %s1372_s14 = sshll.u32 %s1799_s13, 9  ;;  %s1371_s18 = sshll.u32 %s1799_s13, 8 }
   0xf   : > { %s1648_s17 = scalar_lea.vmem %s1795_s1, %s1372_s14  ;;  %s1684_s21 = scalar_lea.vmem %s1794_s0, %s1371_s18 }
  0x10   : > { %v1542_v0 = vld [vmem:[%s1648_s17 + $0x40] sm:$0xff]   ;;  %v1546_v4 = vld [vmem:[%s1648_s17 + $0x48] sm:$0xff]   ;;  %v1550_v8 = vld [vmem:[%s1648_s17 + $0x50] sm:$0xff]   ;;  %s199_s24 = scalar_lea.vmem %s1796_s2, %s1799_s13  ;;  %s1373_s25 = sshll.u32 %s1799_s13, 6 }
  0x11   : > { %v1543_v1 = vld [vmem:[%s1648_s17 + $0xc0] sm:$0xff]   ;;  %1374 = vmatprep.subr.bf16.mxu0 %v1542_v0  ;;  %v1547_v5 = vld [vmem:[%s1648_s17 + $0xc8] sm:$0xff]   ;;  %v1551_v9 = vld [vmem:[%s1648_s17 + $0xd0] sm:$0xff]   ;;  %s1774_s28 = scalar_lea.vmem %s1797_s3, %s1373_s25 }
  0x12   : > { %v1544_v2 = vld [vmem:[%s1648_s17] sm:$0xff]   ;;  %1414 = vmatprep.subr.bf16.mxu1 %v1543_v1  ;;  %v1548_v6 = vld [vmem:[%s1648_s17 + $0x8] sm:$0xff]   ;;  %v1552_v10 = vld [vmem:[%s1648_s17 + $0x10] sm:$0xff]  }
  0x13   : > { %v1545_v3 = vld [vmem:[%s1648_s17 + $0x80] sm:$0xff]   ;;  %1375 = vmatpush3.bf16.msra.mxu0 %v1544_v2  ;;  %v1549_v7 = vld [vmem:[%s1648_s17 + $0x88] sm:$0xff]   ;;  %v1553_v11 = vld [vmem:[%s1648_s17 + $0x90] sm:$0xff]  }
  0x14   : > { %1415 = vmatpush3.bf16.msra.mxu1 %v1545_v3  ;;  %1376 = vmatprep.subr.bf16.mxu0 %v1546_v4  ;;  %v1554_v12 = vld [vmem:[%s1648_s17 + $0x58] sm:$0xff]   ;;  %v1558_v16 = vld [vmem:[%s1648_s17 + $0x60] sm:$0xff]   ;;  %v1562_v20 = vld [vmem:[%s1648_s17 + $0x68] sm:$0xff]  }
  0x15   : > { %1416 = vmatprep.subr.bf16.mxu1 %v1547_v5  ;;  %v1555_v13 = vld [vmem:[%s1648_s17 + $0xd8] sm:$0xff]   ;;  %v1559_v17 = vld [vmem:[%s1648_s17 + $0xe0] sm:$0xff]   ;;  %v1563_v21 = vld [vmem:[%s1648_s17 + $0xe8] sm:$0xff]  }
  0x16   : > { %v1556_v14 = vld [vmem:[%s1648_s17 + $0x18] sm:$0xff]   ;;  %v1560_v18 = vld [vmem:[%s1648_s17 + $0x20] sm:$0xff]   ;;  %v1564_v22 = vld [vmem:[%s1648_s17 + $0x28] sm:$0xff]  }
  0x17   : > { %1377 = vmatpush3.bf16.msra.mxu0 %v1548_v6  ;;  %v1557_v15 = vld [vmem:[%s1648_s17 + $0x98] sm:$0xff]   ;;  %v1561_v19 = vld [vmem:[%s1648_s17 + $0xa0] sm:$0xff]   ;;  %v1565_v23 = vld [vmem:[%s1648_s17 + $0xa8] sm:$0xff]  }
  0x18   : > { %1417 = vmatpush3.bf16.msra.mxu1 %v1549_v7  ;;  %1378 = vmatprep.subr.bf16.mxu0 %v1550_v8  ;;  %v1566_v24 = vld [vmem:[%s1648_s17 + $0x70] sm:$0xff]   ;;  %v1570_v28 = vld [vmem:[%s1648_s17 + $0x78] sm:$0xff]   ;;  %v206_v32 = vld [vmem:[%s1684_s21] sm:$0xff] }
  0x19   : > { %1418 = vmatprep.subr.bf16.mxu1 %v1551_v9  ;;  %v1567_v25 = vld [vmem:[%s1648_s17 + $0xf0] sm:$0xff]   ;;  %v1571_v29 = vld [vmem:[%s1648_s17 + $0xf8] sm:$0xff]   ;;  %v210_v33 = vld [vmem:[%s1684_s21 + $0x20] sm:$0xff] }
  0x1a   : > { %v1568_v26 = vld [vmem:[%s1648_s17 + $0x30] sm:$0xff]   ;;  %v1572_v30 = vld [vmem:[%s1648_s17 + $0x38] sm:$0xff]   ;;  %v207_v34 = vld [vmem:[%s1684_s21 + $0x8] sm:$0xff]  ;;  %v1273_v35 = vcombine.low %v206_v32, %v210_v33  ;;  %v1274_v36 = vcombine.high %v206_v32, %v210_v33 }
  0x1b   : > { %1379 = vmatpush3.bf16.msra.mxu0 %v1552_v10  ;;  %v1569_v27 = vld [vmem:[%s1648_s17 + $0xb0] sm:$0xff]   ;;  %v1573_v31 = vld [vmem:[%s1648_s17 + $0xb8] sm:$0xff]   ;;  %v211_v37 = vld [vmem:[%s1684_s21 + $0x28] sm:$0xff] }
  0x1c   : > { %1419 = vmatpush3.bf16.msra.mxu1 %v1553_v11  ;;  %1380 = vmatprep.subr.bf16.mxu0 %v1554_v12  ;;  %v1275_v38 = vcombine.low %v207_v34, %v211_v37  ;;  %v1276_v39 = vcombine.high %v207_v34, %v211_v37  ;;  %v1574_v40 = vld [vmem:[%s1648_s17 + $0x140] sm:$0xff]   ;;  %v1578_v44 = vld [vmem:[%s1648_s17 + $0x148] sm:$0xff]   ;;  %v1582_v56 = vld [vmem:[%s1648_s17 + $0x150] sm:$0xff]  }
  0x1d   : > { %1420 = vmatprep.subr.bf16.mxu1 %v1555_v13  ;;  %949 = vmatprep.mubr.bf16.mxu0 %v1274_v36  ;;  %v1575_v41 = vld [vmem:[%s1648_s17 + $0x1c0] sm:$0xff]   ;;  %v1579_v45 = vld [vmem:[%s1648_s17 + $0x1c8] sm:$0xff]   ;;  %v1583_v57 = vld [vmem:[%s1648_s17 + $0x1d0] sm:$0xff]  }
  0x1e   : > { %1014 = vmatprep.mubr.bf16.mxu1 %v1276_v39  ;;  %v1576_v42 = vld [vmem:[%s1648_s17 + $0x100] sm:$0xff]   ;;  %v1580_v46 = vld [vmem:[%s1648_s17 + $0x108] sm:$0xff]   ;;  %v1584_v58 = vld [vmem:[%s1648_s17 + $0x110] sm:$0xff]  }
  0x1f   : > { %1381 = vmatpush3.bf16.msra.mxu0 %v1556_v14  ;;  %v1577_v43 = vld [vmem:[%s1648_s17 + $0x180] sm:$0xff]   ;;  %v1581_v47 = vld [vmem:[%s1648_s17 + $0x188] sm:$0xff]   ;;  %v1585_v59 = vld [vmem:[%s1648_s17 + $0x190] sm:$0xff]  }
  0x20   : > { %1421 = vmatpush3.bf16.msra.mxu1 %v1557_v15  ;;  %1382 = vmatprep.subr.bf16.mxu0 %v1558_v16  ;;  %v214_v48 = vld [vmem:[%s1684_s21 + $0x40] sm:$0xff]  ;;  %v215_v51 = vld [vmem:[%s1684_s21 + $0x48] sm:$0xff]  ;;  %v1586_v60 = vld [vmem:[%s1648_s17 + $0x158] sm:$0xff]  }
  0x21   : > { %1422 = vmatprep.subr.bf16.mxu1 %v1559_v17  ;;  %v218_v49 = vld [vmem:[%s1684_s21 + $0x60] sm:$0xff]  ;;  %v219_v52 = vld [vmem:[%s1684_s21 + $0x68] sm:$0xff]  ;;  %v1587_v61 = vld [vmem:[%s1648_s17 + $0x1d8] sm:$0xff]  }
  0x22   : > { %v1282_v50 = vcombine.high %v214_v48, %v218_v49  ;;  %v1281_v53 = vcombine.low %v214_v48, %v218_v49  ;;  %v1284_v54 = vcombine.high %v215_v51, %v219_v52  ;;  %v1283_v55 = vcombine.low %v215_v51, %v219_v52  ;;  %v1588_v62 = vld [vmem:[%s1648_s17 + $0x118] sm:$0xff]   ;;  %v222_v0 = vld [vmem:[%s1684_s21 + $0x80] sm:$0xff]  ;;  %v223_v2 = vld [vmem:[%s1684_s21 + $0x88] sm:$0xff] }
  0x23   : > { %1383 = vmatpush3.bf16.msra.mxu0 %v1560_v18  ;;  %v1589_v63 = vld [vmem:[%s1648_s17 + $0x198] sm:$0xff]   ;;  %v226_v1 = vld [vmem:[%s1684_s21 + $0xa0] sm:$0xff]  ;;  %v227_v3 = vld [vmem:[%s1684_s21 + $0xa8] sm:$0xff] }
  0x24   : > { %1423 = vmatpush3.bf16.msra.mxu1 %v1561_v19  ;;  %1384 = vmatprep.subr.bf16.mxu0 %v1562_v20  ;;  %v1290_v4 = vcombine.high %v222_v0, %v226_v1  ;;  %v1292_v5 = vcombine.high %v223_v2, %v227_v3  ;;  %v1289_v6 = vcombine.low %v222_v0, %v226_v1  ;;  %v1590_v8 = vld [vmem:[%s1648_s17 + $0x160] sm:$0xff]   ;;  %v1594_v12 = vld [vmem:[%s1648_s17 + $0x168] sm:$0xff]   ;;  %v208_v32 = vld [vmem:[%s1684_s21 + $0x10] sm:$0xff] }
  0x25   : > { %1424 = vmatprep.subr.bf16.mxu1 %v1563_v21  ;;  %v1291_v7 = vcombine.low %v223_v2, %v227_v3  ;;  %v1591_v9 = vld [vmem:[%s1648_s17 + $0x1e0] sm:$0xff]   ;;  %v1595_v13 = vld [vmem:[%s1648_s17 + $0x1e8] sm:$0xff]   ;;  %v212_v33 = vld [vmem:[%s1684_s21 + $0x30] sm:$0xff] }
  0x26   : > { %v1592_v10 = vld [vmem:[%s1648_s17 + $0x120] sm:$0xff]   ;;  %v1596_v14 = vld [vmem:[%s1648_s17 + $0x128] sm:$0xff]   ;;  %v1277_v34 = vcombine.low %v208_v32, %v212_v33  ;;  %v209_v36 = vld [vmem:[%s1684_s21 + $0x18] sm:$0xff] }
  0x27   : > { %1385 = vmatpush3.bf16.msra.mxu0 %v1564_v22  ;;  %v1593_v11 = vld [vmem:[%s1648_s17 + $0x1a0] sm:$0xff]   ;;  %v1597_v15 = vld [vmem:[%s1648_s17 + $0x1a8] sm:$0xff]   ;;  %v213_v37 = vld [vmem:[%s1684_s21 + $0x38] sm:$0xff] }
  0x28   : > { %1425 = vmatpush3.bf16.msra.mxu1 %v1565_v23  ;;  %1386 = vmatprep.subr.bf16.mxu0 %v1566_v24  ;;  %v230_v16 = vld [vmem:[%s1684_s21 + $0xc0] sm:$0xff]  ;;  %v231_v18 = vld [vmem:[%s1684_s21 + $0xc8] sm:$0xff]  ;;  %v1598_v24 = vld [vmem:[%s1648_s17 + $0x170] sm:$0xff]   ;;  %v1279_v39 = vcombine.low %v209_v36, %v213_v37 }
  0x29   : > { %1426 = vmatprep.subr.bf16.mxu1 %v1567_v25  ;;  %v234_v17 = vld [vmem:[%s1684_s21 + $0xe0] sm:$0xff]  ;;  %v235_v20 = vld [vmem:[%s1684_s21 + $0xe8] sm:$0xff]  ;;  %v1599_v25 = vld [vmem:[%s1648_s17 + $0x1f0] sm:$0xff]  }
  0x2a   : > { %v1298_v19 = vcombine.high %v230_v16, %v234_v17  ;;  %v1297_v21 = vcombine.low %v230_v16, %v234_v17  ;;  %v1300_v22 = vcombine.high %v231_v18, %v235_v20  ;;  %v1299_v23 = vcombine.low %v231_v18, %v235_v20  ;;  %v225_v48 = vld [vmem:[%s1684_s21 + $0x98] sm:$0xff]  ;;  %v1272_v2 = vld [vmem:[%s199_s24] ss:$0 sm:$0xff] }
  0x2b   : > { %1387 = vmatpush3.bf16.msra.mxu0 %v1568_v26  ;;  %v1600_v26 = vld [vmem:[%s1648_s17 + $0x130] sm:$0xff]   ;;  %v229_v49 = vld [vmem:[%s1684_s21 + $0xb8] sm:$0xff] }
  0x2c   : > { %1427 = vmatpush3.bf16.msra.mxu1 %v1569_v27  ;;  %1388 = vmatprep.subr.bf16.mxu0 %v1570_v28  ;;  %v1601_v27 = vld [vmem:[%s1648_s17 + $0x1b0] sm:$0xff]   ;;  %v1602_v28 = vld [vmem:[%s1648_s17 + $0x178] sm:$0xff]  }
  0x2d   : > { %1428 = vmatprep.subr.bf16.mxu1 %v1571_v29  ;;  %v1603_v29 = vld [vmem:[%s1648_s17 + $0x1f8] sm:$0xff]  }
  0x2f   : > { %1389 = vmatpush3.bf16.msra.mxu0 %v1572_v30  ;;  %v1604_v30 = vld [vmem:[%s1648_s17 + $0x138] sm:$0xff]  }
  0x30   : > { %1429 = vmatpush3.bf16.msra.mxu1 %v1573_v31  ;;  %1454 = vmatprep.subr.bf16.mxu0 %v1574_v40  ;;  %v1605_v31 = vld [vmem:[%s1648_s17 + $0x1b8] sm:$0xff]   ;;  %v1280_v40 = vcombine.high %v209_v36, %v213_v37 }
  0x31   : > { %1494 = vmatprep.subr.bf16.mxu1 %v1575_v41  ;;  %v220_v41 = vld [vmem:[%s1684_s21 + $0x70] sm:$0xff] }
  0x32   : > { %950 = vmatmul.mubr.bf16.vlgmr.msra.gmra.mrb[0].mxu0 %v1273_v35  ;;  %v1278_v35 = vcombine.high %v208_v32, %v212_v33 }
  0x33   : > { %1015 = vmatmul.mubr.bf16.vlgmr.msra.gmra.mrb[0].mxu1 %v1275_v38  ;;  %1455 = vmatpush3.bf16.msra.mxu0 %v1576_v42  ;;  %v216_v38 = vld [vmem:[%s1684_s21 + $0x50] sm:$0xff]  ;;  %v217_v42 = vld [vmem:[%s1684_s21 + $0x58] sm:$0xff] }
  0x34   : > { %1495 = vmatpush3.bf16.msra.mxu1 %v1577_v43  ;;  %1456 = vmatprep.subr.bf16.mxu0 %v1578_v44  ;;  %v221_v43 = vld [vmem:[%s1684_s21 + $0x78] sm:$0xff]  ;;  %v1286_v44 = vcombine.high %v216_v38, %v220_v41 }
  0x35   : > { %1496 = vmatprep.subr.bf16.mxu1 %v1579_v45  ;;  %957 = vmatprep.mubr.bf16.mxu0 %v1282_v50  ;;  %v1288_v45 = vcombine.high %v217_v42, %v221_v43  ;;  %v1285_v50 = vcombine.low %v216_v38, %v220_v41  ;;  %v1287_v51 = vcombine.low %v217_v42, %v221_v43 }
  0x36   : > { %1022 = vmatprep.mubr.bf16.mxu1 %v1284_v54  ;;  %v232_v54 = vld [vmem:[%s1684_s21 + $0xd0] sm:$0xff] }
  0x37   : > { %1457 = vmatpush3.bf16.msra.mxu0 %v1580_v46  ;;  %v224_v46 = vld [vmem:[%s1684_s21 + $0x90] sm:$0xff] }
  0x38   : > { %1497 = vmatpush3.bf16.msra.mxu1 %v1581_v47  ;;  %1458 = vmatprep.subr.bf16.mxu0 %v1582_v56  ;;  %v228_v47 = vld [vmem:[%s1684_s21 + $0xb0] sm:$0xff]  ;;  %v233_v56 = vld [vmem:[%s1684_s21 + $0xd8] sm:$0xff] }
  0x39   : > { %1498 = vmatprep.subr.bf16.mxu1 %v1583_v57  ;;  %v1294_v52 = vcombine.high %v224_v46, %v228_v47  ;;  %v237_v57 = vld [vmem:[%s1684_s21 + $0xf8] sm:$0xff] }
  0x3a   : > { %958 = vmatmul.mubr.bf16.gmra.mrb[4].mxu0 %v1281_v53  ;;  %v1296_v53 = vcombine.high %v225_v48, %v229_v49 }
  0x3b   : > { %1023 = vmatmul.mubr.bf16.gmra.mrb[4].mxu1 %v1283_v55  ;;  %1459 = vmatpush3.bf16.msra.mxu0 %v1584_v58  ;;  %v236_v55 = vld [vmem:[%s1684_s21 + $0xf0] sm:$0xff]  ;;  %v1293_v58 = vcombine.low %v224_v46, %v228_v47 }
  0x3c   : > { %1499 = vmatpush3.bf16.msra.mxu1 %v1585_v59  ;;  %1460 = vmatprep.subr.bf16.mxu0 %v1586_v60  ;;  %v1295_v59 = vcombine.low %v225_v48, %v229_v49  ;;  %v1302_v60 = vcombine.high %v232_v54, %v236_v55 }
  0x3d   : > { %1500 = vmatprep.subr.bf16.mxu1 %v1587_v61  ;;  %965 = vmatprep.mubr.bf16.mxu0 %v1290_v4  ;;  %v1304_v61 = vcombine.high %v233_v56, %v237_v57 }
  0x3e   : > { %1030 = vmatprep.mubr.bf16.mxu1 %v1292_v5 }
  0x3f   : > { %1461 = vmatpush3.bf16.msra.mxu0 %v1588_v62  ;;  %v1301_v62 = vcombine.low %v232_v54, %v236_v55 }
  0x40   : > { %1501 = vmatpush3.bf16.msra.mxu1 %v1589_v63  ;;  %1462 = vmatprep.subr.bf16.mxu0 %v1590_v8  ;;  %v1303_v63 = vcombine.low %v233_v56, %v237_v57 }
  0x41   : > { %1502 = vmatprep.subr.bf16.mxu1 %v1591_v9 }
  0x42   : > { %966 = vmatmul.mubr.bf16.gmra.mrb[8].mxu0 %v1289_v6 }
  0x43   : > { %1031 = vmatmul.mubr.bf16.gmra.mrb[8].mxu1 %v1291_v7  ;;  %1463 = vmatpush3.bf16.msra.mxu0 %v1592_v10 }
  0x44   : > { %1503 = vmatpush3.bf16.msra.mxu1 %v1593_v11  ;;  %1464 = vmatprep.subr.bf16.mxu0 %v1594_v12 }
  0x45   : > { %1504 = vmatprep.subr.bf16.mxu1 %v1595_v13  ;;  %973 = vmatprep.mubr.bf16.mxu0 %v1298_v19 }
  0x46   : > { %1038 = vmatprep.mubr.bf16.mxu1 %v1300_v22 }
  0x47   : > { %1465 = vmatpush3.bf16.msra.mxu0 %v1596_v14 }
  0x48   : > { %1505 = vmatpush3.bf16.msra.mxu1 %v1597_v15  ;;  %1466 = vmatprep.subr.bf16.mxu0 %v1598_v24 }
  0x49   : > { %1506 = vmatprep.subr.bf16.mxu1 %v1599_v25 }
  0x4a   : > { %974 = vmatmul.mubr.bf16.gmra.mrb[12].mxu0 %v1297_v21 }
  0x4b   : > { %1039 = vmatmul.mubr.bf16.gmra.mrb[12].mxu1 %v1299_v23  ;;  %1467 = vmatpush3.bf16.msra.mxu0 %v1600_v26 }
  0x4c   : > { %1507 = vmatpush3.bf16.msra.mxu1 %v1601_v27  ;;  %1468 = vmatprep.subr.bf16.mxu0 %v1602_v28 }
  0x4d   : > { %1508 = vmatprep.subr.bf16.mxu1 %v1603_v29  ;;  %1079 = vmatprep.mubr.bf16.mxu0 %v1278_v35 }
  0x4e   : > { %1144 = vmatprep.mubr.bf16.mxu1 %v1280_v40 }
  0x4f   : > { %1469 = vmatpush3.bf16.msra.mxu0 %v1604_v30 }
  0x50   : > { %1509 = vmatpush3.bf16.msra.mxu1 %v1605_v31 }
  0x52   : > { %1080 = vmatmul.mubr.bf16.vlgmr.msra.gmra.mrb[16].mxu0 %v1277_v34 }
  0x53   : > { %1145 = vmatmul.mubr.bf16.vlgmr.msra.gmra.mrb[16].mxu1 %v1279_v39  ;;  %1087 = vmatprep.mubr.bf16.mxu0 %v1286_v44 }
  0x54   : > { %1152 = vmatprep.mubr.bf16.mxu1 %v1288_v45 }
  0x5a   : > { %1088 = vmatmul.mubr.bf16.gmra.mrb[20].mxu0 %v1285_v50 }
  0x5b   : > { %1153 = vmatmul.mubr.bf16.gmra.mrb[20].mxu1 %v1287_v51  ;;  %1095 = vmatprep.mubr.bf16.mxu0 %v1294_v52 }
  0x5c   : > { %1160 = vmatprep.mubr.bf16.mxu1 %v1296_v53 }
  0x62   : > { %1096 = vmatmul.mubr.bf16.gmra.mrb[24].mxu0 %v1293_v58 }
  0x63   : > { %1161 = vmatmul.mubr.bf16.gmra.mrb[24].mxu1 %v1295_v59  ;;  %1103 = vmatprep.mubr.bf16.mxu0 %v1302_v60 }
  0x64   : > { %1168 = vmatprep.mubr.bf16.mxu1 %v1304_v61 }
  0x6a   : > { %1104 = vmatmul.mubr.bf16.gmra.mrb[28].mxu0 %v1301_v62 }
  0x6b   : > { %1169 = vmatmul.mubr.bf16.gmra.mrb[28].mxu1 %v1303_v63 }
 0x105   : > { %v1390_v0 = vpop.f32.mrb[0].mxu0 }
 0x106   : > { %v1430_v1 = vpop.f32.mrb[0].mxu1  ;;  %v1391_v3 = vpop.f32.mrb[1].mxu0 }
 0x107   : > { %v1392_v4 = vadd.f32 %v1391_v3, %v1390_v0  ;;  %v1431_v5 = vpop.f32.mrb[1].mxu1  ;;  %v1393_v6 = vpop.f32.mrb[2].mxu0 }
 0x108   : > { %v1432_v7 = vadd.f32 %v1431_v5, %v1430_v1  ;;  %v1433_v8 = vpop.f32.mrb[2].mxu1  ;;  %v1394_v9 = vpop.f32.mrb[3].mxu0 }
 0x109   : > { %v952_v10 = vadd.f32 %v1392_v4, %v1272_v2  ;;  %v1395_v11 = vadd.f32 %v1394_v9, %v1393_v6  ;;  %v1434_v12 = vpop.f32.mrb[3].mxu1 }
 0x10a   : > { %v1435_v13 = vadd.f32 %v1434_v12, %v1433_v8 }
 0x10b   : > { %v1017_v14 = vadd.f32 %v1432_v7, %v952_v10  ;;  %v955_v15 = vadd.f32 %v1395_v11, %v1272_v2 }
 0x10d   : > { %v1756_v16 = vadd.f32 %v1435_v13, %v955_v15  ;;  %v1396_v17 = vpop.f32.mrb[4].mxu0 }
 0x10e   : > { %v1436_v18 = vpop.f32.mrb[4].mxu1  ;;  %v1397_v19 = vpop.f32.mrb[5].mxu0 }
 0x10f   : > { %v1398_v20 = vadd.f32 %v1397_v19, %v1396_v17  ;;  %v1437_v21 = vpop.f32.mrb[5].mxu1  ;;  %v1399_v22 = vpop.f32.mrb[6].mxu0 }
 0x110   : > { %v1438_v23 = vadd.f32 %v1437_v21, %v1436_v18  ;;  %v1439_v24 = vpop.f32.mrb[6].mxu1  ;;  %v1400_v25 = vpop.f32.mrb[7].mxu0 }
 0x111   : > { %v960_v26 = vadd.f32 %v1398_v20, %v1272_v2  ;;  %v1401_v27 = vadd.f32 %v1400_v25, %v1399_v22  ;;  %v1440_v28 = vpop.f32.mrb[7].mxu1 }
 0x112   : > { %v1441_v29 = vadd.f32 %v1440_v28, %v1439_v24 }
 0x113   : > { %v1758_v30 = vadd.f32 %v1438_v23, %v960_v26  ;;  %v963_v31 = vadd.f32 %v1401_v27, %v1272_v2 }
 0x115   : > { %v1760_v32 = vadd.f32 %v1441_v29, %v963_v31  ;;  %v1402_v33 = vpop.f32.mrb[8].mxu0 }
 0x116   : > { %v1442_v34 = vpop.f32.mrb[8].mxu1  ;;  %v1403_v35 = vpop.f32.mrb[9].mxu0 }
 0x117   : > { %v1443_v36 = vpop.f32.mrb[9].mxu1  ;;  %v1404_v37 = vadd.f32 %v1403_v35, %v1402_v33  ;;  %v1405_v39 = vpop.f32.mrb[10].mxu0 }
 0x118   : > { %v1444_v38 = vadd.f32 %v1443_v36, %v1442_v34  ;;  %v1445_v40 = vpop.f32.mrb[10].mxu1  ;;  %v1406_v41 = vpop.f32.mrb[11].mxu0 }
 0x119   : > { %v1446_v42 = vpop.f32.mrb[11].mxu1  ;;  %v968_v43 = vadd.f32 %v1404_v37, %v1272_v2  ;;  %v1407_v44 = vadd.f32 %v1406_v41, %v1405_v39 }
 0x11a   : > { %v1447_v45 = vadd.f32 %v1446_v42, %v1445_v40 }
 0x11b   : > { %v1762_v46 = vadd.f32 %v1444_v38, %v968_v43  ;;  %v971_v47 = vadd.f32 %v1407_v44, %v1272_v2 }
 0x11d   : > { %v1764_v48 = vadd.f32 %v1447_v45, %v971_v47  ;;  %v1408_v49 = vpop.f32.mrb[12].mxu0 }
 0x11e   : > { %v1448_v50 = vpop.f32.mrb[12].mxu1  ;;  %v1409_v51 = vpop.f32.mrb[13].mxu0 }
 0x11f   : > { %v1410_v52 = vadd.f32 %v1409_v51, %v1408_v49  ;;  %v1449_v53 = vpop.f32.mrb[13].mxu1  ;;  %v1411_v54 = vpop.f32.mrb[14].mxu0 }
 0x120   : > { %v1450_v55 = vadd.f32 %v1449_v53, %v1448_v50  ;;  %v1451_v56 = vpop.f32.mrb[14].mxu1  ;;  %v1412_v57 = vpop.f32.mrb[15].mxu0 }
 0x121   : > { %v976_v58 = vadd.f32 %v1410_v52, %v1272_v2  ;;  %v1413_v59 = vadd.f32 %v1412_v57, %v1411_v54  ;;  %v1452_v60 = vpop.f32.mrb[15].mxu1 }
 0x122   : > { %v1453_v61 = vadd.f32 %v1452_v60, %v1451_v56 }
 0x123   : > { %v1766_v62 = vadd.f32 %v1450_v55, %v976_v58  ;;  %v979_v63 = vadd.f32 %v1413_v59, %v1272_v2 }
 0x125   : > { %v1768_v0 = vadd.f32 %v1453_v61, %v979_v63  ;;  %v1470_v1 = vpop.f32.mrb[16].mxu0 }
 0x126   : > { %v1510_v3 = vpop.f32.mrb[16].mxu1  ;;  %v1471_v4 = vpop.f32.mrb[17].mxu0 }
 0x127   : > { %v1472_v5 = vadd.f32 %v1471_v4, %v1470_v1  ;;  %v1511_v6 = vpop.f32.mrb[17].mxu1  ;;  %v1473_v7 = vpop.f32.mrb[18].mxu0 }
 0x128   : > { %v1512_v8 = vadd.f32 %v1511_v6, %v1510_v3  ;;  %v1513_v9 = vpop.f32.mrb[18].mxu1  ;;  %v1474_v10 = vpop.f32.mrb[19].mxu0 }
 0x129   : > { %v1082_v11 = vadd.f32 %v1472_v5, %v1017_v14  ;;  %v1475_v12 = vadd.f32 %v1474_v10, %v1473_v7  ;;  %v1514_v13 = vpop.f32.mrb[19].mxu1 }
 0x12a   : > { %v1515_v2 = vadd.f32 %v1514_v13, %v1513_v9 }
 0x12b   : > { %v1147_v15 = vadd.f32 %v1512_v8, %v1082_v11  ;;  %v1085_v17 = vadd.f32 %v1475_v12, %v1756_v16 }
 0x12d   : > { %1177 = vst [vmem:[%s1774_s28] sm:$0xff] %v1147_v15  ;;  %v1150_v18 = vadd.f32 %v1515_v2, %v1085_v17  ;;  %v1476_v19 = vpop.f32.mrb[20].mxu0 }
 0x12e   : > { %v1516_v20 = vpop.f32.mrb[20].mxu1  ;;  %v1477_v21 = vpop.f32.mrb[21].mxu0 }
 0x12f   : > { %1178 = vst [vmem:[%s1774_s28 + $0x8] sm:$0xff] %v1150_v18  ;;  %v1478_v14 = vadd.f32 %v1477_v21, %v1476_v19  ;;  %v1517_v22 = vpop.f32.mrb[21].mxu1  ;;  %v1479_v23 = vpop.f32.mrb[22].mxu0 }
 0x130   : > { %v1518_v24 = vadd.f32 %v1517_v22, %v1516_v20  ;;  %v1519_v25 = vpop.f32.mrb[22].mxu1  ;;  %v1480_v26 = vpop.f32.mrb[23].mxu0 }
 0x131   : > { %v1090_v27 = vadd.f32 %v1478_v14, %v1758_v30  ;;  %v1481_v28 = vadd.f32 %v1480_v26, %v1479_v23  ;;  %v1520_v29 = vpop.f32.mrb[23].mxu1 }
 0x132   : > { %v1521_v31 = vadd.f32 %v1520_v29, %v1519_v25 }
 0x133   : > { %v1155_v16 = vadd.f32 %v1518_v24, %v1090_v27  ;;  %v1093_v33 = vadd.f32 %v1481_v28, %v1760_v32 }
 0x135   : > { %1179 = vst [vmem:[%s1774_s28 + $0x10] sm:$0xff] %v1155_v16  ;;  %v1158_v34 = vadd.f32 %v1521_v31, %v1093_v33  ;;  %v1482_v35 = vpop.f32.mrb[24].mxu0 }
 0x136   : > { %v1522_v36 = vpop.f32.mrb[24].mxu1  ;;  %v1483_v37 = vpop.f32.mrb[25].mxu0 }
 0x137   : > { %1180 = vst [vmem:[%s1774_s28 + $0x18] sm:$0xff] %v1158_v34  ;;  %v1484_v38 = vadd.f32 %v1483_v37, %v1482_v35  ;;  %v1523_v39 = vpop.f32.mrb[25].mxu1  ;;  %v1485_v40 = vpop.f32.mrb[26].mxu0 }
 0x138   : > { %v1524_v41 = vadd.f32 %v1523_v39, %v1522_v36  ;;  %v1525_v42 = vpop.f32.mrb[26].mxu1  ;;  %v1486_v30 = vpop.f32.mrb[27].mxu0 }
 0x139   : > { %v1098_v43 = vadd.f32 %v1484_v38, %v1762_v46  ;;  %v1487_v44 = vadd.f32 %v1486_v30, %v1485_v40  ;;  %v1526_v45 = vpop.f32.mrb[27].mxu1 }
 0x13a   : > { %v1527_v47 = vadd.f32 %v1526_v45, %v1525_v42 }
 0x13b   : > { %v1163_v32 = vadd.f32 %v1524_v41, %v1098_v43  ;;  %v1101_v49 = vadd.f32 %v1487_v44, %v1764_v48 }
 0x13d   : > { %1181 = vst [vmem:[%s1774_s28 + $0x20] sm:$0xff] %v1163_v32  ;;  %v1166_v50 = vadd.f32 %v1527_v47, %v1101_v49  ;;  %v1488_v51 = vpop.f32.mrb[28].mxu0 }
 0x13e   : > { %v1528_v52 = vpop.f32.mrb[28].mxu1  ;;  %v1489_v53 = vpop.f32.mrb[29].mxu0 }
 0x13f   : > { %1182 = vst [vmem:[%s1774_s28 + $0x28] sm:$0xff] %v1166_v50  ;;  %v1490_v54 = vadd.f32 %v1489_v53, %v1488_v51  ;;  %v1529_v55 = vpop.f32.mrb[29].mxu1  ;;  %v1491_v56 = vpop.f32.mrb[30].mxu0 }
 0x140   : > { %v1530_v57 = vadd.f32 %v1529_v55, %v1528_v52  ;;  %v1531_v58 = vpop.f32.mrb[30].mxu1  ;;  %v1492_v46 = vpop.f32.mrb[31].mxu0 }
 0x141   : > { %v1106_v59 = vadd.f32 %v1490_v54, %v1766_v62  ;;  %v1493_v60 = vadd.f32 %v1492_v46, %v1491_v56  ;;  %v1532_v61 = vpop.f32.mrb[31].mxu1 }
 0x142   : > { %v1533_v63 = vadd.f32 %v1532_v61, %v1531_v58 }
 0x143   : > { %v1171_v48 = vadd.f32 %v1530_v57, %v1106_v59  ;;  %v1109_v1 = vadd.f32 %v1493_v60, %v1768_v0 }
 0x145   : > { %1183 = vst [vmem:[%s1774_s28 + $0x30] sm:$0xff] %v1171_v48  ;;  %v1174_v3 = vadd.f32 %v1533_v63, %v1109_v1 }
 0x147   : > { %1184 = vst [vmem:[%s1774_s28 + $0x38] sm:$0xff] %v1174_v3 }
 0x148 PF: > { %s13_s12 = sadd.s32 1, %s1612_s12  }
 0x149   : > { %p10_p4 = scmp.ge.s32.totalorder %s13_s12, 5  }
 0x14b   :  { %12 = sbr.rel (!%p10_p4) target bundleno = 1 (0x1), region = 68 }

</bundles_post_ra>
